<compile_context>
chip_gen: v6e
topology: v6e:2x2x1
jax: 0.10.0
libtpu: 0.0.40
codegen_flags: <defaults>
</compile_context>

<pallas_src>
import functools

import jax
import jax.numpy as jnp
from jax import lax
from jax.experimental import pallas as pl
from jax.experimental.pallas import tpu as pltpu

TAU = 0.4
EPS = 1e-12  # F.normalize eps


def projection(z):
    """'b c h w -> b (h w) c'"""
    b, c, h, w = z.shape
    return jnp.transpose(z, (0, 2, 3, 1)).reshape(b, h * w, c)


def _l2_normalize(x):
    """F.normalize(x, dim=-1): x / max(||x||_2, eps)."""
    ss = jnp.sum(x * x, axis=-1, keepdims=True)
    return x * (1.0 / jnp.maximum(jnp.sqrt(ss), EPS))


def _contrastive_kernel(h1q_ref, h1k_ref, h2q_ref, h2k_ref, out_ref,
                        acc1_ref, acc2_ref, diag_ref, *, tau, use_bf16):
    """Grid: (batch, query-tile, key-tile); key tiles stream innermost.

    Blocks (inputs are already L2-normalized, lane-padded f32):
      h?q_ref : (1, T, C)   query tile of h1 / h2
      h?k_ref : (1, T, C)   key tile of h1 / h2
      out_ref : (1, NT, T)  per-token loss for the whole batch row (lane-dense)
    Scratch (live across the (q, k) sub-grid of one batch):
      acc1_ref: (NT, T)  sum_j e11 + sum_j e12 - e11_ii   (denominator of l1)
      acc2_ref: (NT, T)  sum_j e22 + sum_j e21 - e22_ii   (denominator of l2)
      diag_ref: (NT, T)  s12_ii / tau  (= log numerator of both semi-losses)
    """
    q = pl.program_id(1)
    k = pl.program_id(2)
    inv_tau = 1.0 / tau

    @pl.when(jnp.logical_and(q == 0, k == 0))
    def _init():
        acc1_ref[...] = jnp.zeros_like(acc1_ref)
        acc2_ref[...] = jnp.zeros_like(acc2_ref)

    # Inputs arrive pre-normalized (normalization hoisted to the wrapper).
    n1q = h1q_ref[0]
    n2q = h2q_ref[0]
    n1k = h1k_ref[0]
    n2k = h2k_ref[0]

    if use_bf16:
        a1q, a2q = n1q.astype(jnp.bfloat16), n2q.astype(jnp.bfloat16)
        a1k, a2k = n1k.astype(jnp.bfloat16), n2k.astype(jnp.bfloat16)
    else:
        a1q, a2q, a1k, a2k = n1q, n2q, n1k, n2k

    # Scores in (key, query) orientation so per-query reductions are cross-
    # sublane (axis 0) and land lane-major, matching the accumulator layout.
    ddn = (((1,), (1,)), ((), ()))   # contract the trailing dim of both operands
    s11 = lax.dot_general(a1k, a1q, ddn, preferred_element_type=jnp.float32)
    s12 = lax.dot_general(a2k, a1q, ddn, preferred_element_type=jnp.float32)
    s22 = lax.dot_general(a2k, a2q, ddn, preferred_element_type=jnp.float32)

    e11 = jnp.exp(s11 * inv_tau)   # (Tk, Tq)
    e12 = jnp.exp(s12 * inv_tau)   # e12[a, b] = exp(<n1_q[b], n2_k[a]>/tau)
    e22 = jnp.exp(s22 * inv_tau)

    # Per-query partial row sums over this key tile (lane-major (1, T)).
    acc1_ref[pl.ds(q, 1), :] += (jnp.sum(e11, axis=0, keepdims=True) +
                                 jnp.sum(e12, axis=0, keepdims=True))
    acc2_ref[pl.ds(q, 1), :] += jnp.sum(e22, axis=0, keepdims=True)

    # s21 == s12^T, so the row sums of exp(s21/tau) are column sums of e12.
    # Reduce the query (lane) axis with a ones-matvec so the result stays
    # lane-major, and accumulate it at the *key* tile's positions.  This
    # replaces the 4th matmul + 4th N^2 exp of the naive formulation.
    # NOTE: relies on the q/k grid axes being sequential ("arbitrary").
    ones_q = jnp.ones((1, e12.shape[1]), jnp.float32)
    r21 = lax.dot_general(ones_q, e12, ddn, preferred_element_type=jnp.float32)  # (1, Tk)
    acc2_ref[pl.ds(k, 1), :] += r21

    @pl.when(k == 0)
    def _diagonals():
        # Exact diagonals in f32 (kept instead of the exp(1/tau) constant so
        # the F.normalize eps behaviour for all-zero rows matches PyTorch
        # exactly).  ones-matvecs keep these per-query vectors lane-major.
        ones_c = jnp.ones((1, n1q.shape[1]), jnp.float32)
        d11 = jnp.exp(lax.dot_general(ones_c, n1q * n1q, ddn,
                                      preferred_element_type=jnp.float32) * inv_tau)
        d22 = jnp.exp(lax.dot_general(ones_c, n2q * n2q, ddn,
                                      preferred_element_type=jnp.float32) * inv_tau)
        s12d = lax.dot_general(ones_c, n1q * n2q, ddn,
                               preferred_element_type=jnp.float32) * inv_tau
        acc1_ref[pl.ds(q, 1), :] -= d11
        acc2_ref[pl.ds(q, 1), :] -= d22
        diag_ref[pl.ds(q, 1), :] = s12d

    @pl.when(jnp.logical_and(q == pl.num_programs(1) - 1,
                             k == pl.num_programs(2) - 1))
    def _finalize():
        # l1 = log(denom1) - s12_ii/tau ; l2 = log(denom2) - s12_ii/tau
        loss = 0.5 * (jnp.log(acc1_ref[...]) + jnp.log(acc2_ref[...])) - diag_ref[...]
        out_ref[0] = loss.astype(out_ref.dtype)


def _vmem_budget_bytes():
    """Generation-aware VMEM budget (~60% of capacity, capped at 96 MiB)."""
    cap = 64 * 1024 * 1024  # conservative fallback (v7x per-TC capacity)
    try:
        info = pltpu.get_tpu_info()
        for attr in ("vmem_capacity_bytes", "vmem_bytes", "vmem_size_bytes"):
            v = getattr(info, attr, None)
            if v:
                cap = int(v)
                break
    except Exception:
        pass
    return min((cap * 3) // 5, 96 * 1024 * 1024)


def _tile_vmem_bytes(t, c, n):
    """Rough per-call VMEM footprint estimate for token tile `t`."""
    nt = n // t
    inputs = 4 * 2 * t * c * 4        # four (1,T,C) f32 blocks, double-buffered
    out = 2 * nt * t * 4              # (1,NT,T) f32 output block, double-buffered
    scratch = 3 * nt * t * 4          # acc1 / acc2 / diag
    temps = 8 * t * t * 4             # 3 scores + 3 exps + slack (T x T f32)
    return inputs + out + scratch + temps


def _pick_tile(n, c, budget, max_tile=1024):
    """Largest token tile (multiple of 128, or all of n) dividing n that fits."""
    cands = set()
    if n <= max_tile:
        cands.add(n)
    t = min(max_tile, (n // 128) * 128)
    while t >= 128:
        if n % t == 0:
            cands.add(t)
        t -= 128
    if not cands:
        # TODO(synk): ragged N > max_tile with no 128-multiple divisor can
        # exceed the VMEM budget; pad/mask N upstream if this ever triggers.
        cands.add(n)
    for t in sorted(cands, reverse=True):
        if _tile_vmem_bytes(t, c, n) <= budget:
            return t
    return min(cands)


def contrastive_loss(z1, z2, *, tau=TAU, mean=True, tile=None,
                     use_bf16_matmul=False):
    h1 = projection(z1).astype(jnp.float32)
    h2 = projection(z2).astype(jnp.float32)
    B, N, C = h1.shape

    # Hoist the L2 normalization out of the NT^2 inner loop: O(B*N*C) once in
    # the wrapper instead of 4x per grid step inside the kernel.
    h1 = _l2_normalize(h1)
    h2 = _l2_normalize(h2)

    # Lane density: zero-pad C to a multiple of 128 (>=128).  Zero columns
    # change neither the (already applied) norms nor any dot product, but keep
    # every block, vreg and DMA dense on the lane axis.
    C_pad = max(128, ((C + 127) // 128) * 128)
    if C_pad != C:
        pad = [(0, 0), (0, 0), (0, C_pad - C)]
        h1 = jnp.pad(h1, pad)
        h2 = jnp.pad(h2, pad)
        C = C_pad

    budget = _vmem_budget_bytes()
    T = _pick_tile(N, C, budget) if tile is None else int(tile)
    assert N % T == 0 and (T == N or T % 128 == 0), (N, T)
    NT = N // T

    kernel = functools.partial(_contrastive_kernel, tau=float(tau),
                               use_bf16=bool(use_bf16_matmul))

    # Advisory cost estimate (includes the NT-fold re-read of the key tiles).
    flops = 2 * B * N * N * (3 * C + 1)             # 3 score matmuls + ones-matvec
    transcendentals = 3 * B * N * N                 # three NxN exps dominate
    bytes_accessed = (2 * B * N * C * 4             # query side (revisited blocks)
                      + 2 * B * NT * N * C * 4      # key side, re-read NT times
                      + B * N * 4)                  # output

    per_token = pl.pallas_call(
        kernel,
        out_shape=jax.ShapeDtypeStruct((B, NT, T), jnp.float32),
        grid_spec=pltpu.PrefetchScalarGridSpec(
            num_scalar_prefetch=0,
            grid=(B, NT, NT),
            in_specs=[
                # NOTE: query blocks only change every NT steps; keeping the
                # default double-buffering here is cheap since C is lane-padded
                # and T is VMEM-budgeted (Buffered(1) would save 2*T*C*4 B each).
                pl.BlockSpec((1, T, C), lambda b, q, k: (b, q, 0)),  # h1 query tile
                pl.BlockSpec((1, T, C), lambda b, q, k: (b, k, 0)),  # h1 key tile
                pl.BlockSpec((1, T, C), lambda b, q, k: (b, q, 0)),  # h2 query tile
                pl.BlockSpec((1, T, C), lambda b, q, k: (b, k, 0)),  # h2 key tile
            ],
            out_specs=pl.BlockSpec((1, NT, T), lambda b, q, k: (b, 0, 0)),
            scratch_shapes=[
                pltpu.VMEM((NT, T), jnp.float32),   # acc1 (denominator of l1)
                pltpu.VMEM((NT, T), jnp.float32),   # acc2 (denominator of l2)
                pltpu.VMEM((NT, T), jnp.float32),   # diag (s12_ii / tau)
            ],
        ),
        compiler_params=pltpu.CompilerParams(
            # Batch axis parallel (feeds both TCs on megacore parts).  The two
            # tile axes carry running accumulators (incl. cross-q scatters into
            # key-tile rows of acc2) so they MUST stay arbitrary/sequential.
            dimension_semantics=("parallel", "arbitrary", "arbitrary"),
            vmem_limit_bytes=int(budget),
        ),
        cost_estimate=pl.CostEstimate(
            flops=int(flops),
            transcendentals=int(transcendentals),
            bytes_accessed=int(bytes_accessed),
        ),
    )(h1, h1, h2, h2)

    ret = per_token.reshape(B, N)
    return ret.mean() if mean else ret.sum()


def _reference_loss(z1, z2, tau=TAU, mean=True):
    """Pure-JAX reference mirroring the PyTorch forward."""
    def norm(x):
        return x / jnp.maximum(
            jnp.sqrt(jnp.sum(x * x, axis=2, keepdims=True)), EPS)

    def semi(a, b):
        an, bn = norm(a), norm(b)
        refl = jnp.exp(jnp.einsum("bnc,bmc->bnm", an, an) / tau)
        betw = jnp.exp(jnp.einsum("bnc,bmc->bnm", an, bn) / tau)
        refl_sum = refl.sum(axis=2)
        betw_sum = betw.sum(axis=2)
        refl_diag = jnp.diagonal(refl, axis1=1, axis2=2)
        betw_diag = jnp.diagonal(betw, axis1=1, axis2=2)
        return -jnp.log(betw_diag / (refl_sum + betw_sum - refl_diag))

    h1, h2 = projection(z1), projection(z2)
    ret = 0.5 * (semi(h1, h2) + semi(h2, h1))
    return ret.mean() if mean else ret.sum()


if __name__ == "__main__":
    key = jax.random.PRNGKey(0)
    k1, k2 = jax.random.split(key, 2)

    # Small shapes consistent with the module's forward (NCHW inputs).
    B, C, H, W = 2, 4, 16, 16
    z1 = jax.random.normal(k1, (B, C, H, W), dtype=jnp.float32)
    z2 = jax.random.normal(k2, (B, C, H, W), dtype=jnp.float32)

    # fc1 / fc2 from __init__ are never used by forward (projection() only
    # rearranges), so they do not influence the loss and are omitted here.

    ref = jax.block_until_ready(_reference_loss(z1, z2))

    # f32 single-tile path (N = 256 fits in one token tile).
    out = jax.block_until_ready(contrastive_loss(z1, z2, mean=True))
    assert jnp.allclose(out, ref, rtol=1e-5, atol=1e-5), (out, ref)

    # f32 multi-tile path (exercises streamed key tiles / cross-tile accumulation).
    out_tiled = jax.block_until_ready(contrastive_loss(z1, z2, mean=True, tile=128))
    assert jnp.allclose(out_tiled, ref, rtol=1e-5, atol=1e-5), (out_tiled, ref)

    # bf16-fed MXU path (f32 accumulate); relaxed tolerance per the perf review.
    out_bf16 = jax.block_until_ready(
        contrastive_loss(z1, z2, mean=True, use_bf16_matmul=True))
    assert jnp.allclose(out_bf16, ref, rtol=2e-2, atol=2e-2), (out_bf16, ref)

    print("KERNEL_OK")
</pallas_src>

<mosaic_0001>
module attributes {stable_mosaic.version = 11 : i64} {
  func.func @_contrastive_kernel(%arg0: i32, %arg1: i32, %arg2: i32, %arg3: memref<1x256x128xf32, #tpu.memory_space<vmem>>, %arg4: memref<1x256x128xf32, #tpu.memory_space<vmem>>, %arg5: memref<1x256x128xf32, #tpu.memory_space<vmem>>, %arg6: memref<1x256x128xf32, #tpu.memory_space<vmem>>, %arg7: memref<1x1x256xf32, #tpu.memory_space<vmem>>, %arg8: memref<1x256xf32, #tpu.memory_space<vmem>>, %arg9: memref<1x256xf32, #tpu.memory_space<vmem>>, %arg10: memref<1x256xf32, #tpu.memory_space<vmem>>) attributes {dimension_semantics = [#tpu.dimension_semantics<parallel>, #tpu.dimension_semantics<arbitrary>, #tpu.dimension_semantics<arbitrary>], iteration_bounds = array<i64: 2, 1, 1>, scalar_prefetch = 0 : i64, scratch_operands = 3 : i64, tpu.core_type = #tpu.core_type<tc>, window_params = [{transform_indices = @transform_0, window_bounds = array<i64: 1, 256, 128>}, {transform_indices = @transform_1, window_bounds = array<i64: 1, 256, 128>}, {transform_indices = @transform_2, window_bounds = array<i64: 1, 256, 128>}, {transform_indices = @transform_3, window_bounds = array<i64: 1, 256, 128>}, {transform_indices = @transform_4, window_bounds = array<i64: 1, 1, 256>}]} {
    %c0_i32 = arith.constant 0 : i32
    %0 = arith.cmpi eq, %arg1, %c0_i32 : i32
    %c0_i32_0 = arith.constant 0 : i32
    %1 = arith.cmpi eq, %arg2, %c0_i32_0 : i32
    %2 = arith.andi %0, %1 : i1
    %3 = arith.extui %2 : i1 to i32
    %c0_i32_1 = arith.constant 0 : i32
    %4 = arith.cmpi ne, %3, %c0_i32_1 : i32
    scf.if %4 {
      %cst_34 = arith.constant 0.000000e+00 : f32
      %57 = vector.broadcast %cst_34 : f32 to vector<1x256xf32>
      %c0_35 = arith.constant 0 : index
      %c0_36 = arith.constant 0 : index
      %58 = vector.load %arg8[%c0_35, %c0_36] : memref<1x256xf32, #tpu.memory_space<vmem>>, vector<1x256xf32>
      tpu.vector_store %arg8[%c0_35, %c0_36], %57 {strides = array<i32>} : memref<1x256xf32, #tpu.memory_space<vmem>>, vector<1x256xf32>,
      %cst_37 = arith.constant 0.000000e+00 : f32
      %59 = vector.broadcast %cst_37 : f32 to vector<1x256xf32>
      %c0_38 = arith.constant 0 : index
      %c0_39 = arith.constant 0 : index
      %60 = vector.load %arg9[%c0_38, %c0_39] : memref<1x256xf32, #tpu.memory_space<vmem>>, vector<1x256xf32>
      tpu.vector_store %arg9[%c0_38, %c0_39], %59 {strides = array<i32>} : memref<1x256xf32, #tpu.memory_space<vmem>>, vector<1x256xf32>,
    } else {
    }
    %c0 = arith.constant 0 : index
    %c0_2 = arith.constant 0 : index
    %c0_3 = arith.constant 0 : index
    %5 = vector.load %arg3[%c0, %c0_2, %c0_3] : memref<1x256x128xf32, #tpu.memory_space<vmem>>, vector<1x256x128xf32>
    %6 = vector.shape_cast %5 : vector<1x256x128xf32> to vector<256x128xf32>
    %c0_4 = arith.constant 0 : index
    %c0_5 = arith.constant 0 : index
    %c0_6 = arith.constant 0 : index
    %7 = vector.load %arg5[%c0_4, %c0_5, %c0_6] : memref<1x256x128xf32, #tpu.memory_space<vmem>>, vector<1x256x128xf32>
    %8 = vector.shape_cast %7 : vector<1x256x128xf32> to vector<256x128xf32>
    %c0_7 = arith.constant 0 : index
    %c0_8 = arith.constant 0 : index
    %c0_9 = arith.constant 0 : index
    %9 = vector.load %arg4[%c0_7, %c0_8, %c0_9] : memref<1x256x128xf32, #tpu.memory_space<vmem>>, vector<1x256x128xf32>
    %10 = vector.shape_cast %9 : vector<1x256x128xf32> to vector<256x128xf32>
    %c0_10 = arith.constant 0 : index
    %c0_11 = arith.constant 0 : index
    %c0_12 = arith.constant 0 : index
    %11 = vector.load %arg6[%c0_10, %c0_11, %c0_12] : memref<1x256x128xf32, #tpu.memory_space<vmem>>, vector<1x256x128xf32>
    %12 = vector.shape_cast %11 : vector<1x256x128xf32> to vector<256x128xf32>
    %cst = arith.constant dense<0.000000e+00> : vector<256x256xf32>
    %13 = tpu.matmul %10, %6, %cst {dimension_numbers = #tpu.dot_dimension_numbers<[1], [1], [0], [0], [0, 0, 1, 0], [], []>} : vector<256x128xf32>, vector<256x128xf32>, vector<256x256xf32> -> vector<256x256xf32>
    %cst_13 = arith.constant dense<0.000000e+00> : vector<256x256xf32>
    %14 = tpu.matmul %12, %6, %cst_13 {dimension_numbers = #tpu.dot_dimension_numbers<[1], [1], [0], [0], [0, 0, 1, 0], [], []>} : vector<256x128xf32>, vector<256x128xf32>, vector<256x256xf32> -> vector<256x256xf32>
    %cst_14 = arith.constant dense<0.000000e+00> : vector<256x256xf32>
    %15 = tpu.matmul %12, %8, %cst_14 {dimension_numbers = #tpu.dot_dimension_numbers<[1], [1], [0], [0], [0, 0, 1, 0], [], []>} : vector<256x128xf32>, vector<256x128xf32>, vector<256x256xf32> -> vector<256x256xf32>
    %cst_15 = arith.constant 2.500000e+00 : f32
    %16 = vector.broadcast %cst_15 : f32 to vector<256x256xf32>
    %17 = arith.mulf %13, %16 : vector<256x256xf32>
    %18 = math.exp %17 : vector<256x256xf32>
    %cst_16 = arith.constant 2.500000e+00 : f32
    %19 = vector.broadcast %cst_16 : f32 to vector<256x256xf32>
    %20 = arith.mulf %14, %19 : vector<256x256xf32>
    %21 = math.exp %20 : vector<256x256xf32>
    %cst_17 = arith.constant 2.500000e+00 : f32
    %22 = vector.broadcast %cst_17 : f32 to vector<256x256xf32>
    %23 = arith.mulf %15, %22 : vector<256x256xf32>
    %24 = math.exp %23 : vector<256x256xf32>
    %25 = arith.index_cast %arg1 : i32 to index
    %c0_18 = arith.constant 0 : index
    %26 = vector.load %arg8[%25, %c0_18] : memref<1x256xf32, #tpu.memory_space<vmem>>, vector<1x256xf32>
    %cst_19 = arith.constant dense<0.000000e+00> : vector<256xf32>
    %27 = vector.multi_reduction <add>, %18, %cst_19 [0] : vector<256x256xf32> to vector<256xf32>
    %28 = vector.shape_cast %27 : vector<256xf32> to vector<1x256xf32>
    %cst_20 = arith.constant dense<0.000000e+00> : vector<256xf32>
    %29 = vector.multi_reduction <add>, %21, %cst_20 [0] : vector<256x256xf32> to vector<256xf32>
    %30 = vector.shape_cast %29 : vector<256xf32> to vector<1x256xf32>
    %31 = arith.addf %28, %30 : vector<1x256xf32>
    %32 = arith.addf %26, %31 : vector<1x256xf32>
    %33 = arith.index_cast %arg1 : i32 to index
    %c0_21 = arith.constant 0 : index
    %34 = vector.load %arg8[%33, %c0_21] : memref<1x256xf32, #tpu.memory_space<vmem>>, vector<1x256xf32>
    tpu.vector_store %arg8[%33, %c0_21], %32 {strides = array<i32>} : memref<1x256xf32, #tpu.memory_space<vmem>>, vector<1x256xf32>,
    %35 = arith.index_cast %arg1 : i32 to index
    %c0_22 = arith.constant 0 : index
    %36 = vector.load %arg9[%35, %c0_22] : memref<1x256xf32, #tpu.memory_space<vmem>>, vector<1x256xf32>
    %cst_23 = arith.constant dense<0.000000e+00> : vector<256xf32>
    %37 = vector.multi_reduction <add>, %24, %cst_23 [0] : vector<256x256xf32> to vector<256xf32>
    %38 = vector.shape_cast %37 : vector<256xf32> to vector<1x256xf32>
    %39 = arith.addf %36, %38 : vector<1x256xf32>
    %40 = arith.index_cast %arg1 : i32 to index
    %c0_24 = arith.constant 0 : index
    %41 = vector.load %arg9[%40, %c0_24] : memref<1x256xf32, #tpu.memory_space<vmem>>, vector<1x256xf32>
    tpu.vector_store %arg9[%40, %c0_24], %39 {strides = array<i32>} : memref<1x256xf32, #tpu.memory_space<vmem>>, vector<1x256xf32>,
    %cst_25 = arith.constant 1.000000e+00 : f32
    %42 = vector.broadcast %cst_25 : f32 to vector<1x256xf32>
    %cst_26 = arith.constant dense<0.000000e+00> : vector<1x256xf32>
    %43 = tpu.matmul %42, %21, %cst_26 {dimension_numbers = #tpu.dot_dimension_numbers<[1], [1], [0], [0], [0, 0, 1, 0], [], []>} : vector<1x256xf32>, vector<256x256xf32>, vector<1x256xf32> -> vector<1x256xf32>
    %44 = arith.index_cast %arg2 : i32 to index
    %c0_27 = arith.constant 0 : index
    %45 = vector.load %arg9[%44, %c0_27] : memref<1x256xf32, #tpu.memory_space<vmem>>, vector<1x256xf32>
    %46 = arith.addf %45, %43 : vector<1x256xf32>
    %47 = arith.index_cast %arg2 : i32 to index
    %c0_28 = arith.constant 0 : index
    %48 = vector.load %arg9[%47, %c0_28] : memref<1x256xf32, #tpu.memory_space<vmem>>, vector<1x256xf32>
    tpu.vector_store %arg9[%47, %c0_28], %46 {strides = array<i32>} : memref<1x256xf32, #tpu.memory_space<vmem>>, vector<1x256xf32>,
    %c0_i32_29 = arith.constant 0 : i32
    %49 = arith.cmpi eq, %arg2, %c0_i32_29 : i32
    %50 = arith.extui %49 : i1 to i32
    %c0_i32_30 = arith.constant 0 : i32
    %51 = arith.cmpi ne, %50, %c0_i32_30 : i32
    scf.if %51 {
      %cst_34 = arith.constant 1.000000e+00 : f32
      %57 = vector.broadcast %cst_34 : f32 to vector<1x128xf32>
      %58 = arith.mulf %6, %6 : vector<256x128xf32>
      %cst_35 = arith.constant dense<0.000000e+00> : vector<1x256xf32>
      %59 = tpu.matmul %57, %58, %cst_35 {dimension_numbers = #tpu.dot_dimension_numbers<[1], [1], [0], [0], [0, 0, 1, 0], [], []>} : vector<1x128xf32>, vector<256x128xf32>, vector<1x256xf32> -> vector<1x256xf32>
      %cst_36 = arith.constant 2.500000e+00 : f32
      %60 = vector.broadcast %cst_36 : f32 to vector<1x256xf32>
      %61 = arith.mulf %59, %60 : vector<1x256xf32>
      %62 = math.exp %61 : vector<1x256xf32>
      %63 = arith.mulf %8, %8 : vector<256x128xf32>
      %cst_37 = arith.constant dense<0.000000e+00> : vector<1x256xf32>
      %64 = tpu.matmul %57, %63, %cst_37 {dimension_numbers = #tpu.dot_dimension_numbers<[1], [1], [0], [0], [0, 0, 1, 0], [], []>} : vector<1x128xf32>, vector<256x128xf32>, vector<1x256xf32> -> vector<1x256xf32>
      %cst_38 = arith.constant 2.500000e+00 : f32
      %65 = vector.broadcast %cst_38 : f32 to vector<1x256xf32>
      %66 = arith.mulf %64, %65 : vector<1x256xf32>
      %67 = math.exp %66 : vector<1x256xf32>
      %68 = arith.mulf %6, %8 : vector<256x128xf32>
      %cst_39 = arith.constant dense<0.000000e+00> : vector<1x256xf32>
      %69 = tpu.matmul %57, %68, %cst_39 {dimension_numbers = #tpu.dot_dimension_numbers<[1], [1], [0], [0], [0, 0, 1, 0], [], []>} : vector<1x128xf32>, vector<256x128xf32>, vector<1x256xf32> -> vector<1x256xf32>
      %cst_40 = arith.constant 2.500000e+00 : f32
      %70 = vector.broadcast %cst_40 : f32 to vector<1x256xf32>
      %71 = arith.mulf %69, %70 : vector<1x256xf32>
      %72 = arith.index_cast %arg1 : i32 to index
      %c0_41 = arith.constant 0 : index
      %73 = vector.load %arg8[%72, %c0_41] : memref<1x256xf32, #tpu.memory_space<vmem>>, vector<1x256xf32>
      %74 = arith.subf %73, %62 : vector<1x256xf32>
      %75 = arith.index_cast %arg1 : i32 to index
      %c0_42 = arith.constant 0 : index
      %76 = vector.load %arg8[%75, %c0_42] : memref<1x256xf32, #tpu.memory_space<vmem>>, vector<1x256xf32>
      tpu.vector_store %arg8[%75, %c0_42], %74 {strides = array<i32>} : memref<1x256xf32, #tpu.memory_space<vmem>>, vector<1x256xf32>,
      %77 = arith.index_cast %arg1 : i32 to index
      %c0_43 = arith.constant 0 : index
      %78 = vector.load %arg9[%77, %c0_43] : memref<1x256xf32, #tpu.memory_space<vmem>>, vector<1x256xf32>
      %79 = arith.subf %78, %67 : vector<1x256xf32>
      %80 = arith.index_cast %arg1 : i32 to index
      %c0_44 = arith.constant 0 : index
      %81 = vector.load %arg9[%80, %c0_44] : memref<1x256xf32, #tpu.memory_space<vmem>>, vector<1x256xf32>
      tpu.vector_store %arg9[%80, %c0_44], %79 {strides = array<i32>} : memref<1x256xf32, #tpu.memory_space<vmem>>, vector<1x256xf32>,
      %82 = arith.index_cast %arg1 : i32 to index
      %c0_45 = arith.constant 0 : index
      %83 = vector.load %arg10[%82, %c0_45] : memref<1x256xf32, #tpu.memory_space<vmem>>, vector<1x256xf32>
      tpu.vector_store %arg10[%82, %c0_45], %71 {strides = array<i32>} : memref<1x256xf32, #tpu.memory_space<vmem>>, vector<1x256xf32>,
    } else {
    }
    %c0_i32_31 = arith.constant 0 : i32
    %52 = arith.cmpi eq, %arg1, %c0_i32_31 : i32
    %c0_i32_32 = arith.constant 0 : i32
    %53 = arith.cmpi eq, %arg2, %c0_i32_32 : i32
    %54 = arith.andi %52, %53 : i1
    %55 = arith.extui %54 : i1 to i32
    %c0_i32_33 = arith.constant 0 : i32
    %56 = arith.cmpi ne, %55, %c0_i32_33 : i32
    scf.if %56 {
      %c0_34 = arith.constant 0 : index
      %c0_35 = arith.constant 0 : index
      %57 = vector.load %arg8[%c0_34, %c0_35] : memref<1x256xf32, #tpu.memory_space<vmem>>, vector<1x256xf32>
      %58 = math.log %57 : vector<1x256xf32>
      %c0_36 = arith.constant 0 : index
      %c0_37 = arith.constant 0 : index
      %59 = vector.load %arg9[%c0_36, %c0_37] : memref<1x256xf32, #tpu.memory_space<vmem>>, vector<1x256xf32>
      %60 = math.log %59 : vector<1x256xf32>
      %61 = arith.addf %58, %60 : vector<1x256xf32>
      %cst_38 = arith.constant 5.000000e-01 : f32
      %62 = vector.broadcast %cst_38 : f32 to vector<1x256xf32>
      %63 = arith.mulf %62, %61 : vector<1x256xf32>
      %c0_39 = arith.constant 0 : index
      %c0_40 = arith.constant 0 : index
      %64 = vector.load %arg10[%c0_39, %c0_40] : memref<1x256xf32, #tpu.memory_space<vmem>>, vector<1x256xf32>
      %65 = arith.subf %63, %64 : vector<1x256xf32>
      %c0_41 = arith.constant 0 : index
      %c0_42 = arith.constant 0 : index
      %c0_43 = arith.constant 0 : index
      %66 = vector.load %arg7[%c0_41, %c0_42, %c0_43] : memref<1x1x256xf32, #tpu.memory_space<vmem>>, vector<1x1x256xf32>
      %67 = vector.shape_cast %66 : vector<1x1x256xf32> to vector<1x256xf32>
      %68 = vector.shape_cast %65 : vector<1x256xf32> to vector<1x1x256xf32>
      tpu.vector_store %arg7[%c0_41, %c0_42, %c0_43], %68 {strides = array<i32>} : memref<1x1x256xf32, #tpu.memory_space<vmem>>, vector<1x1x256xf32>,
    } else {
    }
    return
  }
  func.func @transform_0(%arg0: i32, %arg1: i32, %arg2: i32) -> (i32, i32, i32) {
    %c0_i32 = arith.constant 0 : i32
    %c0_i32_0 = arith.constant 0 : i32
    return %arg0, %arg1, %c0_i32 : i32, i32, i32
  }
  func.func @transform_1(%arg0: i32, %arg1: i32, %arg2: i32) -> (i32, i32, i32) {
    %c0_i32 = arith.constant 0 : i32
    %c0_i32_0 = arith.constant 0 : i32
    return %arg0, %arg2, %c0_i32 : i32, i32, i32
  }
  func.func @transform_2(%arg0: i32, %arg1: i32, %arg2: i32) -> (i32, i32, i32) {
    %c0_i32 = arith.constant 0 : i32
    %c0_i32_0 = arith.constant 0 : i32
    return %arg0, %arg1, %c0_i32 : i32, i32, i32
  }
  func.func @transform_3(%arg0: i32, %arg1: i32, %arg2: i32) -> (i32, i32, i32) {
    %c0_i32 = arith.constant 0 : i32
    %c0_i32_0 = arith.constant 0 : i32
    return %arg0, %arg2, %c0_i32 : i32, i32, i32
  }
  func.func @transform_4(%arg0: i32, %arg1: i32, %arg2: i32) -> (i32, i32, i32) {
    %c0_i32 = arith.constant 0 : i32
    %c0_i32_0 = arith.constant 0 : i32
    %c0_i32_1 = arith.constant 0 : i32
    return %arg0, %c0_i32, %c0_i32_0 : i32, i32, i32
  }
}

</mosaic_0001>

<bundles_post_ra>
// kernel: tpu_custom_call.1
= control target key start
LH: loop header
LB: loop body
LE: loop exit
PB: predicated region body
PF: predicated region fallthrough
CT: control target
= control target key end

     0   :  { %s5195_s0 = inlined_call_operand.hbm [shape: f32[2,256,128], index: 0, kind: input, shape index: {}]   ;;  %s5196_s1 = inlined_call_operand.hbm [shape: f32[2,256,128], index: 1, kind: input, shape index: {}]   ;;  %s5197_s2 = inlined_call_operand.hbm [shape: f32[2,256,128], index: 2, kind: input, shape index: {}]   ;;  %s5198_s3 = inlined_call_operand.hbm [shape: f32[2,256,128], index: 3, kind: input, shape index: {}]   ;;  %s5199_s4 = inlined_call_operand.hbm [shape: f32[2,1,256], index: 4, kind: output, shape index: {}]  }
   0x1   :  { %5206 = sst [smem:[#allocation23_spill]] %s5196_s1 }
   0x2   :  { %9 = vsyncpa [#allocation6], 0 }
   0x3   :  { %11 = vsyncpa [#allocation6 + $0x1], 0 }
   0x4   :  { %12 = vsyncpa [#allocation9], 0 }
   0x5   :  { %14 = vsyncpa [#allocation9 + $0x1], 0 }
   0x6   :  { %15 = vsyncpa [#allocation12], 0 }
   0x7   :  { %17 = vsyncpa [#allocation12 + $0x1], 0 }
   0x8   :  { %18 = vsyncpa [#allocation7], 0 }
   0x9   :  { %20 = vsyncpa [#allocation7 + $0x1], 0  ;;  %s4028_s15 = smov 0   ;;  %s4030_s16 = smov 0  }
   0xa   :  { %s4032_s17 = smov 0   ;;  %s4034_s18 = smov 0  }
   0xb   :  { %s4036_s19 = smov 0   ;;  %s4038_s20 = smov 0  }
   0xc LB: > { %5207 = sst [smem:[#allocation18_spill]] %s3979_s17  ;;  %s4059_s21 = sadd.s32 4294967295, %s3991_s20   ;;  %s3991_s20 = sphi %s4038_s20, %s26_s20   ;;  %s3987_s19 = sphi %s4036_s19, %s5230_s19   ;;  %s3983_s18 = sphi %s4034_s18, %s5226_s18   ;;  %s3979_s17 = sphi %s4032_s17, %s5225_s17   ;;  %s3975_s16 = sphi %s4030_s16, %s5229_s16   ;;  %s3971_s15 = sphi %s4028_s15, %s5228_s15  }
   0xd   : > { %5208 = sst [smem:[#allocation19_spill]] %s3987_s19  ;;  %s2810_s22 = sadd.s32 4294967294, %s3991_s20  }
   0xe   : > { %s45_s23 = sadd.s32 1, %s3987_s19  ;;  %s54_s24 = sadd.s32 1, %s3979_s17 }
   0xf   : > { %p47_p0 = scmp.ge.s32.totalorder %s45_s23, 2  ;;  %p61_p1 = scmp.ne.s32.totalorder %s3979_s17, %s3975_s16 }
  0x10   : > { %p62_p2 = scmp.eq.s32.totalorder %s3991_s20, 0  ;;  %p67_p3 = scmp.ne.s32.totalorder %s3975_s16, %s3971_s15 }
  0x11   : > { %s5232_s23 = smov (%p47_p0, %s45_s23), 0  ;;  %p68_p5 = scmp.eq.s32.totalorder %s4059_s21, 0 }
  0x12   : > { %5209 = sst [smem:[#allocation20_spill]] %s5232_s23  ;;  %p4071_p4 = por %p62_p2, %p61_p1 }
  0x13   : > { %s49_s26 = ssub.s32 %s3987_s19, %s5232_s23  ;;  %p175_p6 = scmp.eq.s32.totalorder %s4059_s21, 1 }
  0x14   : > { %p52_p7 = scmp.eq.s32.totalorder %s49_s26, 0  ;;  %p4079_p8 = por %p68_p5, %p67_p3 }
  0x15   : > { %p4083_p9 = por %p175_p6, %p61_p1  ;;  %p181_p10 = scmp.eq.s32.totalorder %s2810_s22, 1 }
  0x16   : > { %s4088_s29 = scalar_select %p52_p7, %s3979_s17, %s54_s24  }
  0x17   : > { %p4090_p11 = por %p181_p10, %p67_p3  ;;  %p3258_p13 = scmp.lt.s32.totalorder %s3991_s20, 2 }
  0x18   : > { %5213 = sst [smem:[#allocation21_spill]] %s4088_s29  ;;  %s4097_s5 = sand.u32 1, %s3979_s17  }
  0x19   : > { %s5214_s30 = scalar_select %p4090_p11, 1, 0 }
  0x1a   : > { %s4100_s6 = sshll.u32 %s4097_s5, 8  ;;  %s4103_s7 = sshll.u32 %s3987_s19, 12 }
  0x1b   : > { %5215 = sst [smem:[#allocation22_spill]] %s5214_s30  ;;  %p4107_p0 = pnand %p3258_p13, %p4071_p4 }
  0x1c   : > { %s224_s9 = sand.u32 1, %s3991_s20   ;;  %s5217_s1 = sld [smem:[#allocation23_spill]] }
  0x1d   : > { %s228_s13 = scalar_lea.vmem [#allocation8], %s4100_s6  ;;  %p2825_p1 = scmp.ge.s32.totalorder %s3991_s20, 1 }
  0x1e   : > { %s237_s14 = sshll.u32 %s228_s13, 4  ;;  %p291_p2 = scmp.lt.s32.totalorder %s3991_s20, 3  ;;  %s238_s14 = int_to_ptr.vmem [resolvable:$true] %s237_s14 }
  0x1f   : > { %s4119_s22 = scalar_lea.sflag [#allocation9], %s224_s9  ;;  %p3793_p3 = pneg %p4107_p0 }
  0x20   : > { %s3804_s24 = scalar_lea.vmem %s238_s14, 4096  ;;  %s3993_s25 = smov [#allocation8]  }
  0x21   : > { %p3805_p4 = scmp.ne.s32.totalorder %s238_s14, %s3804_s24  ;;  %s3809_s26 = sshll.u32 %s3993_s25, 4  ;;  %s3810_s26 = int_to_ptr.vmem [resolvable:$false] %s3809_s26 }
  0x22   : > { %s236_s12 = scalar_lea.hbm %s5217_s1, %s4103_s7  ;;  %s3811_s10 = scalar_lea.vmem %s3810_s26, 8192 }
  0x23   : > { %p3807_p5 = pnand %p3805_p4, %p3793_p3  ;;  %p3812_p7 = scmp.lt.s32.totalorder %s238_s14, %s3810_s26 }
  0x24   : > { %p3813_p10 = scmp.lt.s32.totalorder %s3811_s10, %s3804_s24 }
  0x25   : > { %p3808_p6 = pneg %p3807_p5 }
  0x26   : > { %p3814_p13 = por %p3813_p10, %p3812_p7 }
  0x28   : > { %p3815_p12 = pnand %p3814_p13, %p3808_p6 }
  0x2a   : > { %3818 = shalt.err (!%p3815_p12)
}
  0x2b   : > { %s5204_s11 = smov 128   ;;  %s3995_s9 = smov 8  }
  0x2c   : > { %3247 = dma.hbm_to_vmem [thread:$0]  (!%p4107_p0), %s236_s12, 4096, %s238_s14, %s4119_s22, %s5204_s11, %s5204_s11, %s3995_s9  }
  0x2d   : > { %p4136_p4 = pnand %p2825_p1, %p291_p2  ;;  %s213_s26 = scalar_lea.hbm %s5195_s0, %s4103_s7 }
  0x2e   : > { %s205_s10 = scalar_lea.vmem [#allocation5], %s4100_s6  ;;  %s259_s29 = scalar_lea.hbm %s5197_s2, %s4103_s7 }
  0x2f   : > { %s214_s1 = sshll.u32 %s205_s10, 4  ;;  %s202_s17 = scalar_lea.sflag [#allocation6], %s4097_s5  ;;  %s215_s1 = int_to_ptr.vmem [resolvable:$true] %s214_s1 }
  0x30   : > { %s3832_s30 = scalar_lea.vmem %s215_s1, 4096  ;;  %s3996_s12 = smov [#allocation5]  }
  0x31   : > { %p3833_p12 = scmp.ne.s32.totalorder %s215_s1, %s3832_s30  ;;  %s3837_s14 = sshll.u32 %s3996_s12, 4  ;;  %s3838_s14 = int_to_ptr.vmem [resolvable:$false] %s3837_s14 }
  0x32   : > { %s3839_s11 = scalar_lea.vmem %s3838_s14, 8192  ;;  %p3840_p5 = scmp.lt.s32.totalorder %s215_s1, %s3838_s14 }
  0x33   : > { %p3835_p1 = pnand %p3833_p12, %p3793_p3  ;;  %p3841_p6 = scmp.lt.s32.totalorder %s3839_s11, %s3832_s30 }
  0x35   : > { %p3836_p2 = pneg %p3835_p1  ;;  %p3842_p7 = por %p3841_p6, %p3840_p5 }
  0x37   : > { %p3843_p10 = pnand %p3842_p7, %p3836_p2 }
  0x39   : > { %3846 = shalt.err (!%p3843_p10)
}
  0x3a   : > { %s5219_s19 = smov 128   ;;  %s251_s23 = scalar_lea.vmem [#allocation10], %s4100_s6 }
  0x3b   : > { %3244 = dma.hbm_to_vmem [thread:$0]  (!%p4107_p0), %s213_s26, 4096, %s215_s1, %s202_s17, %s5219_s19, %s5219_s19, %s3995_s9  }
  0x3c   : > { %s260_s24 = sshll.u32 %s251_s23, 4  ;;  %s3997_s30 = smov [#allocation10]   ;;  %s261_s24 = int_to_ptr.vmem [resolvable:$true] %s260_s24 }
  0x3d   : > { %s3860_s25 = scalar_lea.vmem %s261_s24, 4096  ;;  %s3865_s11 = sshll.u32 %s3997_s30, 4  ;;  %s3866_s11 = int_to_ptr.vmem [resolvable:$false] %s3865_s11 }
  0x3e   : > { %p3861_p13 = scmp.ne.s32.totalorder %s261_s24, %s3860_s25  ;;  %s3867_s10 = scalar_lea.vmem %s3866_s11, 8192 }
  0x3f   : > { %p3868_p2 = scmp.lt.s32.totalorder %s261_s24, %s3866_s11  ;;  %p3869_p5 = scmp.lt.s32.totalorder %s3867_s10, %s3860_s25 }
  0x40   : > { %p3863_p12 = pnand %p3861_p13, %p3793_p3 }
  0x41   : > { %p3870_p6 = por %p3869_p5, %p3868_p2 }
  0x42   : > { %p3864_p1 = pneg %p3863_p12 }
  0x44   : > { %p3871_p7 = pnand %p3870_p6, %p3864_p1 }
  0x46   : > { %3874 = shalt.err (!%p3871_p7)
}
  0x47   : > { %3250 = dma.hbm_to_vmem [thread:$0]  (!%p4107_p0), %s259_s29, 4096, %s261_s24, %s4119_s22, %s5219_s19, %s5219_s19, %s3995_s9  }
  0x48   : > { %s282_s14 = scalar_lea.hbm %s5198_s3, %s4103_s7  ;;  %s274_s23 = scalar_lea.vmem [#allocation11], %s4100_s6 }
  0x49   : > { %s283_s25 = sshll.u32 %s274_s23, 4  ;;  %s271_s30 = scalar_lea.sflag [#allocation12], %s4097_s5  ;;  %s284_s25 = int_to_ptr.vmem [resolvable:$true] %s283_s25 }
  0x4a   : > { %s3888_s11 = scalar_lea.vmem %s284_s25, 4096  ;;  %s3998_s10 = smov [#allocation11]  }
  0x4b   : > { %p3889_p10 = scmp.ne.s32.totalorder %s284_s25, %s3888_s11  ;;  %s3893_s1 = sshll.u32 %s3998_s10, 4  ;;  %s3894_s1 = int_to_ptr.vmem [resolvable:$false] %s3893_s1 }
  0x4c   : > { %s3895_s17 = scalar_lea.vmem %s3894_s1, 8192  ;;  %p3896_p1 = scmp.lt.s32.totalorder %s284_s25, %s3894_s1 }
  0x4d   : > { %p3891_p13 = pnand %p3889_p10, %p3793_p3  ;;  %p3897_p2 = scmp.lt.s32.totalorder %s3895_s17, %s3888_s11 }
  0x4f   : > { %p3892_p12 = pneg %p3891_p13  ;;  %p3898_p5 = por %p3897_p2, %p3896_p1 }
  0x51   : > { %p3899_p6 = pnand %p3898_p5, %p3892_p12 }
  0x53   : > { %3902 = shalt.err (!%p3899_p6)
}
  0x54   : > { %3253 = dma.hbm_to_vmem [thread:$0]  (!%p4107_p0), %s282_s14, 4096, %s284_s25, %s271_s30, %s5219_s19, %s5219_s19, %s3995_s9  }
  0x55   : > { %295 = sbr.rel (%p4136_p4) target bundleno = 918 (0x396), region = 36  ;;  %s4190_s29 = sand.u32 (!%p4136_p4), 1, %s3975_s16  }
  0x56   : > { %s2826_s5 = sshll.u32 (!%p4136_p4), %s4190_s29, 8  ;;  %s298_s6 = scalar_lea.sflag (!%p4136_p4), [#allocation6], %s4190_s29 }
  0x57   : > { %s4194_s7 = scalar_lea.vmem (!%p4136_p4), [#allocation5], %s2826_s5 }
  0x5a   : > { %3954 = dma.done.wait (%p4079_p8), %s298_s6, 4096  }
  0x5b   : > { %3956 = vsyncadd (%p4079_p8), %s298_s6, 4294963200  ;;  %s306_s8 = sand.u32 1, %s4059_s21   ;;  %s4201_s9 = scalar_lea.vmem [#allocation8], %s2826_s5 }
  0x5c   : > { %s307_s22 = scalar_lea.sflag [#allocation9], %s306_s8 }
  0x5d   : > { %3958 = dma.done.wait (%p4079_p8), %s307_s22, 8192  }
  0x5e   : > { %3960 = vsyncadd (%p4079_p8), %s307_s22, 4294959104  ;;  %s4207_s13 = scalar_lea.vmem [#allocation10], %s2826_s5  ;;  %s325_s19 = scalar_lea.sflag [#allocation12], %s4190_s29 }
  0x5f   : > { %s4210_s24 = scalar_lea.vmem [#allocation11], %s2826_s5 }
  0x60   : > { %3962 = dma.done.wait (%p4079_p8), %s325_s19, 4096  }
  0x61   : > { %3964 = vsyncadd (%p4079_p8), %s325_s19, 4294963200  ;;  %v415_v0 = vld [vmem:[%s4194_s7 + $0xf8] sm:$0xff]  ;;  %v414_v2 = vld [vmem:[%s4194_s7 + $0xf0] sm:$0xff]  ;;  %s2830_s21 = sshll.u32 %s4190_s29, 1  ;;  %s2840_s27 = sshll.u32 %s3983_s18, 5 }
  0x62   : > { %v399_v1 = vld [vmem:[%s4194_s7 + $0x78] sm:$0xff]  ;;  %2841 = vmatprep.subr.mxu0 %v415_v0  ;;  %2937 = vmatprep.subr.mxu1 %v415_v0  ;;  %v398_v3 = vld [vmem:[%s4194_s7 + $0x70] sm:$0xff]  ;;  %v413_v4 = vld [vmem:[%s4194_s7 + $0xe8] sm:$0xff]  ;;  %s367_s26 = scalar_lea.vmem [#allocation13], %s2830_s21  ;;  %s2640_s25 = scalar_lea.hbm %s5199_s4, %s2840_s27 }
  0x63   : > { %2842 = vmatpush3.xpose.msra.mxu0 %v399_v1  ;;  %2938 = vmatpush3.xpose.msra.mxu1 %v399_v1  ;;  %v397_v5 = vld [vmem:[%s4194_s7 + $0x68] sm:$0xff]  ;;  %v412_v6 = vld [vmem:[%s4194_s7 + $0xe0] sm:$0xff]  ;;  %v411_v10 = vld [vmem:[%s4194_s7 + $0xd8] sm:$0xff]  ;;  %s2642_s12 = sshll.u32 %s367_s26, 4  ;;  %s2628_s30 = scalar_lea.sflag [#allocation7], %s4190_s29  ;;  %s2643_s12 = int_to_ptr.vmem [resolvable:$true] %s2642_s12 }
  0x64   : > { %2843 = vmatprep.subr.mxu0 %v414_v2  ;;  %2939 = vmatprep.subr.mxu1 %v414_v2  ;;  %v4224_v7 = vld [vmem:[%s4201_s9] sm:$0xff]  ;;  %v395_v11 = vld [vmem:[%s4194_s7 + $0x58] sm:$0xff]  ;;  %v410_v12 = vld [vmem:[%s4194_s7 + $0xd0] sm:$0xff]  ;;  %s3903_s11 = scalar_lea.vmem %s2643_s12, 32  ;;  %s4002_s18 = smov [#allocation13]  }
  0x65   : > { %v396_v8 = vld [vmem:[%s4194_s7 + $0x60] sm:$0xff]  ;;  %2873 = vmatprep.mubr.f32.mxu0 %v4224_v7  ;;  %v394_v13 = vld [vmem:[%s4194_s7 + $0x50] sm:$0xff]  ;;  %v409_v14 = vld [vmem:[%s4194_s7 + $0xc8] sm:$0xff]  ;;  %p3904_p8 = scmp.ne.s32.totalorder %s2643_s12, %s3903_s11  ;;  %s3907_s10 = sshll.u32 %s4002_s18, 4  ;;  %s3908_s10 = int_to_ptr.vmem [resolvable:$false] %s3907_s10 }
  0x66   : > { %v4228_v9 = vld [vmem:[%s4210_s24] sm:$0xff]  ;;  %v393_v15 = vld [vmem:[%s4194_s7 + $0x48] sm:$0xff]  ;;  %v407_v18 = vld [vmem:[%s4194_s7 + $0xb8] sm:$0xff]  ;;  %s3909_s1 = scalar_lea.vmem %s3908_s10, 64  ;;  %p3910_p4 = scmp.lt.s32.totalorder %s2643_s12, %s3908_s10 }
  0x67   : > { %2844 = vmatpush3.xpose.msra.mxu0 %v398_v3  ;;  %2940 = vmatpush3.xpose.msra.mxu1 %v398_v3  ;;  %v408_v16 = vld [vmem:[%s4194_s7 + $0xc0] sm:$0xff]  ;;  %v391_v19 = vld [vmem:[%s4194_s7 + $0x38] sm:$0xff]  ;;  %v406_v20 = vld [vmem:[%s4194_s7 + $0xb0] sm:$0xff]  ;;  %p3905_p0 = pnand %p3904_p8, %p4083_p9  ;;  %p3911_p7 = scmp.lt.s32.totalorder %s3909_s1, %s3903_s11 }
  0x68   : > { %2845 = vmatprep.subr.mxu0 %v413_v4  ;;  %2941 = vmatprep.subr.mxu1 %v413_v4  ;;  %v392_v17 = vld [vmem:[%s4194_s7 + $0x40] sm:$0xff]  ;;  %v390_v21 = vld [vmem:[%s4194_s7 + $0x30] sm:$0xff]  ;;  %v405_v22 = vld [vmem:[%s4194_s7 + $0xa8] sm:$0xff] }
  0x69   : > { %2969 = vmatprep.mubr.f32.mxu1 %v4228_v9  ;;  %v389_v23 = vld [vmem:[%s4194_s7 + $0x28] sm:$0xff]  ;;  %v404_v24 = vld [vmem:[%s4194_s7 + $0xa0] sm:$0xff]  ;;  %v403_v26 = vld [vmem:[%s4194_s7 + $0x98] sm:$0xff]  ;;  %p3906_p3 = pneg %p3905_p0  ;;  %p3912_p10 = por %p3911_p7, %p3910_p4 }
  0x6a   : > { %v388_v25 = vld [vmem:[%s4194_s7 + $0x20] sm:$0xff]  ;;  %v387_v27 = vld [vmem:[%s4194_s7 + $0x18] sm:$0xff]  ;;  %v402_v28 = vld [vmem:[%s4194_s7 + $0x90] sm:$0xff] }
  0x6b   : > { %2846 = vmatpush3.xpose.msra.mxu0 %v397_v5  ;;  %2942 = vmatpush3.xpose.msra.mxu1 %v397_v5  ;;  %v386_v29 = vld [vmem:[%s4194_s7 + $0x10] sm:$0xff]  ;;  %v401_v30 = vld [vmem:[%s4194_s7 + $0x88] sm:$0xff]  ;;  %v400_v32 = vld [vmem:[%s4194_s7 + $0x80] sm:$0xff]  ;;  %p3913_p13 = pnand %p3912_p10, %p3906_p3 }
  0x6c   : > { %2847 = vmatprep.subr.mxu0 %v412_v6  ;;  %2943 = vmatprep.subr.mxu1 %v412_v6  ;;  %v385_v31 = vld [vmem:[%s4194_s7 + $0x8] sm:$0xff]  ;;  %v384_v33 = vld [vmem:[%s4194_s7] sm:$0xff]  ;;  %v4257_v34 = vld [vmem:[%s4207_s13 + $0xf8] sm:$0xff] }
  0x6d   : > { %v449_v35 = vld [vmem:[%s4201_s9 + $0x8] sm:$0xff]  ;;  %v4265_v37 = vld [vmem:[%s4207_s13 + $0x78] sm:$0xff]  ;;  %v4270_v38 = vld [vmem:[%s4207_s13 + $0xf0] sm:$0xff] }
  0x6e   : > { %v4261_v36 = vld [vmem:[%s4210_s24 + $0x8] sm:$0xff]  ;;  %v450_v39 = vld [vmem:[%s4201_s9 + $0x10] sm:$0xff]  ;;  %v451_v43 = vld [vmem:[%s4201_s9 + $0x18] sm:$0xff] }
  0x6f   : > { %2848 = vmatpush3.xpose.msra.mxu0 %v396_v8  ;;  %2944 = vmatpush3.xpose.msra.mxu1 %v396_v8  ;;  %v4275_v40 = vld [vmem:[%s4210_s24 + $0x10] sm:$0xff]  ;;  %v4284_v42 = vld [vmem:[%s4207_s13 + $0xe8] sm:$0xff]  ;;  %v4289_v44 = vld [vmem:[%s4210_s24 + $0x18] sm:$0xff] }
  0x70   : > { %2849 = vmatprep.subr.mxu0 %v411_v10  ;;  %2945 = vmatprep.subr.mxu1 %v411_v10  ;;  %v4280_v41 = vld [vmem:[%s4207_s13 + $0x70] sm:$0xff]  ;;  %v4294_v45 = vld [vmem:[%s4207_s13 + $0x68] sm:$0xff]  ;;  %v4298_v46 = vld [vmem:[%s4207_s13 + $0xe0] sm:$0xff] }
  0x71   : > { %v452_v47 = vld [vmem:[%s4201_s9 + $0x20] sm:$0xff]  ;;  %v443_v50 = vld [vmem:[%s4207_s13 + $0xd8] sm:$0xff]  ;;  %v453_v51 = vld [vmem:[%s4201_s9 + $0x28] sm:$0xff] }
  0x72   : > { %v4303_v48 = vld [vmem:[%s4210_s24 + $0x20] sm:$0xff]  ;;  %v4315_v52 = vld [vmem:[%s4210_s24 + $0x28] sm:$0xff]  ;;  %v427_v53 = vld [vmem:[%s4207_s13 + $0x58] sm:$0xff] }
  0x73   : > { %2850 = vmatpush3.xpose.msra.mxu0 %v395_v11  ;;  %2946 = vmatpush3.xpose.msra.mxu1 %v395_v11  ;;  %v4308_v49 = vld [vmem:[%s4207_s13 + $0x60] sm:$0xff]  ;;  %v442_v54 = vld [vmem:[%s4207_s13 + $0xd0] sm:$0xff]  ;;  %v455_v57 = vld [vmem:[%s4201_s9 + $0x38] sm:$0xff] }
  0x74   : > { %2851 = vmatprep.subr.mxu0 %v410_v12  ;;  %2947 = vmatprep.subr.mxu1 %v410_v12  ;;  %v454_v55 = vld [vmem:[%s4201_s9 + $0x30] sm:$0xff]  ;;  %v4330_v58 = vld [vmem:[%s4210_s24 + $0x38] sm:$0xff]  ;;  %v456_v59 = vld [vmem:[%s4201_s9 + $0x40] sm:$0xff] }
  0x75   : > { %v4324_v56 = vld [vmem:[%s4210_s24 + $0x30] sm:$0xff]  ;;  %v4336_v60 = vld [vmem:[%s4210_s24 + $0x40] sm:$0xff]  ;;  %v457_v61 = vld [vmem:[%s4201_s9 + $0x48] sm:$0xff] }
  0x76   : > { %v4342_v62 = vld [vmem:[%s4210_s24 + $0x48] sm:$0xff]  ;;  %v458_v63 = vld [vmem:[%s4201_s9 + $0x50] sm:$0xff]  ;;  %v459_v1 = vld [vmem:[%s4201_s9 + $0x58] sm:$0xff] }
  0x77   : > { %2852 = vmatpush3.xpose.msra.mxu0 %v394_v13  ;;  %2948 = vmatpush3.xpose.msra.mxu1 %v394_v13  ;;  %v4348_v0 = vld [vmem:[%s4210_s24 + $0x50] sm:$0xff]  ;;  %v4354_v2 = vld [vmem:[%s4210_s24 + $0x58] sm:$0xff]  ;;  %v460_v3 = vld [vmem:[%s4201_s9 + $0x60] sm:$0xff] }
  0x78   : > { %2853 = vmatprep.subr.mxu0 %v409_v14  ;;  %2949 = vmatprep.subr.mxu1 %v409_v14  ;;  %v4360_v4 = vld [vmem:[%s4210_s24 + $0x60] sm:$0xff]  ;;  %v461_v5 = vld [vmem:[%s4201_s9 + $0x68] sm:$0xff]  ;;  %v4372_v8 = vld [vmem:[%s4210_s24 + $0x70] sm:$0xff] }
  0x79   : > { %v4366_v6 = vld [vmem:[%s4210_s24 + $0x68] sm:$0xff]  ;;  %v463_v10 = vld [vmem:[%s4201_s9 + $0x78] sm:$0xff]  ;;  %v464_v12 = vld [vmem:[%s4201_s9 + $0x80] sm:$0xff] }
  0x7a   : > { %v4378_v11 = vld [vmem:[%s4210_s24 + $0x78] sm:$0xff]  ;;  %v4384_v13 = vld [vmem:[%s4210_s24 + $0x80] sm:$0xff]  ;;  %v465_v14 = vld [vmem:[%s4201_s9 + $0x88] sm:$0xff] }
  0x7b   : > { %2854 = vmatpush3.xpose.msra.mxu0 %v393_v15  ;;  %2950 = vmatpush3.xpose.msra.mxu1 %v393_v15  ;;  %v4390_v15 = vld [vmem:[%s4210_s24 + $0x88] sm:$0xff] }
  0x7c   : > { %2855 = vmatprep.subr.mxu0 %v408_v16  ;;  %2951 = vmatprep.subr.mxu1 %v408_v16  ;;  %v426_v16 = vld [vmem:[%s4207_s13 + $0x50] sm:$0xff] }
  0x7f   : > { %2856 = vmatpush3.xpose.msra.mxu0 %v392_v17  ;;  %2952 = vmatpush3.xpose.msra.mxu1 %v392_v17  ;;  %v466_v17 = vld [vmem:[%s4201_s9 + $0x90] sm:$0xff] }
  0x80   : > { %2857 = vmatprep.subr.mxu0 %v407_v18  ;;  %2953 = vmatprep.subr.mxu1 %v407_v18  ;;  %v4397_v18 = vld [vmem:[%s4210_s24 + $0x90] sm:$0xff] }
  0x83   : > { %2858 = vmatpush3.xpose.msra.mxu0 %v391_v19  ;;  %2954 = vmatpush3.xpose.msra.mxu1 %v391_v19  ;;  %v441_v19 = vld [vmem:[%s4207_s13 + $0xc8] sm:$0xff] }
  0x84   : > { %2859 = vmatprep.subr.mxu0 %v406_v20  ;;  %2955 = vmatprep.subr.mxu1 %v406_v20  ;;  %v425_v20 = vld [vmem:[%s4207_s13 + $0x48] sm:$0xff] }
  0x87   : > { %2860 = vmatpush3.xpose.msra.mxu0 %v390_v21  ;;  %2956 = vmatpush3.xpose.msra.mxu1 %v390_v21  ;;  %v467_v21 = vld [vmem:[%s4201_s9 + $0x98] sm:$0xff] }
  0x88   : > { %2861 = vmatprep.subr.mxu0 %v405_v22  ;;  %2957 = vmatprep.subr.mxu1 %v405_v22  ;;  %v4405_v22 = vld [vmem:[%s4210_s24 + $0x98] sm:$0xff] }
  0x8b   : > { %2862 = vmatpush3.xpose.msra.mxu0 %v389_v23  ;;  %2958 = vmatpush3.xpose.msra.mxu1 %v389_v23  ;;  %v440_v23 = vld [vmem:[%s4207_s13 + $0xc0] sm:$0xff] }
  0x8c   : > { %2863 = vmatprep.subr.mxu0 %v404_v24  ;;  %2959 = vmatprep.subr.mxu1 %v404_v24  ;;  %v424_v24 = vld [vmem:[%s4207_s13 + $0x40] sm:$0xff] }
  0x8f   : > { %2864 = vmatpush3.xpose.msra.mxu0 %v388_v25  ;;  %2960 = vmatpush3.xpose.msra.mxu1 %v388_v25  ;;  %v468_v25 = vld [vmem:[%s4201_s9 + $0xa0] sm:$0xff] }
  0x90   : > { %2865 = vmatprep.subr.mxu0 %v403_v26  ;;  %2961 = vmatprep.subr.mxu1 %v403_v26  ;;  %v4413_v26 = vld [vmem:[%s4210_s24 + $0xa0] sm:$0xff] }
  0x93   : > { %2866 = vmatpush3.xpose.msra.mxu0 %v387_v27  ;;  %2962 = vmatpush3.xpose.msra.mxu1 %v387_v27  ;;  %v439_v27 = vld [vmem:[%s4207_s13 + $0xb8] sm:$0xff] }
  0x94   : > { %2867 = vmatprep.subr.mxu0 %v402_v28  ;;  %2963 = vmatprep.subr.mxu1 %v402_v28  ;;  %v423_v28 = vld [vmem:[%s4207_s13 + $0x38] sm:$0xff] }
  0x97   : > { %2868 = vmatpush3.xpose.msra.mxu0 %v386_v29  ;;  %2964 = vmatpush3.xpose.msra.mxu1 %v386_v29  ;;  %v469_v29 = vld [vmem:[%s4201_s9 + $0xa8] sm:$0xff] }
  0x98   : > { %2869 = vmatprep.subr.mxu0 %v401_v30  ;;  %2965 = vmatprep.subr.mxu1 %v401_v30  ;;  %v4421_v30 = vld [vmem:[%s4210_s24 + $0xa8] sm:$0xff] }
  0x9b   : > { %2870 = vmatpush3.xpose.msra.mxu0 %v385_v31  ;;  %2966 = vmatpush3.xpose.msra.mxu1 %v385_v31  ;;  %v438_v31 = vld [vmem:[%s4207_s13 + $0xb0] sm:$0xff] }
  0x9c   : > { %2871 = vmatprep.subr.mxu0 %v400_v32  ;;  %2967 = vmatprep.subr.mxu1 %v400_v32  ;;  %v422_v32 = vld [vmem:[%s4207_s13 + $0x30] sm:$0xff] }
  0x9f   : > { %2872 = vmatpush3.xpose.msra.mxu0 %v384_v33  ;;  %2968 = vmatpush3.xpose.msra.mxu1 %v384_v33  ;;  %v470_v33 = vld [vmem:[%s4201_s9 + $0xb0] sm:$0xff] }
  0xa0   : > { %3033 = vmatprep.subr.mxu0 %v4257_v34 }
  0xa2   : > { %2874 = vmatmul.mubr.f32.vlgmr.msra.gmra.mxu0 %v4224_v7  ;;  %2970 = vmatmul.mubr.f32.vlgmr.msra.gmra.mxu1 %v4228_v9  ;;  %v462_v7 = vld [vmem:[%s4201_s9 + $0x70] sm:$0xff] }
  0xa3   : > { %2875 = vmatprep.mubr.f32.mxu0 %v449_v35  ;;  %2971 = vmatprep.mubr.f32.mxu1 %v4261_v36 }
  0xa4   : > { %3034 = vmatpush3.xpose.msra.mxu0 %v4265_v37 }
  0xa5   : > { %3035 = vmatprep.subr.mxu0 %v4270_v38 }
  0xa6   : > { %2876 = vmatmul.mubr.f32.gmra.mxu0 %v449_v35  ;;  %2972 = vmatmul.mubr.f32.gmra.mxu1 %v4261_v36  ;;  %v4429_v35 = vld [vmem:[%s4210_s24 + $0xb0] sm:$0xff] }
  0xa7   : > { %2877 = vmatprep.mubr.f32.mxu0 %v450_v39  ;;  %2973 = vmatprep.mubr.f32.mxu1 %v4275_v40 }
  0xa8   : > { %3036 = vmatpush3.xpose.msra.mxu0 %v4280_v41 }
  0xa9   : > { %3037 = vmatprep.subr.mxu0 %v4284_v42 }
  0xaa   : > { %2878 = vmatmul.mubr.f32.gmra.mxu0 %v450_v39  ;;  %2974 = vmatmul.mubr.f32.gmra.mxu1 %v4275_v40  ;;  %v437_v39 = vld [vmem:[%s4207_s13 + $0xa8] sm:$0xff] }
  0xab   : > { %2879 = vmatprep.mubr.f32.mxu0 %v451_v43  ;;  %2975 = vmatprep.mubr.f32.mxu1 %v4289_v44 }
  0xac   : > { %3038 = vmatpush3.xpose.msra.mxu0 %v4294_v45 }
  0xad   : > { %3039 = vmatprep.subr.mxu0 %v4298_v46 }
  0xae   : > { %2880 = vmatmul.mubr.f32.gmra.mxu0 %v451_v43  ;;  %2976 = vmatmul.mubr.f32.gmra.mxu1 %v4289_v44  ;;  %v421_v43 = vld [vmem:[%s4207_s13 + $0x28] sm:$0xff] }
  0xaf   : > { %2881 = vmatprep.mubr.f32.mxu0 %v452_v47  ;;  %2977 = vmatprep.mubr.f32.mxu1 %v4303_v48 }
  0xb0   : > { %3040 = vmatpush3.xpose.msra.mxu0 %v4308_v49 }
  0xb1   : > { %3041 = vmatprep.subr.mxu0 %v443_v50  ;;  %v4437_v50 = vld [vmem:[%s4210_s24 + $0xb8] sm:$0xff] }
  0xb2   : > { %2882 = vmatmul.mubr.f32.gmra.mxu0 %v452_v47  ;;  %2978 = vmatmul.mubr.f32.gmra.mxu1 %v4303_v48  ;;  %v471_v47 = vld [vmem:[%s4201_s9 + $0xb8] sm:$0xff] }
  0xb3   : > { %2883 = vmatprep.mubr.f32.mxu0 %v453_v51  ;;  %2979 = vmatprep.mubr.f32.mxu1 %v4315_v52 }
  0xb4   : > { %3042 = vmatpush3.xpose.msra.mxu0 %v427_v53  ;;  %v420_v53 = vld [vmem:[%s4207_s13 + $0x20] sm:$0xff] }
  0xb5   : > { %3043 = vmatprep.subr.mxu0 %v442_v54  ;;  %v472_v54 = vld [vmem:[%s4201_s9 + $0xc0] sm:$0xff] }
  0xb6   : > { %2884 = vmatmul.mubr.f32.gmra.mxu0 %v453_v51  ;;  %2980 = vmatmul.mubr.f32.gmra.mxu1 %v4315_v52  ;;  %v436_v51 = vld [vmem:[%s4207_s13 + $0xa0] sm:$0xff] }
  0xb7   : > { %2885 = vmatprep.mubr.f32.mxu0 %v454_v55  ;;  %2981 = vmatprep.mubr.f32.mxu1 %v4324_v56 }
  0xb8   : > { %3044 = vmatpush3.xpose.msra.mxu0 %v426_v16  ;;  %v4469_v16 = vld [vmem:[%s4210_s24 + $0xd8] sm:$0xff] }
  0xb9   : > { %3045 = vmatprep.subr.mxu0 %v441_v19  ;;  %v416_v19 = vld [vmem:[%s4207_s13] sm:$0xff] }
  0xba   : > { %2886 = vmatmul.mubr.f32.gmra.mxu0 %v454_v55  ;;  %2982 = vmatmul.mubr.f32.gmra.mxu1 %v4324_v56  ;;  %v4445_v55 = vld [vmem:[%s4210_s24 + $0xc0] sm:$0xff] }
  0xbb   : > { %2887 = vmatprep.mubr.f32.mxu0 %v455_v57  ;;  %2983 = vmatprep.mubr.f32.mxu1 %v4330_v58 }
  0xbc   : > { %3046 = vmatpush3.xpose.msra.mxu0 %v425_v20  ;;  %v476_v20 = vld [vmem:[%s4201_s9 + $0xe0] sm:$0xff] }
  0xbd   : > { %3047 = vmatprep.subr.mxu0 %v440_v23  ;;  %v477_v23 = vld [vmem:[%s4201_s9 + $0xe8] sm:$0xff] }
  0xbe   : > { %2888 = vmatmul.mubr.f32.gmra.mxu0 %v455_v57  ;;  %2984 = vmatmul.mubr.f32.gmra.mxu1 %v4330_v58  ;;  %v435_v57 = vld [vmem:[%s4207_s13 + $0x98] sm:$0xff] }
  0xbf   : > { %2889 = vmatprep.mubr.f32.mxu0 %v456_v59  ;;  %2985 = vmatprep.mubr.f32.mxu1 %v4336_v60 }
  0xc0   : > { %3048 = vmatpush3.xpose.msra.mxu0 %v424_v24  ;;  %v4483_v24 = vld [vmem:[%s4210_s24 + $0xe8] sm:$0xff] }
  0xc1   : > { %3049 = vmatprep.subr.mxu0 %v439_v27  ;;  %v4489_v27 = vld [vmem:[%s4210_s24 + $0xf0] sm:$0xff] }
  0xc2   : > { %2890 = vmatmul.mubr.f32.gmra.mxu0 %v456_v59  ;;  %2986 = vmatmul.mubr.f32.gmra.mxu1 %v4336_v60  ;;  %v419_v59 = vld [vmem:[%s4207_s13 + $0x18] sm:$0xff] }
  0xc3   : > { %2891 = vmatprep.mubr.f32.mxu0 %v457_v61  ;;  %2987 = vmatprep.mubr.f32.mxu1 %v4342_v62 }
  0xc4   : > { %3050 = vmatpush3.xpose.msra.mxu0 %v423_v28  ;;  %v479_v28 = vld [vmem:[%s4201_s9 + $0xf8] sm:$0xff] }
  0xc5   : > { %3051 = vmatprep.subr.mxu0 %v438_v31 }
  0xc6   : > { %2892 = vmatmul.mubr.f32.gmra.mxu0 %v457_v61  ;;  %2988 = vmatmul.mubr.f32.gmra.mxu1 %v4342_v62  ;;  %v473_v61 = vld [vmem:[%s4201_s9 + $0xc8] sm:$0xff] }
  0xc7   : > { %2893 = vmatprep.mubr.f32.mxu0 %v458_v63  ;;  %2989 = vmatprep.mubr.f32.mxu1 %v4348_v0 }
  0xc8   : > { %3052 = vmatpush3.xpose.msra.mxu0 %v422_v32 }
  0xc9   : > { %3053 = vmatprep.subr.mxu0 %v437_v39 }
  0xca   : > { %2894 = vmatmul.mubr.f32.gmra.mxu0 %v458_v63  ;;  %2990 = vmatmul.mubr.f32.gmra.mxu1 %v4348_v0  ;;  %v4453_v63 = vld [vmem:[%s4210_s24 + $0xc8] sm:$0xff] }
  0xcb   : > { %2895 = vmatprep.mubr.f32.mxu0 %v459_v1  ;;  %2991 = vmatprep.mubr.f32.mxu1 %v4354_v2 }
  0xcc   : > { %3054 = vmatpush3.xpose.msra.mxu0 %v421_v43  ;;  %v2353_v43 = vmul.f32 %v4265_v37, %v4265_v37 }
  0xcd   : > { %3055 = vmatprep.subr.mxu0 %v436_v51 }
  0xce   : > { %2896 = vmatmul.mubr.f32.gmra.mxu0 %v459_v1  ;;  %2992 = vmatmul.mubr.f32.gmra.mxu1 %v4354_v2  ;;  %v434_v1 = vld [vmem:[%s4207_s13 + $0x90] sm:$0xff] }
  0xcf   : > { %2897 = vmatprep.mubr.f32.mxu0 %v460_v3  ;;  %2993 = vmatprep.mubr.f32.mxu1 %v4360_v4 }
  0xd0   : > { %3056 = vmatpush3.xpose.msra.mxu0 %v420_v53 }
  0xd1   : > { %3057 = vmatprep.subr.mxu0 %v435_v57 }
  0xd2   : > { %2898 = vmatmul.mubr.f32.gmra.mxu0 %v460_v3  ;;  %2994 = vmatmul.mubr.f32.gmra.mxu1 %v4360_v4  ;;  %v418_v3 = vld [vmem:[%s4207_s13 + $0x10] sm:$0xff] }
  0xd3   : > { %2899 = vmatprep.mubr.f32.mxu0 %v461_v5  ;;  %2995 = vmatprep.mubr.f32.mxu1 %v4366_v6 }
  0xd4   : > { %3058 = vmatpush3.xpose.msra.mxu0 %v419_v59 }
  0xd5   : > { %3059 = vmatprep.subr.mxu0 %v434_v1 }
  0xd6   : > { %2900 = vmatmul.mubr.f32.gmra.mxu0 %v461_v5  ;;  %2996 = vmatmul.mubr.f32.gmra.mxu1 %v4366_v6  ;;  %v474_v5 = vld [vmem:[%s4201_s9 + $0xd0] sm:$0xff] }
  0xd7   : > { %2901 = vmatprep.mubr.f32.mxu0 %v462_v7  ;;  %2997 = vmatprep.mubr.f32.mxu1 %v4372_v8 }
  0xd8   : > { %3060 = vmatpush3.xpose.msra.mxu0 %v418_v3  ;;  %v2369_v3 = vmul.f32 %v4257_v34, %v4257_v34 }
  0xda   : > { %2902 = vmatmul.mubr.f32.gmra.mxu0 %v462_v7  ;;  %2998 = vmatmul.mubr.f32.gmra.mxu1 %v4372_v8  ;;  %v4461_v7 = vld [vmem:[%s4210_s24 + $0xd0] sm:$0xff] }
  0xdb   : > { %2903 = vmatprep.mubr.f32.mxu0 %v463_v10  ;;  %2999 = vmatprep.mubr.f32.mxu1 %v4378_v11 }
  0xde   : > { %2904 = vmatmul.mubr.f32.gmra.mxu0 %v463_v10  ;;  %3000 = vmatmul.mubr.f32.gmra.mxu1 %v4378_v11  ;;  %v433_v10 = vld [vmem:[%s4207_s13 + $0x88] sm:$0xff] }
  0xdf   : > { %2905 = vmatprep.mubr.f32.mxu0 %v464_v12  ;;  %3001 = vmatprep.mubr.f32.mxu1 %v4384_v13 }
  0xe0   : > { %3061 = vmatprep.subr.mxu0 %v433_v10 }
  0xe2   : > { %2906 = vmatmul.mubr.f32.gmra.mxu0 %v464_v12  ;;  %3002 = vmatmul.mubr.f32.gmra.mxu1 %v4384_v13  ;;  %v417_v12 = vld [vmem:[%s4207_s13 + $0x8] sm:$0xff] }
  0xe3   : > { %2907 = vmatprep.mubr.f32.mxu0 %v465_v14  ;;  %3003 = vmatprep.mubr.f32.mxu1 %v4390_v15 }
  0xe4   : > { %3062 = vmatpush3.xpose.msra.mxu0 %v417_v12 }
  0xe6   : > { %2908 = vmatmul.mubr.f32.gmra.mxu0 %v465_v14  ;;  %3004 = vmatmul.mubr.f32.gmra.mxu1 %v4390_v15  ;;  %v475_v14 = vld [vmem:[%s4201_s9 + $0xd8] sm:$0xff] }
  0xe7   : > { %2909 = vmatprep.mubr.f32.mxu0 %v466_v17  ;;  %3005 = vmatprep.mubr.f32.mxu1 %v4397_v18 }
  0xea   : > { %2910 = vmatmul.mubr.f32.gmra.mxu0 %v466_v17  ;;  %3006 = vmatmul.mubr.f32.gmra.mxu1 %v4397_v18  ;;  %v432_v17 = vld [vmem:[%s4207_s13 + $0x80] sm:$0xff] }
  0xeb   : > { %2911 = vmatprep.mubr.f32.mxu0 %v467_v21  ;;  %3007 = vmatprep.mubr.f32.mxu1 %v4405_v22 }
  0xec   : > { %3063 = vmatprep.subr.mxu0 %v432_v17 }
  0xed   : > { %3064 = vmatpush3.xpose.msra.mxu0 %v416_v19 }
  0xee   : > { %2912 = vmatmul.mubr.f32.gmra.mxu0 %v467_v21  ;;  %3008 = vmatmul.mubr.f32.gmra.mxu1 %v4405_v22  ;;  %v4477_v21 = vld [vmem:[%s4210_s24 + $0xe0] sm:$0xff] }
  0xef   : > { %2913 = vmatprep.mubr.f32.mxu0 %v468_v25  ;;  %3009 = vmatprep.mubr.f32.mxu1 %v4413_v26 }
  0xf0   : > { %3163 = vmatprep.subr.mxu0 %v2369_v3 }
  0xf2   : > { %2914 = vmatmul.mubr.f32.gmra.mxu0 %v468_v25  ;;  %3010 = vmatmul.mubr.f32.gmra.mxu1 %v4413_v26  ;;  %v478_v25 = vld [vmem:[%s4201_s9 + $0xf0] sm:$0xff] }
  0xf3   : > { %2915 = vmatprep.mubr.f32.mxu0 %v469_v29  ;;  %3011 = vmatprep.mubr.f32.mxu1 %v4421_v30 }
  0xf6   : > { %2916 = vmatmul.mubr.f32.gmra.mxu0 %v469_v29  ;;  %3012 = vmatmul.mubr.f32.gmra.mxu1 %v4421_v30  ;;  %v4495_v29 = vld [vmem:[%s4210_s24 + $0xf8] sm:$0xff] }
  0xf7   : > { %2917 = vmatprep.mubr.f32.mxu0 %v470_v33  ;;  %3013 = vmatprep.mubr.f32.mxu1 %v4429_v35 }
  0xfa   : > { %2918 = vmatmul.mubr.f32.gmra.mxu0 %v470_v33  ;;  %3014 = vmatmul.mubr.f32.gmra.mxu1 %v4429_v35 }
  0xfb   : > { %2919 = vmatprep.mubr.f32.mxu0 %v471_v47  ;;  %3015 = vmatprep.mubr.f32.mxu1 %v4437_v50 }
  0xfe   : > { %2920 = vmatmul.mubr.f32.gmra.mxu0 %v471_v47  ;;  %3016 = vmatmul.mubr.f32.gmra.mxu1 %v4437_v50 }
  0xff   : > { %2921 = vmatprep.mubr.f32.mxu0 %v472_v54  ;;  %3017 = vmatprep.mubr.f32.mxu1 %v4445_v55 }
 0x102   : > { %2922 = vmatmul.mubr.f32.gmra.mxu0 %v472_v54  ;;  %3018 = vmatmul.mubr.f32.gmra.mxu1 %v4445_v55 }
 0x103   : > { %2923 = vmatprep.mubr.f32.mxu0 %v473_v61  ;;  %3019 = vmatprep.mubr.f32.mxu1 %v4453_v63 }
 0x106   : > { %2924 = vmatmul.mubr.f32.gmra.mxu0 %v473_v61  ;;  %3020 = vmatmul.mubr.f32.gmra.mxu1 %v4453_v63 }
 0x107   : > { %2925 = vmatprep.mubr.f32.mxu0 %v474_v5  ;;  %3021 = vmatprep.mubr.f32.mxu1 %v4461_v7 }
 0x10a   : > { %2926 = vmatmul.mubr.f32.gmra.mxu0 %v474_v5  ;;  %3022 = vmatmul.mubr.f32.gmra.mxu1 %v4461_v7 }
 0x10b   : > { %2927 = vmatprep.mubr.f32.mxu0 %v475_v14  ;;  %3023 = vmatprep.mubr.f32.mxu1 %v4469_v16 }
 0x10e   : > { %2928 = vmatmul.mubr.f32.gmra.mxu0 %v475_v14  ;;  %3024 = vmatmul.mubr.f32.gmra.mxu1 %v4469_v16 }
 0x10f   : > { %2929 = vmatprep.mubr.f32.mxu0 %v476_v20  ;;  %3025 = vmatprep.mubr.f32.mxu1 %v4477_v21 }
 0x112   : > { %2930 = vmatmul.mubr.f32.gmra.mxu0 %v476_v20  ;;  %3026 = vmatmul.mubr.f32.gmra.mxu1 %v4477_v21 }
 0x113   : > { %2931 = vmatprep.mubr.f32.mxu0 %v477_v23  ;;  %3027 = vmatprep.mubr.f32.mxu1 %v4483_v24 }
 0x116   : > { %2932 = vmatmul.mubr.f32.gmra.mxu0 %v477_v23  ;;  %3028 = vmatmul.mubr.f32.gmra.mxu1 %v4483_v24 }
 0x117   : > { %2933 = vmatprep.mubr.f32.mxu0 %v478_v25  ;;  %3029 = vmatprep.mubr.f32.mxu1 %v4489_v27 }
 0x11a   : > { %2934 = vmatmul.mubr.f32.gmra.mxu0 %v478_v25  ;;  %3030 = vmatmul.mubr.f32.gmra.mxu1 %v4489_v27 }
 0x11b   : > { %2935 = vmatprep.mubr.f32.mxu0 %v479_v28  ;;  %3031 = vmatprep.mubr.f32.mxu1 %v4495_v29 }
 0x11e   : > { %2936 = vmatmul.mubr.f32.gmra.mxu0 %v479_v28  ;;  %3032 = vmatmul.mubr.f32.gmra.mxu1 %v4495_v29 }
 0x11f   : > { %3065 = vmatprep.mubr.f32.mxu0 %v4228_v9 }
 0x122   : > { %3066 = vmatmul.mubr.f32.vlgmr.msra.gmra.mxu0 %v4228_v9 }
 0x123   : > { %3067 = vmatprep.mubr.f32.mxu0 %v4261_v36  ;;  %3164 = vmatpush3.xpose.msra.mxu0 %v2353_v43 }
 0x126   : > { %3068 = vmatmul.mubr.f32.gmra.mxu0 %v4261_v36 }
 0x127   : > { %3069 = vmatprep.mubr.f32.mxu0 %v4275_v40 }
 0x12a   : > { %3070 = vmatmul.mubr.f32.gmra.mxu0 %v4275_v40 }
 0x12b   : > { %3071 = vmatprep.mubr.f32.mxu0 %v4289_v44 }
 0x12e   : > { %3072 = vmatmul.mubr.f32.gmra.mxu0 %v4289_v44 }
 0x12f   : > { %3073 = vmatprep.mubr.f32.mxu0 %v4303_v48 }
 0x132   : > { %3074 = vmatmul.mubr.f32.gmra.mxu0 %v4303_v48 }
 0x133   : > { %3075 = vmatprep.mubr.f32.mxu0 %v4315_v52 }
 0x136   : > { %3076 = vmatmul.mubr.f32.gmra.mxu0 %v4315_v52 }
 0x137   : > { %3077 = vmatprep.mubr.f32.mxu0 %v4324_v56 }
 0x13a   : > { %3078 = vmatmul.mubr.f32.gmra.mxu0 %v4324_v56 }
 0x13b   : > { %3079 = vmatprep.mubr.f32.mxu0 %v4330_v58 }
 0x13e   : > { %3080 = vmatmul.mubr.f32.gmra.mxu0 %v4330_v58 }
 0x13f   : > { %3081 = vmatprep.mubr.f32.mxu0 %v4336_v60 }
 0x142   : > { %3082 = vmatmul.mubr.f32.gmra.mxu0 %v4336_v60 }
 0x143   : > { %3083 = vmatprep.mubr.f32.mxu0 %v4342_v62 }
 0x146   : > { %3084 = vmatmul.mubr.f32.gmra.mxu0 %v4342_v62 }
 0x147   : > { %3085 = vmatprep.mubr.f32.mxu0 %v4348_v0 }
 0x14a   : > { %3086 = vmatmul.mubr.f32.gmra.mxu0 %v4348_v0 }
 0x14b   : > { %3087 = vmatprep.mubr.f32.mxu0 %v4354_v2 }
 0x14e   : > { %3088 = vmatmul.mubr.f32.gmra.mxu0 %v4354_v2 }
 0x14f   : > { %3089 = vmatprep.mubr.f32.mxu0 %v4360_v4 }
 0x152   : > { %3090 = vmatmul.mubr.f32.gmra.mxu0 %v4360_v4 }
 0x153   : > { %3091 = vmatprep.mubr.f32.mxu0 %v4366_v6 }
 0x156   : > { %3092 = vmatmul.mubr.f32.gmra.mxu0 %v4366_v6 }
 0x157   : > { %3093 = vmatprep.mubr.f32.mxu0 %v4372_v8 }
 0x15a   : > { %3094 = vmatmul.mubr.f32.gmra.mxu0 %v4372_v8 }
 0x15b   : > { %3095 = vmatprep.mubr.f32.mxu0 %v4378_v11 }
 0x15e   : > { %3096 = vmatmul.mubr.f32.gmra.mxu0 %v4378_v11 }
 0x15f   : > { %3097 = vmatprep.mubr.f32.mxu0 %v4384_v13 }
 0x162   : > { %v578_v9 = vpop.f32.mrf.mxu0  ;;  %v835_v36 = vpop.f32.mrf.mxu1  ;;  %3098 = vmatmul.mubr.f32.gmra.mxu0 %v4384_v13 }
 0x163   : > { %v1283_v40 = vmul.f32 2.5, %v578_v9  ;;  %v1475_v44 = vmul.f32 2.5, %v835_v36  ;;  %3099 = vmatprep.mubr.f32.mxu0 %v4390_v15 }
 0x164   : > { %v580_v48 = vpop.f32.mrf.mxu0  ;;  %v837_v52 = vpop.f32.mrf.mxu1 }
 0x165   : > { %v1347_v56 = vmul.f32 1.442695, %v1283_v40  ;;  %v1539_v58 = vmul.f32 1.442695, %v1475_v44  ;;  %v1284_v60 = vmul.f32 2.5, %v580_v48  ;;  %v1476_v62 = vmul.f32 2.5, %v837_v52 }
 0x166   : > { %v584_v0 = vpop.f32.mrf.mxu0  ;;  %v841_v2 = vpop.f32.mrf.mxu1  ;;  %3100 = vmatmul.mubr.f32.gmra.mxu0 %v4390_v15 }
 0x167   : > { %3313 = vpow2.f32 %v1347_v56  ;;  %v1349_v4 = vmul.f32 1.442695, %v1284_v60  ;;  %v1541_v6 = vmul.f32 1.442695, %v1476_v62  ;;  %v1285_v8 = vmul.f32 2.5, %v584_v0  ;;  %3101 = vmatprep.mubr.f32.mxu0 %v4397_v18 }
 0x168   : > { %3315 = vpow2.f32 %v1539_v58  ;;  %v1477_v11 = vmul.f32 2.5, %v841_v2  ;;  %v586_v13 = vpop.f32.mrf.mxu0  ;;  %v843_v31 = vpop.f32.mrf.mxu1 }
 0x169   : > { %3317 = vpow2.f32 %v1349_v4  ;;  %v1351_v32 = vmul.f32 1.442695, %v1285_v8  ;;  %v1286_v33 = vmul.f32 2.5, %v586_v13  ;;  %v1478_v39 = vmul.f32 2.5, %v843_v31 }
 0x16a   : > { %3319 = vpow2.f32 %v1541_v6  ;;  %v1543_v47 = vmul.f32 1.442695, %v1477_v11  ;;  %v590_v15 = vpop.f32.mrf.mxu0  ;;  %v847_v51 = vpop.f32.mrf.mxu1  ;;  %3102 = vmatmul.mubr.f32.gmra.mxu0 %v4397_v18  ;;  %v2352_v18 = vmul.f32 %v4280_v41, %v4280_v41  ;;  %v2368_v41 = vmul.f32 %v4270_v38, %v4270_v38 }
 0x16b   : > { %3321 = vpow2.f32 %v1351_v32  ;;  %v1353_v53 = vmul.f32 1.442695, %v1286_v33  ;;  %v1545_v54 = vmul.f32 1.442695, %v1478_v39  ;;  %v1287_v57 = vmul.f32 2.5, %v590_v15  ;;  %3103 = vmatprep.mubr.f32.mxu0 %v4405_v22 }
 0x16c   : > { %3323 = vpow2.f32 %v1543_v47  ;;  %v1479_v59 = vmul.f32 2.5, %v847_v51  ;;  %v592_v61 = vpop.f32.mrf.mxu0  ;;  %v849_v1 = vpop.f32.mrf.mxu1  ;;  %3165 = vmatprep.subr.mxu0 %v2368_v41  ;;  %v2350_v13 = vmul.f32 %v4308_v49, %v4308_v49 }
 0x16d   : > { %3325 = vpow2.f32 %v1353_v53  ;;  %v1355_v37 = vmul.f32 1.442695, %v1287_v57  ;;  %v1288_v5 = vmul.f32 2.5, %v592_v61  ;;  %v1480_v10 = vmul.f32 2.5, %v849_v1  ;;  %3166 = vmatpush3.xpose.msra.mxu0 %v2352_v18 }
 0x16e   : > { %3327 = vpow2.f32 %v1545_v54  ;;  %v1547_v12 = vmul.f32 1.442695, %v1479_v59  ;;  %v596_v14 = vpop.f32.mrf.mxu0  ;;  %v853_v17 = vpop.f32.mrf.mxu1  ;;  %3104 = vmatmul.mubr.f32.gmra.mxu0 %v4405_v22  ;;  %v2351_v22 = vmul.f32 %v4294_v45, %v4294_v45  ;;  %v2367_v45 = vmul.f32 %v4284_v42, %v4284_v42 }
 0x16f   : > { %3329 = vpow2.f32 %v1355_v37  ;;  %v1357_v19 = vmul.f32 1.442695, %v1288_v5  ;;  %v1549_v20 = vmul.f32 1.442695, %v1480_v10  ;;  %v1289_v23 = vmul.f32 2.5, %v596_v14  ;;  %3105 = vmatprep.mubr.f32.mxu0 %v4413_v26 }
 0x170   : > { %3331 = vpow2.f32 %v1547_v12  ;;  %v1481_v34 = vmul.f32 2.5, %v853_v17  ;;  %v598_v25 = vpop.f32.mrf.mxu0  ;;  %v855_v28 = vpop.f32.mrf.mxu1  ;;  %3167 = vmatprep.subr.mxu0 %v2367_v45  ;;  %v2366_v54 = vmul.f32 %v4298_v46, %v4298_v46 }
 0x171   : > { %3333 = vpow2.f32 %v1357_v19  ;;  %v1359_v9 = vmul.f32 1.442695, %v1289_v23  ;;  %v1290_v36 = vmul.f32 2.5, %v598_v25  ;;  %v1482_v40 = vmul.f32 2.5, %v855_v28  ;;  %3168 = vmatpush3.xpose.msra.mxu0 %v2351_v22 }
 0x172   : > { %3335 = vpow2.f32 %v1549_v20  ;;  %v1551_v44 = vmul.f32 1.442695, %v1481_v34  ;;  %v602_v48 = vpop.f32.mrf.mxu0  ;;  %v859_v52 = vpop.f32.mrf.mxu1  ;;  %3106 = vmatmul.mubr.f32.gmra.mxu0 %v4413_v26  ;;  %3169 = vmatprep.subr.mxu0 %v2366_v54 }
 0x173   : > { %3337 = vpow2.f32 %v1359_v9  ;;  %v1361_v56 = vmul.f32 1.442695, %v1290_v36  ;;  %v1553_v58 = vmul.f32 1.442695, %v1482_v40  ;;  %v1291_v60 = vmul.f32 2.5, %v602_v48  ;;  %3107 = vmatprep.mubr.f32.mxu0 %v4421_v30 }
 0x174   : > { %v3314_v38 = vpop.eup %3313  ;;  %3339 = vpow2.f32 %v1551_v44  ;;  %v1483_v62 = vmul.f32 2.5, %v859_v52  ;;  %v604_v0 = vpop.f32.mrf.mxu0 }
 0x175   : > { %v861_v2 = vpop.f32.mrf.mxu1  ;;  %v4555_v4 = vpop.eup %3315  ;;  %3341 = vpow2.f32 %v1361_v56  ;;  %v1363_v26 = vmul.f32 1.442695, %v1291_v60  ;;  %v1292_v6 = vmul.f32 2.5, %v604_v0  ;;  %3170 = vmatpush3.xpose.msra.mxu0 %v2350_v13 }
 0x176   : > { %v1484_v8 = vmul.f32 2.5, %v861_v2  ;;  %v3318_v11 = vpop.eup %3317  ;;  %3343 = vpow2.f32 %v1553_v58  ;;  %v1555_v31 = vmul.f32 1.442695, %v1483_v62  ;;  %v608_v32 = vpop.f32.mrf.mxu0  ;;  %3108 = vmatmul.mubr.f32.gmra.mxu0 %v4421_v30 }
 0x177   : > { %v865_v33 = vpop.f32.mrf.mxu1  ;;  %v4560_v39 = vpop.eup %3319  ;;  %3345 = vpow2.f32 %v1363_v26  ;;  %v1365_v42 = vmul.f32 1.442695, %v1292_v6  ;;  %v1293_v47 = vmul.f32 2.5, %v608_v32  ;;  %3109 = vmatprep.mubr.f32.mxu0 %v4429_v35 }
 0x178   : > { %v1557_v43 = vmul.f32 1.442695, %v1484_v8  ;;  %v3322_v15 = vpop.eup %3321  ;;  %3347 = vpow2.f32 %v1555_v31  ;;  %v1485_v51 = vmul.f32 2.5, %v865_v33  ;;  %v610_v49 = vpop.f32.mrf.mxu0 }
 0x179   : > { %v867_v53 = vpop.f32.mrf.mxu1  ;;  %v4565_v57 = vpop.eup %3323  ;;  %v1862_v30 = vadd.f32 %v3322_v15, %v3314_v38  ;;  %3349 = vpow2.f32 %v1365_v42  ;;  %v1367_v59 = vmul.f32 1.442695, %v1293_v47  ;;  %v1294_v61 = vmul.f32 2.5, %v610_v49 }
 0x17a   : > { %v3326_v1 = vpop.eup %3325  ;;  %v1936_v3 = vadd.f32 %v4565_v57, %v4555_v4  ;;  %3351 = vpow2.f32 %v1557_v43  ;;  %v1559_v37 = vmul.f32 1.442695, %v1485_v51  ;;  %v1486_v5 = vmul.f32 2.5, %v867_v53  ;;  %v614_v10 = vpop.f32.mrf.mxu0  ;;  %3110 = vmatmul.mubr.f32.gmra.mxu0 %v4429_v35 }
 0x17b   : > { %v871_v18 = vpop.f32.mrf.mxu1  ;;  %v4570_v12 = vpop.eup %3327  ;;  %v1899_v46 = vadd.f32 %v3326_v1, %v3318_v11  ;;  %3353 = vpow2.f32 %v1367_v59  ;;  %v1369_v14 = vmul.f32 1.442695, %v1294_v61  ;;  %v1295_v17 = vmul.f32 2.5, %v614_v10  ;;  %3111 = vmatprep.mubr.f32.mxu0 %v4437_v50 }
 0x17c   : > { %v3330_v19 = vpop.eup %3329  ;;  %v1973_v20 = vadd.f32 %v4570_v12, %v4560_v39  ;;  %3355 = vpow2.f32 %v1559_v37  ;;  %v1561_v23 = vmul.f32 1.442695, %v1486_v5  ;;  %v1487_v34 = vmul.f32 2.5, %v871_v18  ;;  %v616_v25 = vpop.f32.mrf.mxu0 }
 0x17d   : > { %v873_v28 = vpop.f32.mrf.mxu1  ;;  %v4575_v35 = vpop.eup %3331  ;;  %v1863_v41 = vadd.f32 %v3330_v19, %v1862_v30  ;;  %3357 = vpow2.f32 %v1369_v14  ;;  %v1371_v9 = vmul.f32 1.442695, %v1295_v17  ;;  %v1296_v36 = vmul.f32 2.5, %v616_v25 }
 0x17e   : > { %v3334_v40 = vpop.eup %3333  ;;  %v1937_v22 = vadd.f32 %v4575_v35, %v1936_v3  ;;  %3359 = vpow2.f32 %v1561_v23  ;;  %v1563_v44 = vmul.f32 1.442695, %v1487_v34  ;;  %v1488_v48 = vmul.f32 2.5, %v873_v28  ;;  %v620_v52 = vpop.f32.mrf.mxu0  ;;  %3112 = vmatmul.mubr.f32.gmra.mxu0 %v4437_v50 }
 0x17f   : > { %v877_v56 = vpop.f32.mrf.mxu1  ;;  %v4579_v58 = vpop.eup %3335  ;;  %v1900_v60 = vadd.f32 %v3334_v40, %v1899_v46  ;;  %3361 = vpow2.f32 %v1371_v9  ;;  %v1373_v38 = vmul.f32 1.442695, %v1296_v36  ;;  %v1297_v62 = vmul.f32 2.5, %v620_v52  ;;  %3113 = vmatprep.mubr.f32.mxu0 %v4445_v55 }
 0x180   : > { %v3338_v0 = vpop.eup %3337  ;;  %v1974_v2 = vadd.f32 %v4579_v58, %v1973_v20  ;;  %3363 = vpow2.f32 %v1563_v44  ;;  %v1565_v45 = vmul.f32 1.442695, %v1488_v48  ;;  %v1489_v26 = vmul.f32 2.5, %v877_v56  ;;  %v622_v6 = vpop.f32.mrf.mxu0 }
 0x181   : > { %v879_v8 = vpop.f32.mrf.mxu1  ;;  %v4583_v11 = vpop.eup %3339  ;;  %v1864_v13 = vadd.f32 %v3338_v0, %v1863_v41  ;;  %3365 = vpow2.f32 %v1373_v38  ;;  %v1375_v50 = vmul.f32 1.442695, %v1297_v62  ;;  %v1298_v31 = vmul.f32 2.5, %v622_v6 }
 0x182   : > { %v3342_v32 = vpop.eup %3341  ;;  %v1938_v33 = vadd.f32 %v4583_v11, %v1937_v22  ;;  %3367 = vpow2.f32 %v1565_v45  ;;  %v1567_v42 = vmul.f32 1.442695, %v1489_v26  ;;  %v1490_v43 = vmul.f32 2.5, %v879_v8  ;;  %v626_v47 = vpop.f32.mrf.mxu0  ;;  %3114 = vmatmul.mubr.f32.gmra.mxu0 %v4445_v55 }
 0x183   : > { %v883_v15 = vpop.f32.mrf.mxu1  ;;  %v4587_v51 = vpop.eup %3343  ;;  %v1901_v49 = vadd.f32 %v3342_v32, %v1900_v60  ;;  %3369 = vpow2.f32 %v1375_v50  ;;  %v1377_v53 = vmul.f32 1.442695, %v1298_v31  ;;  %v1299_v54 = vmul.f32 2.5, %v626_v47  ;;  %3115 = vmatprep.mubr.f32.mxu0 %v4453_v63 }
 0x184   : > { %v3346_v30 = vpop.eup %3345  ;;  %v1975_v59 = vadd.f32 %v4587_v51, %v1974_v2  ;;  %3371 = vpow2.f32 %v1567_v42  ;;  %v1569_v61 = vmul.f32 1.442695, %v1490_v43  ;;  %v1491_v1 = vmul.f32 2.5, %v883_v15  ;;  %v628_v3 = vpop.f32.mrf.mxu0 }
 0x185   : > { %v885_v37 = vpop.f32.mrf.mxu1  ;;  %v4591_v5 = vpop.eup %3347  ;;  %v1865_v10 = vadd.f32 %v3346_v30, %v1864_v13  ;;  %3373 = vpow2.f32 %v1377_v53  ;;  %v1379_v55 = vmul.f32 1.442695, %v1299_v54  ;;  %v1300_v18 = vmul.f32 2.5, %v628_v3 }
 0x186   : > { %v3350_v46 = vpop.eup %3349  ;;  %v1939_v14 = vadd.f32 %v4591_v5, %v1938_v33  ;;  %3375 = vpow2.f32 %v1569_v61  ;;  %v1571_v17 = vmul.f32 1.442695, %v1491_v1  ;;  %v1492_v19 = vmul.f32 2.5, %v885_v37  ;;  %v632_v20 = vpop.f32.mrf.mxu0  ;;  %3116 = vmatmul.mubr.f32.gmra.mxu0 %v4453_v63 }
 0x187   : > { %v889_v23 = vpop.f32.mrf.mxu1  ;;  %v4595_v34 = vpop.eup %3351  ;;  %v1902_v25 = vadd.f32 %v3350_v46, %v1901_v49  ;;  %3377 = vpow2.f32 %v1379_v55  ;;  %v1381_v28 = vmul.f32 1.442695, %v1300_v18  ;;  %v1301_v41 = vmul.f32 2.5, %v632_v20  ;;  %3117 = vmatprep.mubr.f32.mxu0 %v4461_v7 }
 0x188   : > { %v3354_v9 = vpop.eup %3353  ;;  %v1976_v36 = vadd.f32 %v4595_v34, %v1975_v59  ;;  %3379 = vpow2.f32 %v1571_v17  ;;  %v1573_v40 = vmul.f32 1.442695, %v1492_v19  ;;  %v1493_v22 = vmul.f32 2.5, %v889_v23  ;;  %v634_v44 = vpop.f32.mrf.mxu0 }
 0x189   : > { %v891_v48 = vpop.f32.mrf.mxu1  ;;  %v4599_v52 = vpop.eup %3355  ;;  %v1866_v56 = vadd.f32 %v3354_v9, %v1865_v10  ;;  %3381 = vpow2.f32 %v1381_v28  ;;  %v1383_v63 = vmul.f32 1.442695, %v1301_v41  ;;  %v1302_v60 = vmul.f32 2.5, %v634_v44 }
 0x18a   : > { %v3358_v38 = vpop.eup %3357  ;;  %v1940_v62 = vadd.f32 %v4599_v52, %v1939_v14  ;;  %3383 = vpow2.f32 %v1573_v40  ;;  %v1575_v0 = vmul.f32 1.442695, %v1493_v22  ;;  %v1494_v2 = vmul.f32 2.5, %v891_v48  ;;  %v638_v45 = vpop.f32.mrf.mxu0  ;;  %3118 = vmatmul.mubr.f32.gmra.mxu0 %v4461_v7 }
 0x18b   : > { %v895_v26 = vpop.f32.mrf.mxu1  ;;  %v4603_v6 = vpop.eup %3359  ;;  %v1903_v8 = vadd.f32 %v3358_v38, %v1902_v25  ;;  %3385 = vpow2.f32 %v1383_v63  ;;  %v1385_v13 = vmul.f32 1.442695, %v1302_v60  ;;  %v1303_v50 = vmul.f32 2.5, %v638_v45  ;;  %3119 = vmatprep.mubr.f32.mxu0 %v4469_v16 }
 0x18c   : > { %v3362_v31 = vpop.eup %3361  ;;  %v1977_v32 = vadd.f32 %v4603_v6, %v1976_v36  ;;  %3387 = vpow2.f32 %v1575_v0  ;;  %v1577_v33 = vmul.f32 1.442695, %v1494_v2  ;;  %v1495_v42 = vmul.f32 2.5, %v895_v26  ;;  %v640_v43 = vpop.f32.mrf.mxu0 }
 0x18d   : > { %v897_v47 = vpop.f32.mrf.mxu1  ;;  %v4607_v15 = vpop.eup %3363  ;;  %v1867_v49 = vadd.f32 %v3362_v31, %v1866_v56  ;;  %3389 = vpow2.f32 %v1385_v13  ;;  %v1387_v7 = vmul.f32 1.442695, %v1303_v50  ;;  %v1304_v53 = vmul.f32 2.5, %v640_v43 }
 0x18e   : > { %v3366_v54 = vpop.eup %3365  ;;  %v1941_v30 = vadd.f32 %v4607_v15, %v1940_v62  ;;  %3391 = vpow2.f32 %v1577_v33  ;;  %v1579_v59 = vmul.f32 1.442695, %v1495_v42  ;;  %v1496_v61 = vmul.f32 2.5, %v897_v47  ;;  %v644_v1 = vpop.f32.mrf.mxu0  ;;  %3120 = vmatmul.mubr.f32.gmra.mxu0 %v4469_v16 }
 0x18f   : > { %v901_v3 = vpop.f32.mrf.mxu1  ;;  %v4611_v37 = vpop.eup %3367  ;;  %v1904_v10 = vadd.f32 %v3366_v54, %v1903_v8  ;;  %3393 = vpow2.f32 %v1387_v7  ;;  %v1389_v55 = vmul.f32 1.442695, %v1304_v53  ;;  %v1305_v18 = vmul.f32 2.5, %v644_v1  ;;  %3121 = vmatprep.mubr.f32.mxu0 %v4477_v21 }
 0x190   : > { %v3370_v46 = vpop.eup %3369  ;;  %v1978_v14 = vadd.f32 %v4611_v37, %v1977_v32  ;;  %3395 = vpow2.f32 %v1579_v59  ;;  %v1581_v17 = vmul.f32 1.442695, %v1496_v61  ;;  %v1497_v19 = vmul.f32 2.5, %v901_v3  ;;  %v646_v20 = vpop.f32.mrf.mxu0 }
 0x191   : > { %v903_v23 = vpop.f32.mrf.mxu1  ;;  %v4615_v25 = vpop.eup %3371  ;;  %v1868_v28 = vadd.f32 %v3370_v46, %v1867_v49  ;;  %3397 = vpow2.f32 %v1389_v55  ;;  %v1391_v16 = vmul.f32 1.442695, %v1305_v18  ;;  %v1306_v41 = vmul.f32 2.5, %v646_v20 }
 0x192   : > { %v3374_v9 = vpop.eup %3373  ;;  %v1942_v36 = vadd.f32 %v4615_v25, %v1941_v30  ;;  %3399 = vpow2.f32 %v1581_v17  ;;  %v1583_v40 = vmul.f32 1.442695, %v1497_v19  ;;  %v1498_v22 = vmul.f32 2.5, %v903_v23  ;;  %v650_v44 = vpop.f32.mrf.mxu0  ;;  %3122 = vmatmul.mubr.f32.gmra.mxu0 %v4477_v21 }
 0x193   : > { %v907_v48 = vpop.f32.mrf.mxu1  ;;  %v4619_v56 = vpop.eup %3375  ;;  %v1905_v63 = vadd.f32 %v3374_v9, %v1904_v10  ;;  %3401 = vpow2.f32 %v1391_v16  ;;  %v1393_v60 = vmul.f32 1.442695, %v1306_v41  ;;  %v1307_v38 = vmul.f32 2.5, %v650_v44  ;;  %3123 = vmatprep.mubr.f32.mxu0 %v4483_v24 }
 0x194   : > { %v3378_v62 = vpop.eup %3377  ;;  %v1979_v0 = vadd.f32 %v4619_v56, %v1978_v14  ;;  %3403 = vpow2.f32 %v1583_v40  ;;  %v1585_v2 = vmul.f32 1.442695, %v1498_v22  ;;  %v1499_v45 = vmul.f32 2.5, %v907_v48  ;;  %v652_v26 = vpop.f32.mrf.mxu0 }
 0x195   : > { %v909_v8 = vpop.f32.mrf.mxu1  ;;  %v4623_v13 = vpop.eup %3379  ;;  %v1869_v50 = vadd.f32 %v3378_v62, %v1868_v28  ;;  %3405 = vpow2.f32 %v1393_v60  ;;  %v1395_v21 = vmul.f32 1.442695, %v1307_v38  ;;  %v1308_v31 = vmul.f32 2.5, %v652_v26 }
 0x196   : > { %v3382_v32 = vpop.eup %3381  ;;  %v1943_v33 = vadd.f32 %v4623_v13, %v1942_v36  ;;  %3407 = vpow2.f32 %v1585_v2  ;;  %v1587_v42 = vmul.f32 1.442695, %v1499_v45  ;;  %v1500_v43 = vmul.f32 2.5, %v909_v8  ;;  %v656_v47 = vpop.f32.mrf.mxu0  ;;  %3124 = vmatmul.mubr.f32.gmra.mxu0 %v4483_v24 }
 0x197   : > { %v913_v49 = vpop.f32.mrf.mxu1  ;;  %v4627_v7 = vpop.eup %3383  ;;  %v1906_v53 = vadd.f32 %v3382_v32, %v1905_v63  ;;  %3409 = vpow2.f32 %v1395_v21  ;;  %v1397_v54 = vmul.f32 1.442695, %v1308_v31  ;;  %v1309_v30 = vmul.f32 2.5, %v656_v47  ;;  %3125 = vmatprep.mubr.f32.mxu0 %v4489_v27 }
 0x198   : > { %v3386_v59 = vpop.eup %3385  ;;  %v1980_v61 = vadd.f32 %v4627_v7, %v1979_v0  ;;  %3411 = vpow2.f32 %v1587_v42  ;;  %v1589_v1 = vmul.f32 1.442695, %v1500_v43  ;;  %v1501_v3 = vmul.f32 2.5, %v913_v49  ;;  %v658_v10 = vpop.f32.mrf.mxu0 }
 0x199   : > { %v915_v55 = vpop.f32.mrf.mxu1  ;;  %v4631_v18 = vpop.eup %3387  ;;  %v1870_v46 = vadd.f32 %v3386_v59, %v1869_v50  ;;  %3413 = vpow2.f32 %v1397_v54  ;;  %v1399_v24 = vmul.f32 1.442695, %v1309_v30  ;;  %v1310_v14 = vmul.f32 2.5, %v658_v10 }
 0x19a   : > { %v3390_v17 = vpop.eup %3389  ;;  %v1944_v19 = vadd.f32 %v4631_v18, %v1943_v33  ;;  %3415 = vpow2.f32 %v1589_v1  ;;  %v1591_v20 = vmul.f32 1.442695, %v1501_v3  ;;  %v1502_v23 = vmul.f32 2.5, %v915_v55  ;;  %v662_v28 = vpop.f32.mrf.mxu0  ;;  %3126 = vmatmul.mubr.f32.gmra.mxu0 %v4489_v27 }
 0x19b   : > { %v919_v16 = vpop.f32.mrf.mxu1  ;;  %v4635_v41 = vpop.eup %3391  ;;  %v1907_v9 = vadd.f32 %v3390_v17, %v1906_v53  ;;  %3417 = vpow2.f32 %v1399_v24  ;;  %v1401_v36 = vmul.f32 1.442695, %v1310_v14  ;;  %v1311_v40 = vmul.f32 2.5, %v662_v28  ;;  %3127 = vmatprep.mubr.f32.mxu0 %v4495_v29 }
 0x19c   : > { %v3394_v22 = vpop.eup %3393  ;;  %v1981_v44 = vadd.f32 %v4635_v41, %v1980_v61  ;;  %3419 = vpow2.f32 %v1591_v20  ;;  %v1593_v48 = vmul.f32 1.442695, %v1502_v23  ;;  %v1503_v63 = vmul.f32 2.5, %v919_v16  ;;  %v664_v60 = vpop.f32.mrf.mxu0 }
 0x19d   : > { %v921_v38 = vpop.f32.mrf.mxu1  ;;  %v4639_v62 = vpop.eup %3395  ;;  %v1871_v0 = vadd.f32 %v3394_v22, %v1870_v46  ;;  %3421 = vpow2.f32 %v1401_v36  ;;  %v1403_v27 = vmul.f32 1.442695, %v1311_v40  ;;  %v1312_v2 = vmul.f32 2.5, %v664_v60 }
 0x19e   : > { %v3398_v45 = vpop.eup %3397  ;;  %v1945_v26 = vadd.f32 %v4639_v62, %v1944_v19  ;;  %3423 = vpow2.f32 %v1593_v48  ;;  %v1595_v8 = vmul.f32 1.442695, %v1503_v63  ;;  %v1504_v50 = vmul.f32 2.5, %v921_v38  ;;  %v668_v21 = vpop.f32.mrf.mxu0  ;;  %3128 = vmatmul.mubr.f32.gmra.mxu0 %v4495_v29 }
 0x19f   : > { %v925_v31 = vpop.f32.mrf.mxu1  ;;  %v4643_v32 = vpop.eup %3399  ;;  %v1908_v33 = vadd.f32 %v3398_v45, %v1907_v9  ;;  %3425 = vpow2.f32 %v1403_v27  ;;  %v1405_v42 = vmul.f32 1.442695, %v1312_v2  ;;  %v1313_v43 = vmul.f32 2.5, %v668_v21 }
 0x1a0   : > { %v3402_v47 = vpop.eup %3401  ;;  %v1982_v49 = vadd.f32 %v4643_v32, %v1981_v44  ;;  %3427 = vpow2.f32 %v1595_v8  ;;  %v1597_v53 = vmul.f32 1.442695, %v1504_v50  ;;  %v1505_v54 = vmul.f32 2.5, %v925_v31  ;;  %v670_v30 = vpop.f32.mrf.mxu0 }
 0x1a1   : > { %v927_v59 = vpop.f32.mrf.mxu1  ;;  %v4646_v61 = vpop.eup %3403  ;;  %v1872_v1 = vadd.f32 %v3402_v47, %v1871_v0  ;;  %3429 = vpow2.f32 %v1405_v42  ;;  %v1407_v3 = vmul.f32 1.442695, %v1313_v43  ;;  %v1314_v29 = vmul.f32 2.5, %v670_v30 }
 0x1a2   : > { %v3406_v10 = vpop.eup %3405  ;;  %v1946_v55 = vadd.f32 %v4646_v61, %v1945_v26  ;;  %3431 = vpow2.f32 %v1597_v53  ;;  %v1599_v46 = vmul.f32 1.442695, %v1505_v54  ;;  %v1506_v24 = vmul.f32 2.5, %v927_v59  ;;  %v674_v14 = vpop.f32.mrf.mxu0 }
 0x1a3   : > { %v931_v17 = vpop.f32.mrf.mxu1  ;;  %v4649_v19 = vpop.eup %3407  ;;  %v1909_v20 = vadd.f32 %v3406_v10, %v1908_v33  ;;  %3433 = vpow2.f32 %v1407_v3  ;;  %v1409_v23 = vmul.f32 1.442695, %v1314_v29  ;;  %v1315_v28 = vmul.f32 2.5, %v674_v14 }
 0x1a4   : > { %v3410_v16 = vpop.eup %3409  ;;  %v1983_v9 = vadd.f32 %v4649_v19, %v1982_v49  ;;  %3435 = vpow2.f32 %v1599_v46  ;;  %v1601_v36 = vmul.f32 1.442695, %v1506_v24  ;;  %v1507_v40 = vmul.f32 2.5, %v931_v17  ;;  %v676_v22 = vpop.f32.mrf.mxu0 }
 0x1a5   : > { %v933_v44 = vpop.f32.mrf.mxu1  ;;  %v4652_v48 = vpop.eup %3411  ;;  %v1873_v63 = vadd.f32 %v3410_v16, %v1872_v1  ;;  %3437 = vpow2.f32 %v1409_v23  ;;  %v1411_v60 = vmul.f32 1.442695, %v1315_v28  ;;  %v1316_v38 = vmul.f32 2.5, %v676_v22 }
 0x1a6   : > { %v3414_v0 = vpop.eup %3413  ;;  %v1947_v27 = vadd.f32 %v4652_v48, %v1946_v55  ;;  %3439 = vpow2.f32 %v1601_v36  ;;  %v1603_v2 = vmul.f32 1.442695, %v1507_v40  ;;  %v1508_v45 = vmul.f32 2.5, %v933_v44  ;;  %v680_v26 = vpop.f32.mrf.mxu0 }
 0x1a7   : > { %v937_v8 = vpop.f32.mrf.mxu1  ;;  %v4655_v50 = vpop.eup %3415  ;;  %v1910_v21 = vadd.f32 %v3414_v0, %v1909_v20  ;;  %3441 = vpow2.f32 %v1411_v60  ;;  %v1413_v31 = vmul.f32 1.442695, %v1316_v38  ;;  %v1317_v33 = vmul.f32 2.5, %v680_v26 }
 0x1a8   : > { %v3418_v42 = vpop.eup %3417  ;;  %v1984_v43 = vadd.f32 %v4655_v50, %v1983_v9  ;;  %3443 = vpow2.f32 %v1603_v2  ;;  %v1605_v47 = vmul.f32 1.442695, %v1508_v45  ;;  %v1509_v49 = vmul.f32 2.5, %v937_v8  ;;  %v682_v53 = vpop.f32.mrf.mxu0 }
 0x1a9   : > { %v939_v54 = vpop.f32.mrf.mxu1  ;;  %v4658_v30 = vpop.eup %3419  ;;  %v1874_v59 = vadd.f32 %v3418_v42, %v1873_v63  ;;  %3445 = vpow2.f32 %v1413_v31  ;;  %v1415_v1 = vmul.f32 1.442695, %v1317_v33  ;;  %v1318_v3 = vmul.f32 2.5, %v682_v53 }
 0x1aa   : > { %v3422_v29 = vpop.eup %3421  ;;  %v1948_v10 = vadd.f32 %v4658_v30, %v1947_v27  ;;  %3447 = vpow2.f32 %v1605_v47  ;;  %v1607_v55 = vmul.f32 1.442695, %v1509_v49  ;;  %v1510_v46 = vmul.f32 2.5, %v939_v54  ;;  %v686_v24 = vpop.f32.mrf.mxu0 }
 0x1ab   : > { %v943_v14 = vpop.f32.mrf.mxu1  ;;  %v4661_v17 = vpop.eup %3423  ;;  %v1911_v20 = vadd.f32 %v3422_v29, %v1910_v21  ;;  %3449 = vpow2.f32 %v1415_v1  ;;  %v1417_v23 = vmul.f32 1.442695, %v1318_v3  ;;  %v1319_v28 = vmul.f32 2.5, %v686_v24 }
 0x1ac   : > { %v3426_v16 = vpop.eup %3425  ;;  %v1985_v9 = vadd.f32 %v4661_v17, %v1984_v43  ;;  %3451 = vpow2.f32 %v1607_v55  ;;  %v1609_v36 = vmul.f32 1.442695, %v1510_v46  ;;  %v1511_v40 = vmul.f32 2.5, %v943_v14  ;;  %v688_v22 = vpop.f32.mrf.mxu0 }
 0x1ad   : > { %v945_v44 = vpop.f32.mrf.mxu1  ;;  %v4664_v63 = vpop.eup %3427  ;;  %v1875_v60 = vadd.f32 %v3426_v16, %v1874_v59  ;;  %3453 = vpow2.f32 %v1417_v23  ;;  %v1419_v38 = vmul.f32 1.442695, %v1319_v28  ;;  %v1320_v0 = vmul.f32 2.5, %v688_v22 }
 0x1ae   : > { %v3430_v27 = vpop.eup %3429  ;;  %v1949_v2 = vadd.f32 %v4664_v63, %v1948_v10  ;;  %3455 = vpow2.f32 %v1609_v36  ;;  %v1611_v45 = vmul.f32 1.442695, %v1511_v40  ;;  %v1512_v26 = vmul.f32 2.5, %v945_v44  ;;  %v692_v8 = vpop.f32.mrf.mxu0 }
 0x1af   : > { %v949_v21 = vpop.f32.mrf.mxu1  ;;  %v3432_v31 = vpop.eup %3431  ;;  %v1912_v33 = vadd.f32 %v3430_v27, %v1911_v20  ;;  %3457 = vpow2.f32 %v1419_v38  ;;  %v1421_v42 = vmul.f32 1.442695, %v1320_v0  ;;  %v1321_v43 = vmul.f32 2.5, %v692_v8 }
 0x1b0   : > { %v3434_v47 = vpop.eup %3433  ;;  %v1986_v49 = vadd.f32 %v3432_v31, %v1985_v9  ;;  %3459 = vpow2.f32 %v1611_v45  ;;  %v1613_v53 = vmul.f32 1.442695, %v1512_v26  ;;  %v1513_v54 = vmul.f32 2.5, %v949_v21  ;;  %v694_v59 = vpop.f32.mrf.mxu0 }
 0x1b1   : > { %v951_v1 = vpop.f32.mrf.mxu1  ;;  %v3436_v3 = vpop.eup %3435  ;;  %v1876_v29 = vadd.f32 %v3434_v47, %v1875_v60  ;;  %3461 = vpow2.f32 %v1421_v42  ;;  %v1423_v10 = vmul.f32 1.442695, %v1321_v43  ;;  %v1322_v55 = vmul.f32 2.5, %v694_v59 }
 0x1b2   : > { %v3438_v46 = vpop.eup %3437  ;;  %v4667_v24 = vadd.f32 %v3436_v3, %v1949_v2  ;;  %3463 = vpow2.f32 %v1613_v53  ;;  %v1615_v14 = vmul.f32 1.442695, %v1513_v54  ;;  %v1514_v20 = vmul.f32 2.5, %v951_v1  ;;  %v698_v23 = vpop.f32.mrf.mxu0 }
 0x1b3   : > { %v955_v28 = vpop.f32.mrf.mxu1  ;;  %v3440_v16 = vpop.eup %3439  ;;  %v1913_v9 = vadd.f32 %v3438_v46, %v1912_v33  ;;  %3465 = vpow2.f32 %v1423_v10  ;;  %v1425_v36 = vmul.f32 1.442695, %v1322_v55  ;;  %v1323_v40 = vmul.f32 2.5, %v698_v23 }
 0x1b4   : > { %v3442_v22 = vpop.eup %3441  ;;  %v4669_v44 = vadd.f32 %v3440_v16, %v1986_v49  ;;  %3467 = vpow2.f32 %v1615_v14  ;;  %v1617_v60 = vmul.f32 1.442695, %v1514_v20  ;;  %v1515_v38 = vmul.f32 2.5, %v955_v28  ;;  %2132 = vmatprep.subr.mxu1 %v3440_v16  ;;  %v700_v0 = vpop.f32.mrf.mxu0 }
 0x1b5   : > { %v957_v27 = vpop.f32.mrf.mxu1  ;;  %v4671_v2 = vpop.eup %3443  ;;  %v1877_v45 = vadd.f32 %v3442_v22, %v1876_v29  ;;  %3469 = vpow2.f32 %v1425_v36  ;;  %v1427_v26 = vmul.f32 1.442695, %v1323_v40  ;;  %v1324_v8 = vmul.f32 2.5, %v700_v0  ;;  %2133 = vmatpush1.xpose.msra.mxu1 %v3436_v3 }
 0x1b6   : > { %v3446_v21 = vpop.eup %3445  ;;  %3471 = vpow2.f32 %v1617_v60  ;;  %v1619_v33 = vmul.f32 1.442695, %v1515_v38  ;;  %v1516_v42 = vmul.f32 2.5, %v957_v27  ;;  %2134 = vmatprep.subr.mxu1 %v3432_v31  ;;  %v704_v43 = vpop.f32.mrf.mxu0 }
 0x1b7   : > { %v961_v47 = vpop.f32.mrf.mxu1  ;;  %v4673_v49 = vpop.eup %3447  ;;  %v1914_v53 = vadd.f32 %v3446_v21, %v1913_v9  ;;  %3473 = vpow2.f32 %v1427_v26  ;;  %v1429_v54 = vmul.f32 1.442695, %v1324_v8  ;;  %v1325_v59 = vmul.f32 2.5, %v704_v43 }
 0x1b8   : > { %v3450_v1 = vpop.eup %3449  ;;  %3475 = vpow2.f32 %v1619_v33  ;;  %v1621_v29 = vmul.f32 1.442695, %v1516_v42  ;;  %v1517_v10 = vmul.f32 2.5, %v961_v47  ;;  %v706_v55 = vpop.f32.mrf.mxu0 }
 0x1b9   : > { %v963_v46 = vpop.f32.mrf.mxu1  ;;  %v4675_v3 = vpop.eup %3451  ;;  %v1878_v14 = vadd.f32 %v3450_v1, %v1877_v45  ;;  %3477 = vpow2.f32 %v1429_v54  ;;  %v1431_v20 = vmul.f32 1.442695, %v1325_v59  ;;  %v1326_v31 = vmul.f32 2.5, %v706_v55  ;;  %2135 = vmatpush1.xpose.msra.mxu1 %v4664_v63 }
 0x1ba   : > { %v3454_v23 = vpop.eup %3453  ;;  %3479 = vpow2.f32 %v1621_v29  ;;  %v1623_v28 = vmul.f32 1.442695, %v1517_v10  ;;  %v1518_v16 = vmul.f32 2.5, %v963_v46  ;;  %2136 = vmatprep.subr.mxu1 %v4661_v17  ;;  %v710_v9 = vpop.f32.mrf.mxu0 }
 0x1bb   : > { %v967_v36 = vpop.f32.mrf.mxu1  ;;  %v4679_v40 = vpop.eup %3455  ;;  %v1915_v22 = vadd.f32 %v3454_v23, %v1914_v53  ;;  %3481 = vpow2.f32 %v1431_v20  ;;  %v1433_v60 = vmul.f32 1.442695, %v1326_v31  ;;  %v1327_v38 = vmul.f32 2.5, %v710_v9 }
 0x1bc   : > { %v3458_v0 = vpop.eup %3457  ;;  %3483 = vpow2.f32 %v1623_v28  ;;  %v1625_v27 = vmul.f32 1.442695, %v1518_v16  ;;  %v1519_v45 = vmul.f32 2.5, %v967_v36  ;;  %v712_v26 = vpop.f32.mrf.mxu0 }
 0x1bd   : > { %v969_v63 = vpop.f32.mrf.mxu1  ;;  %v4681_v8 = vpop.eup %3459  ;;  %v1879_v21 = vadd.f32 %v3458_v0, %v1878_v14  ;;  %3485 = vpow2.f32 %v1433_v60  ;;  %v1435_v33 = vmul.f32 1.442695, %v1327_v38  ;;  %v1328_v17 = vmul.f32 2.5, %v712_v26  ;;  %2137 = vmatpush1.xpose.msra.mxu1 %v4658_v30 }
 0x1be   : > { %v3462_v42 = vpop.eup %3461  ;;  %3487 = vpow2.f32 %v1625_v27  ;;  %v1627_v43 = vmul.f32 1.442695, %v1519_v45  ;;  %v1520_v47 = vmul.f32 2.5, %v969_v63  ;;  %2138 = vmatprep.subr.mxu1 %v4655_v50  ;;  %v716_v53 = vpop.f32.mrf.mxu0 }
 0x1bf   : > { %v973_v54 = vpop.f32.mrf.mxu1  ;;  %v4685_v59 = vpop.eup %3463  ;;  %v1916_v1 = vadd.f32 %v3462_v42, %v1915_v22  ;;  %3489 = vpow2.f32 %v1435_v33  ;;  %v1437_v29 = vmul.f32 1.442695, %v1328_v17  ;;  %v1329_v10 = vmul.f32 2.5, %v716_v53 }
 0x1c0   : > { %v3466_v55 = vpop.eup %3465  ;;  %3491 = vpow2.f32 %v1627_v43  ;;  %v1629_v46 = vmul.f32 1.442695, %v1520_v47  ;;  %v1521_v14 = vmul.f32 2.5, %v973_v54  ;;  %v718_v20 = vpop.f32.mrf.mxu0 }
 0x1c1   : > { %v975_v30 = vpop.f32.mrf.mxu1  ;;  %v4687_v31 = vpop.eup %3467  ;;  %v1880_v23 = vadd.f32 %v3466_v55, %v1879_v21  ;;  %3493 = vpow2.f32 %v1437_v29  ;;  %v1439_v28 = vmul.f32 1.442695, %v1329_v10  ;;  %v1330_v50 = vmul.f32 2.5, %v718_v20  ;;  %2139 = vmatpush1.xpose.msra.mxu1 %v4652_v48 }
 0x1c2   : > { %v3470_v16 = vpop.eup %3469  ;;  %3495 = vpow2.f32 %v1629_v46  ;;  %v1631_v9 = vmul.f32 1.442695, %v1521_v14  ;;  %v1522_v36 = vmul.f32 2.5, %v975_v30  ;;  %2140 = vmatprep.subr.mxu1 %v4649_v19  ;;  %v722_v22 = vpop.f32.mrf.mxu0  ;;  %v1951_v30 = vadd.f32 %v4671_v2, %v4667_v24 }
 0x1c3   : > { %v979_v60 = vpop.f32.mrf.mxu1  ;;  %v4691_v38 = vpop.eup %3471  ;;  %v1917_v0 = vadd.f32 %v3470_v16, %v1916_v1  ;;  %3497 = vpow2.f32 %v1439_v28  ;;  %v1441_v27 = vmul.f32 1.442695, %v1330_v50  ;;  %v1331_v45 = vmul.f32 2.5, %v722_v22 }
 0x1c4   : > { %v3474_v26 = vpop.eup %3473  ;;  %3499 = vpow2.f32 %v1631_v9  ;;  %v1633_v63 = vmul.f32 1.442695, %v1522_v36  ;;  %v1523_v21 = vmul.f32 2.5, %v979_v60  ;;  %v724_v33 = vpop.f32.mrf.mxu0  ;;  %v1988_v60 = vadd.f32 %v4673_v49, %v4669_v44 }
 0x1c5   : > { %v981_v48 = vpop.f32.mrf.mxu1  ;;  %v4693_v17 = vpop.eup %3475  ;;  %v1881_v42 = vadd.f32 %v3474_v26, %v1880_v23  ;;  %3501 = vpow2.f32 %v1441_v27  ;;  %v1443_v43 = vmul.f32 1.442695, %v1331_v45  ;;  %v1332_v19 = vmul.f32 2.5, %v724_v33  ;;  %2141 = vmatpush1.xpose.msra.mxu1 %v4646_v61 }
 0x1c6   : > { %v3478_v47 = vpop.eup %3477  ;;  %3503 = vpow2.f32 %v1633_v63  ;;  %v1635_v53 = vmul.f32 1.442695, %v1523_v21  ;;  %v1524_v54 = vmul.f32 2.5, %v981_v48  ;;  %2142 = vmatprep.subr.mxu1 %v4643_v32  ;;  %v728_v1 = vpop.f32.mrf.mxu0 }
 0x1c7   : > { %v985_v29 = vpop.f32.mrf.mxu1  ;;  %v4697_v10 = vpop.eup %3479  ;;  %v1918_v55 = vadd.f32 %v3478_v47, %v1917_v0  ;;  %3505 = vpow2.f32 %v1443_v43  ;;  %v1445_v46 = vmul.f32 1.442695, %v1332_v19  ;;  %v1333_v14 = vmul.f32 2.5, %v728_v1 }
 0x1c8   : > { %v3482_v20 = vpop.eup %3481  ;;  %3507 = vpow2.f32 %v1635_v53  ;;  %v1637_v61 = vmul.f32 1.442695, %v1524_v54  ;;  %v1525_v23 = vmul.f32 2.5, %v985_v29  ;;  %v730_v28 = vpop.f32.mrf.mxu0  ;;  %v1989_v29 = vadd.f32 %v4679_v40, %v1988_v60 }
 0x1c9   : > { %v987_v50 = vpop.f32.mrf.mxu1  ;;  %v4701_v16 = vpop.eup %3483  ;;  %v1882_v32 = vadd.f32 %v3482_v20, %v1881_v42  ;;  %3509 = vpow2.f32 %v1445_v46  ;;  %v1447_v9 = vmul.f32 1.442695, %v1333_v14  ;;  %v1334_v36 = vmul.f32 2.5, %v730_v28  ;;  %2143 = vmatpush1.xpose.msra.mxu1 %v4639_v62 }
 0x1ca   : > { %v3486_v22 = vpop.eup %3485  ;;  %3511 = vpow2.f32 %v1637_v61  ;;  %v1639_v0 = vmul.f32 1.442695, %v1525_v23  ;;  %v1526_v24 = vmul.f32 2.5, %v987_v50  ;;  %2144 = vmatprep.subr.mxu1 %v4635_v41  ;;  %v734_v27 = vpop.f32.mrf.mxu0  ;;  %v1952_v62 = vadd.f32 %v4675_v3, %v1951_v30 }
 0x1cb   : > { %v991_v45 = vpop.f32.mrf.mxu1  ;;  %v4707_v26 = vpop.eup %3487  ;;  %v1919_v63 = vadd.f32 %v3486_v22, %v1918_v55  ;;  %3513 = vpow2.f32 %v1447_v9  ;;  %v1449_v21 = vmul.f32 1.442695, %v1334_v36  ;;  %v1335_v33 = vmul.f32 2.5, %v734_v27 }
 0x1cc   : > { %v3490_v48 = vpop.eup %3489  ;;  %3515 = vpow2.f32 %v1639_v0  ;;  %v1641_v42 = vmul.f32 1.442695, %v1526_v24  ;;  %v1527_v43 = vmul.f32 2.5, %v991_v45  ;;  %v736_v44 = vpop.f32.mrf.mxu0  ;;  %v1990_v45 = vadd.f32 %v4685_v59, %v1989_v29 }
 0x1cd   : > { %v993_v19 = vpop.f32.mrf.mxu1  ;;  %v4710_v47 = vpop.eup %3491  ;;  %v1883_v53 = vadd.f32 %v3490_v48, %v1882_v32  ;;  %3517 = vpow2.f32 %v1449_v21  ;;  %v1451_v41 = vmul.f32 1.442695, %v1335_v33  ;;  %v1336_v54 = vmul.f32 2.5, %v736_v44  ;;  %2145 = vmatpush1.xpose.msra.mxu1 %v4631_v18 }
 0x1ce   : > { %v3494_v1 = vpop.eup %3493  ;;  %3519 = vpow2.f32 %v1641_v42  ;;  %v1643_v55 = vmul.f32 1.442695, %v1527_v43  ;;  %v1528_v46 = vmul.f32 2.5, %v993_v19  ;;  %2146 = vmatprep.subr.mxu1 %v4627_v7  ;;  %v740_v14 = vpop.f32.mrf.mxu0  ;;  %v1953_v32 = vadd.f32 %v4681_v8, %v1952_v62 }
 0x1cf   : > { %v997_v20 = vpop.f32.mrf.mxu1  ;;  %v4715_v30 = vpop.eup %3495  ;;  %v1920_v61 = vadd.f32 %v3494_v1, %v1919_v63  ;;  %3521 = vpow2.f32 %v1451_v41  ;;  %v1453_v23 = vmul.f32 1.442695, %v1336_v54  ;;  %v1337_v28 = vmul.f32 2.5, %v740_v14 }
 0x1d0   : > { %v3498_v50 = vpop.eup %3497  ;;  %3523 = vpow2.f32 %v1643_v55  ;;  %v1645_v18 = vmul.f32 1.442695, %v1528_v46  ;;  %v1529_v9 = vmul.f32 2.5, %v997_v20  ;;  %v742_v36 = vpop.f32.mrf.mxu0  ;;  %v1991_v20 = vadd.f32 %v4691_v38, %v1990_v45 }
 0x1d1   : > { %v999_v22 = vpop.f32.mrf.mxu1  ;;  %v4718_v60 = vpop.eup %3499  ;;  %v1884_v0 = vadd.f32 %v3498_v50, %v1883_v53  ;;  %3525 = vpow2.f32 %v1453_v23  ;;  %v1455_v7 = vmul.f32 1.442695, %v1337_v28  ;;  %v1338_v24 = vmul.f32 2.5, %v742_v36  ;;  %2147 = vmatpush1.xpose.msra.mxu1 %v4623_v13 }
 0x1d2   : > { %v3502_v27 = vpop.eup %3501  ;;  %3527 = vpow2.f32 %v1645_v18  ;;  %v1647_v63 = vmul.f32 1.442695, %v1529_v9  ;;  %v1530_v21 = vmul.f32 2.5, %v999_v22  ;;  %2148 = vmatprep.subr.mxu1 %v4619_v56  ;;  %v746_v33 = vpop.f32.mrf.mxu0  ;;  %v1954_v53 = vadd.f32 %v4687_v31, %v1953_v32 }
 0x1d3   : > { %v1003_v48 = vpop.f32.mrf.mxu1  ;;  %v4723_v62 = vpop.eup %3503  ;;  %v1921_v42 = vadd.f32 %v3502_v27, %v1920_v61  ;;  %3529 = vpow2.f32 %v1455_v7  ;;  %v1457_v43 = vmul.f32 1.442695, %v1338_v24  ;;  %v1339_v44 = vmul.f32 2.5, %v746_v33 }
 0x1d4   : > { %v3506_v19 = vpop.eup %3505  ;;  %3531 = vpow2.f32 %v1647_v63  ;;  %v1649_v13 = vmul.f32 1.442695, %v1530_v21  ;;  %v1531_v41 = vmul.f32 2.5, %v1003_v48  ;;  %v748_v54 = vpop.f32.mrf.mxu0  ;;  %v1992_v48 = vadd.f32 %v4697_v10, %v1991_v20 }
 0x1d5   : > { %v1005_v1 = vpop.f32.mrf.mxu1  ;;  %v4726_v29 = vpop.eup %3507  ;;  %v1885_v55 = vadd.f32 %v3506_v19, %v1884_v0  ;;  %3533 = vpow2.f32 %v1457_v43  ;;  %v1459_v56 = vmul.f32 1.442695, %v1339_v44  ;;  %v1340_v46 = vmul.f32 2.5, %v748_v54  ;;  %2149 = vmatpush1.xpose.msra.mxu1 %v4615_v25 }
 0x1d6   : > { %v3510_v14 = vpop.eup %3509  ;;  %3535 = vpow2.f32 %v1649_v13  ;;  %v1651_v61 = vmul.f32 1.442695, %v1531_v41  ;;  %v1532_v23 = vmul.f32 2.5, %v1005_v1  ;;  %2150 = vmatprep.subr.mxu1 %v4611_v37  ;;  %v752_v28 = vpop.f32.mrf.mxu0  ;;  %v1955_v0 = vadd.f32 %v4693_v17, %v1954_v53 }
 0x1d7   : > { %v1009_v50 = vpop.f32.mrf.mxu1  ;;  %v4731_v32 = vpop.eup %3511  ;;  %v1922_v18 = vadd.f32 %v3510_v14, %v1921_v42  ;;  %3537 = vpow2.f32 %v1459_v56  ;;  %v1461_v9 = vmul.f32 1.442695, %v1340_v46  ;;  %v1341_v36 = vmul.f32 2.5, %v752_v28 }
 0x1d8   : > { %v3514_v22 = vpop.eup %3513  ;;  %3539 = vpow2.f32 %v1651_v61  ;;  %v1653_v25 = vmul.f32 1.442695, %v1532_v23  ;;  %v1533_v7 = vmul.f32 2.5, %v1009_v50  ;;  %v754_v24 = vpop.f32.mrf.mxu0  ;;  %v1993_v50 = vadd.f32 %v4707_v26, %v1992_v48 }
 0x1d9   : > { %v1011_v27 = vpop.f32.mrf.mxu1  ;;  %v4734_v45 = vpop.eup %3515  ;;  %v1886_v63 = vadd.f32 %v3514_v22, %v1885_v55  ;;  %3541 = vpow2.f32 %v1461_v9  ;;  %v1463_v37 = vmul.f32 1.442695, %v1341_v36  ;;  %v1342_v21 = vmul.f32 2.5, %v754_v24  ;;  %2151 = vmatpush1.xpose.msra.mxu1 %v4607_v15 }
 0x1da   : > { %v3518_v33 = vpop.eup %3517  ;;  %3543 = vpow2.f32 %v1653_v25  ;;  %v1655_v42 = vmul.f32 1.442695, %v1533_v7  ;;  %v1534_v43 = vmul.f32 2.5, %v1011_v27  ;;  %2152 = vmatprep.subr.mxu1 %v4603_v6  ;;  %v758_v44 = vpop.f32.mrf.mxu0  ;;  %v1956_v55 = vadd.f32 %v4701_v16, %v1955_v0 }
 0x1db   : > { %v1015_v19 = vpop.f32.mrf.mxu1  ;;  %v4739_v53 = vpop.eup %3519  ;;  %v1923_v13 = vadd.f32 %v3518_v33, %v1922_v18  ;;  %3545 = vpow2.f32 %v1463_v37  ;;  %v1465_v41 = vmul.f32 1.442695, %v1342_v21  ;;  %v1343_v54 = vmul.f32 2.5, %v758_v44 }
 0x1dc   : > { %v3522_v1 = vpop.eup %3521  ;;  %3547 = vpow2.f32 %v1655_v42  ;;  %v1657_v15 = vmul.f32 1.442695, %v1534_v43  ;;  %v1535_v56 = vmul.f32 2.5, %v1015_v19  ;;  %v760_v46 = vpop.f32.mrf.mxu0  ;;  %v1994_v19 = vadd.f32 %v4715_v30, %v1993_v50 }
 0x1dd   : > { %v1017_v14 = vpop.f32.mrf.mxu1  ;;  %v4742_v20 = vpop.eup %3523  ;;  %v1887_v61 = vadd.f32 %v3522_v1, %v1886_v63  ;;  %3549 = vpow2.f32 %v1465_v41  ;;  %v1467_v6 = vmul.f32 1.442695, %v1343_v54  ;;  %v1344_v23 = vmul.f32 2.5, %v760_v46  ;;  %2153 = vmatpush1.xpose.msra.mxu1 %v4599_v52 }
 0x1de   : > { %v3526_v28 = vpop.eup %3525  ;;  %3551 = vpow2.f32 %v1657_v15  ;;  %v1659_v18 = vmul.f32 1.442695, %v1535_v56  ;;  %v1536_v9 = vmul.f32 2.5, %v1017_v14  ;;  %2154 = vmatprep.subr.mxu1 %v4595_v34  ;;  %v764_v36 = vpop.f32.mrf.mxu0  ;;  %v1957_v63 = vadd.f32 %v4710_v47, %v1956_v55 }
 0x1df   : > { %v1021_v22 = vpop.f32.mrf.mxu1  ;;  %v4747_v0 = vpop.eup %3527  ;;  %v1924_v25 = vadd.f32 %v3526_v28, %v1923_v13  ;;  %3553 = vpow2.f32 %v1467_v6  ;;  %v1469_v7 = vmul.f32 1.442695, %v1344_v23  ;;  %v1345_v24 = vmul.f32 2.5, %v764_v36  ;;  %v3709_v23 = vld [vmem:[%s4207_s13 + $0x58] sm:$0xff] }
 0x1e0   : > { %v3530_v27 = vpop.eup %3529  ;;  %3555 = vpow2.f32 %v1659_v18  ;;  %v1661_v52 = vmul.f32 1.442695, %v1536_v9  ;;  %v1537_v37 = vmul.f32 2.5, %v1021_v22  ;;  %v766_v21 = vpop.f32.mrf.mxu0  ;;  %v1958_v13 = vadd.f32 %v4718_v60, %v1957_v63  ;;  %v3710_v22 = vld [vmem:[%s4207_s13 + $0xd8] sm:$0xff] }
 0x1e1   : > { %v1023_v33 = vpop.f32.mrf.mxu1  ;;  %v4750_v48 = vpop.eup %3531  ;;  %v1888_v42 = vadd.f32 %v3530_v27, %v1887_v61  ;;  %3557 = vpow2.f32 %v1469_v7  ;;  %v1471_v34 = vmul.f32 1.442695, %v1345_v24  ;;  %v1346_v43 = vmul.f32 2.5, %v766_v21  ;;  %2155 = vmatpush1.xpose.msra.mxu1 %v4591_v5  ;;  %v3711_v7 = vld [vmem:[%s4207_s13 + $0xd0] sm:$0xff] }
 0x1e2   : > { %v3534_v44 = vpop.eup %3533  ;;  %3559 = vpow2.f32 %v1661_v52  ;;  %v1663_v41 = vmul.f32 1.442695, %v1537_v37  ;;  %2156 = vmatprep.subr.mxu1 %v4587_v51  ;;  %v1092_v54 = vpop.f32.mrf.mxu0  ;;  %v1538_v56 = vmul.f32 2.5, %v1023_v33  ;;  %v1995_v5 = vadd.f32 %v4723_v62, %v1994_v19 }
 0x1e3   : > { %v4756_v1 = vpop.eup %3535  ;;  %v1925_v55 = vadd.f32 %v3534_v44, %v1924_v25  ;;  %3561 = vpow2.f32 %v1471_v34  ;;  %v1473_v15 = vmul.f32 1.442695, %v1346_v43  ;;  %v1959_v14 = vadd.f32 %v4726_v29, %v1958_v13 }
 0x1e4   : > { %v3538_v46 = vpop.eup %3537  ;;  %3563 = vpow2.f32 %v1663_v41  ;;  %v1094_v61 = vpop.f32.mrf.mxu0  ;;  %v2349_v51 = vmul.f32 %v3709_v23, %v3709_v23  ;;  %v1665_v50 = vmul.f32 1.442695, %v1538_v56  ;;  %v1996_v9 = vadd.f32 %v4731_v32, %v1995_v5  ;;  %v3713_v41 = vld [vmem:[%s4207_s13 + $0xc8] sm:$0xff] }
 0x1e5   : > { %v4760_v6 = vpop.eup %3539  ;;  %v1889_v28 = vadd.f32 %v3538_v46, %v1888_v42  ;;  %3565 = vpow2.f32 %v1473_v15  ;;  %2157 = vmatpush1.xpose.msra.mxu1 %v4583_v11  ;;  %v1960_v36 = vadd.f32 %v4734_v45, %v1959_v14  ;;  %v2365_v25 = vmul.f32 %v3710_v22, %v3710_v22  ;;  %v3712_v42 = vld [vmem:[%s4207_s13 + $0x50] sm:$0xff] }
 0x1e6   : > { %v3542_v18 = vpop.eup %3541  ;;  %2158 = vmatprep.subr.mxu1 %v4579_v58  ;;  %v2364_v24 = vmul.f32 %v3711_v7, %v3711_v7  ;;  %v4769_v27 = vpop.f32.mrf.mxu0  ;;  %3567 = vpow2.f32 %v1665_v50  ;;  %v1997_v11 = vadd.f32 %v4739_v53, %v1996_v9  ;;  %v2348_v34 = vmul.f32 %v3712_v42, %v3712_v42 }
 0x1e7   : > { %v4771_v63 = vpop.eup %3543  ;;  %v1926_v52 = vadd.f32 %v3542_v18, %v1925_v55  ;;  %v1961_v21 = vadd.f32 %v4742_v20, %v1960_v36  ;;  %3171 = vmatprep.subr.mxu0 %v2365_v25  ;;  %v2363_v55 = vmul.f32 %v3713_v41, %v3713_v41  ;;  %v3999_v5 = vmov 1.0   ;;  %v3714_v18 = vld [vmem:[%s4207_s13 + $0x48] sm:$0xff] }
 0x1e8   : > { %v3546_v37 = vpop.eup %3545  ;;  %v4775_v33 = vpop.f32.mrf.mxu0  ;;  %3172 = vmatpush3.xpose.msra.mxu0 %v2349_v51  ;;  %v1998_v19 = vadd.f32 %v4747_v0, %v1997_v11  ;;  %3195 = vmatprep.mubr.f32.mxu0 %v3999_v5  ;;  %v1668_v51 = vmul.f32 2.5, %v1094_v61  ;;  %v2347_v9 = vmul.f32 %v3714_v18, %v3714_v18  ;;  %v3715_v61 = vld [vmem:[%s4207_s13 + $0xc0] sm:$0xff]  ;;  %v3719_v18 = vld [vmem:[%s4207_s13 + $0xb0] sm:$0xff] }
 0x1e9   : > { %v4777_v58 = vpop.eup %3547  ;;  %v1890_v43 = vadd.f32 %v3546_v37, %v1889_v28  ;;  %2159 = vmatpush1.xpose.msra.mxu1 %v4575_v35  ;;  %v1962_v13 = vadd.f32 %v4750_v48, %v1961_v21  ;;  %3173 = vmatprep.subr.mxu0 %v2364_v24  ;;  %v1667_v35 = vmul.f32 2.5, %v1092_v54  ;;  %v2362_v7 = vmul.f32 %v3715_v61, %v3715_v61 }
 0x1ea   : > { %v3550_v44 = vpop.eup %3549  ;;  %2160 = vmatprep.subr.mxu1 %v4570_v12  ;;  %v1104_v15 = vpop.f32.mrf.mxu0  ;;  %2196 = vmatprep.mubr.f32.mxu1 %v3999_v5  ;;  %v1999_v23 = vadd.f32 %v4756_v1, %v1998_v19 }
 0x1eb   : > { %v4785_v56 = vpop.eup %3551  ;;  %v1927_v46 = vadd.f32 %v3550_v44, %v1926_v52  ;;  %v1963_v12 = vadd.f32 %v4760_v6, %v1962_v13  ;;  %v1731_v11 = vmul.f32 1.442695, %v1667_v35  ;;  %v1733_v44 = vmul.f32 1.442695, %v1668_v51  ;;  %v3717_v13 = vld [vmem:[%s4207_s13 + $0x38] sm:$0xff] }
 0x1ec   : > { %v3554_v14 = vpop.eup %3553  ;;  %v1106_v28 = vpop.f32.mrf.mxu0  ;;  %3174 = vmatpush3.xpose.msra.mxu0 %v2348_v34  ;;  %v2000_v54 = vadd.f32 %v4771_v63, %v1999_v23  ;;  %v2345_v41 = vmul.f32 %v3717_v13, %v3717_v13 }
 0x1ed   : > { %v4791_v50 = vpop.eup %3555  ;;  %v1891_v36 = vadd.f32 %v3554_v14, %v1890_v43  ;;  %2161 = vmatpush1.xpose.msra.mxu1 %v4565_v57  ;;  %v1964_v25 = vadd.f32 %v4777_v58, %v1963_v12  ;;  %3175 = vmatprep.subr.mxu0 %v2363_v55  ;;  %v3716_v57 = vld [vmem:[%s4207_s13 + $0x40] sm:$0xff]  ;;  %v3718_v14 = vld [vmem:[%s4207_s13 + $0xb8] sm:$0xff]  ;;  %3569 = vpow2.f32 %v1731_v11  ;;  %v1672_v11 = vmul.f32 2.5, %v1106_v28 }
 0x1ee   : > { %v3558_v22 = vpop.eup %3557  ;;  %2162 = vmatprep.subr.mxu1 %v4560_v39  ;;  %v4799_v24 = vpop.f32.mrf.mxu0  ;;  %v2346_v42 = vmul.f32 %v3716_v57, %v3716_v57  ;;  %v2001_v34 = vadd.f32 %v4785_v56, %v2000_v54  ;;  %v1669_v54 = vmul.f32 2.5, %v4769_v27  ;;  %v1670_v57 = vmul.f32 2.5, %v4775_v33 }
 0x1ef   : > { %v3560_v52 = vpop.eup %3559  ;;  %v1928_v37 = vadd.f32 %v3558_v22, %v1927_v46  ;;  %v1965_v43 = vadd.f32 %v4791_v50, %v1964_v25  ;;  %v2361_v46 = vmul.f32 %v3718_v14, %v3718_v14  ;;  %v2360_v22 = vmul.f32 %v3719_v18, %v3719_v18 }
 0x1f0   : > { %v3562_v21 = vpop.eup %3561  ;;  %v1112_v39 = vpop.f32.mrf.mxu0  ;;  %3176 = vmatpush3.xpose.msra.mxu0 %v2347_v9  ;;  %v2002_v23 = vadd.f32 %v3560_v52, %v2001_v34  ;;  %3571 = vpow2.f32 %v1733_v44  ;;  %v1671_v9 = vmul.f32 2.5, %v1104_v15  ;;  %v3720_v15 = vld [vmem:[%s4207_s13 + $0x30] sm:$0xff] }
 0x1f1   : > { %v3564_v19 = vpop.eup %3563  ;;  %v1892_v55 = vadd.f32 %v3562_v21, %v1891_v36  ;;  %2163 = vmatpush1.xpose.msra.mxu1 %v4555_v4  ;;  %3177 = vmatprep.subr.mxu0 %v2362_v7  ;;  %v1735_v4 = vmul.f32 1.442695, %v1669_v54  ;;  %v1737_v7 = vmul.f32 1.442695, %v1670_v57  ;;  %v1741_v54 = vmul.f32 1.442695, %v1672_v11 }
 0x1f2   : > { %v3566_v35 = vpop.eup %3565  ;;  %v1966_v12 = vadd.f32 %v3564_v19, %v1965_v43  ;;  %v1116_v25 = vpop.f32.mrf.mxu0 }
 0x1f3   : > { %v1893_v51 = vrot.slane %v1892_v55, 4  ;;  %v1929_v61 = vadd.f32 %v3566_v35, %v1928_v37  ;;  %v3568_v36 = vpop.eup %3567  ;;  %3573 = vpow2.f32 %v1735_v4  ;;  %v1739_v37 = vmul.f32 1.442695, %v1671_v9 }
 0x1f4   : > { %v1967_v21 = vrot.slane %v1966_v12, 4  ;;  %v1118_v13 = vpop.f32.mrf.mxu0  ;;  %v2003_v43 = vadd.f32 %v3568_v36, %v2002_v23  ;;  %2164 = vmatprep.subr.mxu1 %v3568_v36  ;;  %3178 = vmatpush3.xpose.msra.mxu0 %v2346_v42  ;;  %3575 = vpow2.f32 %v1737_v7  ;;  %v1675_v11 = vmul.f32 2.5, %v1116_v25 }
 0x1f5   : > { %v1894_v14 = vadd.f32 %v1893_v51, %v1892_v55  ;;  %v1930_v34 = vrot.slane %v1929_v61, 4  ;;  %2165 = vmatpush2.xpose.msra.mxu1 %v3564_v19  ;;  %3179 = vmatprep.subr.mxu0 %v2361_v46  ;;  %v2344_v55 = vmul.f32 %v3720_v15, %v3720_v15  ;;  %3577 = vpow2.f32 %v1739_v37  ;;  %v3721_v46 = vld [vmem:[%s4207_s13 + $0xa8] sm:$0xff] }
 0x1f6   : > { %v1968_v27 = vadd.f32 %v1967_v21, %v1966_v12  ;;  %v1122_v33 = vpop.f32.mrf.mxu0  ;;  %v2004_v18 = vrot.slane %v2003_v43, 4  ;;  %2166 = vmatprep.subr.mxu1 %v3560_v52  ;;  %v2359_v28 = vmul.f32 %v3721_v46, %v3721_v46  ;;  %3579 = vpow2.f32 %v1741_v54 }
 0x1f7   : > { %v1895_v35 = vrot.slane %v1894_v14, 2  ;;  %v1931_v44 = vadd.f32 %v1930_v34, %v1929_v61  ;;  %v1673_v52 = vmul.f32 2.5, %v4799_v24  ;;  %v1674_v61 = vmul.f32 2.5, %v1112_v39  ;;  %v3723_v39 = vld [vmem:[%s4207_s13 + $0xa0] sm:$0xff] }
 0x1f8   : > { %v1969_v23 = vrot.slane %v1968_v27, 2  ;;  %v1124_v42 = vpop.f32.mrf.mxu0  ;;  %v2005_v19 = vadd.f32 %v2004_v18, %v2003_v43  ;;  %3180 = vmatpush3.xpose.msra.mxu0 %v2345_v41 }
 0x1f9   : > { %v1896_v51 = vadd.f32 %v1895_v35, %v1894_v14  ;;  %v1932_v12 = vrot.slane %v1931_v44, 2  ;;  %2167 = vmatpush2.xpose.msra.mxu1 %v4791_v50  ;;  %3181 = vmatprep.subr.mxu0 %v2360_v22  ;;  %v3722_v14 = vld [vmem:[%s4207_s13 + $0x28] sm:$0xff]  ;;  %v1743_v43 = vmul.f32 1.442695, %v1673_v52  ;;  %v1745_v7 = vmul.f32 1.442695, %v1674_v61 }
 0x1fa   : > { %v1970_v57 = vadd.f32 %v1969_v23, %v1968_v27  ;;  %v1128_v36 = vpop.f32.mrf.mxu0  ;;  %v2006_v9 = vrot.slane %v2005_v19, 2  ;;  %2168 = vmatprep.subr.mxu1 %v4785_v56  ;;  %v2343_v34 = vmul.f32 %v3722_v14, %v3722_v14  ;;  %v2358_v35 = vmul.f32 %v3723_v39, %v3723_v39  ;;  %v3570_v54 = vpop.eup %3569 }
 0x1fb   : > { %v1897_v21 = vrot.slane %v1896_v51, 1  ;;  %v1933_v4 = vadd.f32 %v1932_v12, %v1931_v44  ;;  %3581 = vpow2.f32 %v1743_v43  ;;  %v1676_v56 = vmul.f32 2.5, %v1118_v13 }
 0x1fc   : > { %v1971_v41 = vrot.slane %v1970_v57, 1  ;;  %v1130_v27 = vpop.f32.mrf.mxu0  ;;  %v2007_v22 = vadd.f32 %v2006_v9, %v2005_v19  ;;  %3182 = vmatpush3.xpose.msra.mxu0 %v2344_v55  ;;  %3583 = vpow2.f32 %v1745_v7  ;;  %v1747_v23 = vmul.f32 1.442695, %v1675_v11  ;;  %v3724_v19 = vld [vmem:[%s4207_s13 + $0x20] sm:$0xff] }
 0x1fd   : > { %v1898_v37 = vadd.f32 %v1897_v21, %v1896_v51  ;;  %v1934_v50 = vrot.slane %v1933_v4, 1  ;;  %2169 = vmatpush2.xpose.msra.mxu1 %v4777_v58  ;;  %3183 = vmatprep.subr.mxu0 %v2359_v28  ;;  %v1749_v25 = vmul.f32 1.442695, %v1676_v56  ;;  %v1677_v51 = vmul.f32 2.5, %v1122_v33  ;;  %v3572_v12 = vpop.eup %3571  ;;  %v3726_v33 = vld [vmem:[%s4207_s13 + $0x18] sm:$0xff]  ;;  %v4837_v56 = vld [vmem:[%s4207_s13 + $0x10] sm:$0xff] }
 0x1fe   : > { %v1972_v24 = vadd.f32 %v1971_v41, %v1970_v57  ;;  %v1134_v44 = vpop.f32.mrf.mxu0  ;;  %v2008_v15 = vrot.slane %v2007_v22, 1  ;;  %2170 = vmatprep.subr.mxu1 %v4771_v63  ;;  %v2342_v46 = vmul.f32 %v3724_v19, %v3724_v19  ;;  %3585 = vpow2.f32 %v1747_v23  ;;  %v3725_v63 = vld [vmem:[%s4207_s13 + $0x98] sm:$0xff] }
 0x1ff   : > { %v1935_v18 = vadd.f32 %v1934_v50, %v1933_v4  ;;  %v1678_v13 = vmul.f32 2.5, %v1124_v42  ;;  %v2357_v57 = vmul.f32 %v3725_v63, %v3725_v63  ;;  %3587 = vpow2.f32 %v1749_v25 }
 0x200   : > { %v4819_v55 = vadd.f32 %v1972_v24, %v1898_v37  ;;  %v1136_v58 = vpop.f32.mrf.mxu0  ;;  %v2009_v28 = vadd.f32 %v2008_v15, %v2007_v22  ;;  %3184 = vmatpush3.xpose.msra.mxu0 %v2343_v34  ;;  %v1751_v52 = vmul.f32 1.442695, %v1677_v51  ;;  %v1679_v61 = vmul.f32 2.5, %v1128_v36  ;;  %v3574_v4 = vpop.eup %3573 }
 0x201   : > { %2171 = vmatpush2.xpose.msra.mxu1 %v4760_v6  ;;  %3185 = vmatprep.subr.mxu0 %v2358_v35  ;;  %v2341_v9 = vmul.f32 %v3726_v33, %v3726_v33  ;;  %v1753_v34 = vmul.f32 1.442695, %v1678_v13  ;;  %v1680_v41 = vmul.f32 2.5, %v1130_v27  ;;  %v3576_v42 = vpop.eup %3575  ;;  %v2038_v43 = vadd.f32 %v3574_v4, %v3570_v54 }
 0x202   : > { %v1140_v21 = vpop.f32.mrf.mxu0  ;;  %v4825_v14 = vadd.f32 %v2009_v28, %v1935_v18  ;;  %2172 = vmatprep.subr.mxu1 %v4756_v1  ;;  %3589 = vpow2.f32 %v1751_v52  ;;  %v1755_v6 = vmul.f32 1.442695, %v1679_v61  ;;  %v3578_v37 = vpop.eup %3577  ;;  %v2075_v50 = vadd.f32 %v3576_v42, %v3572_v12  ;;  %v4832_v1 = vld [vmem:[%s4207_s13 + $0x90] sm:$0xff]  ;;  %v4843_v12 = vld [vmem:[%s4207_s13 + $0x88] sm:$0xff] }
 0x203   : > { %3591 = vpow2.f32 %v1753_v34  ;;  %v1757_v22 = vmul.f32 1.442695, %v1680_v41  ;;  %v2356_v27 = vmul.f32 %v4832_v1, %v4832_v1  ;;  %v1681_v11 = vmul.f32 2.5, %v1134_v44  ;;  %v3580_v35 = vpop.eup %3579  ;;  %v4849_v61 = vld [vmem:[%s4207_s13 + $0x8] sm:$0xff] }
 0x204   : > { %v1142_v7 = vpop.f32.mrf.mxu0  ;;  %v2014_v36 = vcombine.low %v4819_v55, %v4825_v14  ;;  %3186 = vmatpush3.xpose.msra.mxu0 %v2342_v46  ;;  %3593 = vpow2.f32 %v1755_v6  ;;  %v1682_v24 = vmul.f32 2.5, %v1136_v58  ;;  %v2340_v18 = vmul.f32 %v4837_v56, %v4837_v56 }
 0x205   : > { %2173 = vmatpush2.xpose.msra.mxu1 %v4750_v48  ;;  %3187 = vmatprep.subr.mxu0 %v2357_v57  ;;  %v378_v15 = vlaneseq  ;;  %3595 = vpow2.f32 %v1757_v22  ;;  %v2039_v48 = vadd.f32 %v3578_v37, %v2038_v43  ;;  %v1759_v23 = vmul.f32 1.442695, %v1681_v11 }
 0x206   : > { %v1146_v39 = vpop.f32.mrf.mxu0  ;;  %2174 = vmatprep.subr.mxu1 %v4747_v0  ;;  %v1761_v54 = vmul.f32 1.442695, %v1682_v24  ;;  %v1683_v25 = vmul.f32 2.5, %v1140_v21  ;;  %v4000_v44 = vmov 1966171168   ;;  %v2355_v19 = vmul.f32 %v4843_v12, %v4843_v12 }
 0x207   : > { %v2016_v58 = vunpack.c.l.s4 %v4000_v44  ;;  %v2076_v46 = vadd.f32 %v3580_v35, %v2075_v50  ;;  %v1684_v28 = vmul.f32 2.5, %v1142_v7  ;;  %3597 = vpow2.f32 %v1759_v23 }
 0x208   : > { %v1148_v51 = vpop.f32.mrf.mxu0  ;;  %3188 = vmatpush3.xpose.msra.mxu0 %v2341_v9  ;;  %v1763_v0 = vmul.f32 1.442695, %v1683_v25  ;;  %v1685_v13 = vmul.f32 2.5, %v1146_v39  ;;  %v3582_v52 = vpop.eup %3581  ;;  %v2339_v21 = vmul.f32 %v4849_v61, %v4849_v61  ;;  %3599 = vpow2.f32 %v1761_v54  ;;  %v4863_v54 = vld [vmem:[%s4207_s13] sm:$0xff] }
 0x209   : > { %2175 = vmatpush2.xpose.msra.mxu1 %v4742_v20  ;;  %3189 = vmatprep.subr.mxu0 %v2356_v27  ;;  %v1686_v63 = vmul.f32 2.5, %v1148_v51  ;;  %v1765_v4 = vmul.f32 1.442695, %v1684_v28  ;;  %v3584_v9 = vpop.eup %3583  ;;  %v2040_v20 = vadd.f32 %v3582_v52, %v2039_v48  ;;  %v2017_v50 = vunpack.c.0.s8 %v2016_v58 }
 0x20a   : > { %v1152_v57 = vpop.f32.mrf.mxu0  ;;  %2176 = vmatprep.subr.mxu1 %v4739_v53  ;;  %3601 = vpow2.f32 %v1763_v0  ;;  %v1767_v34 = vmul.f32 1.442695, %v1685_v13  ;;  %v2077_v43 = vadd.f32 %v3584_v9, %v2076_v46  ;;  %v2019_v22 = vshrl.u32 %v378_v15, 7  ;;  %v4857_v53 = vld [vmem:[%s4207_s13 + $0x80] sm:$0xff] }
 0x20b   : > { %v1687_v33 = vmul.f32 2.5, %v1152_v57  ;;  %v1769_v41 = vmul.f32 1.442695, %v1686_v63  ;;  %3603 = vpow2.f32 %v1765_v4  ;;  %v3586_v37 = vpop.eup %3585  ;;  %v2354_v27 = vmul.f32 %v4857_v53, %v4857_v53 }
 0x20c   : > { %v1154_v42 = vpop.f32.mrf.mxu0  ;;  %3190 = vmatpush3.xpose.msra.mxu0 %v2340_v18  ;;  %3605 = vpow2.f32 %v1767_v34  ;;  %v3588_v24 = vpop.eup %3587  ;;  %v2041_v39 = vadd.f32 %v3586_v37, %v2040_v20  ;;  %v2338_v25 = vmul.f32 %v4863_v54, %v4863_v54  ;;  %vm4871_vm0 = vcmp.lt.s32.totalorder %v378_v15, 256 }
 0x20d   : > { %v1771_v6 = vmul.f32 1.442695, %v1687_v33  ;;  %v1688_v7 = vmul.f32 2.5, %v1154_v42  ;;  %2177 = vmatpush2.xpose.msra.mxu1 %v4734_v45  ;;  %3191 = vmatprep.subr.mxu0 %v2355_v19  ;;  %3607 = vpow2.f32 %v1769_v41  ;;  %v2078_v48 = vadd.f32 %v3588_v24, %v2077_v43 }
 0x20e   : > { %v1158_v11 = vpop.f32.mrf.mxu0  ;;  %2178 = vmatprep.subr.mxu1 %v4731_v32  ;;  %v4867_v19 = vsub.s32 %v2017_v50, %v2019_v22  ;;  %v4001_v20 = vmov 0.0  }
 0x20f   : > { %v1773_v35 = vmul.f32 1.442695, %v1688_v7  ;;  %v1689_v18 = vmul.f32 2.5, %v1158_v11  ;;  %3609 = vpow2.f32 %v1771_v6  ;;  %v3590_v45 = vpop.eup %3589  ;;  %382 = vst.msk [vmem:[#allocation2] sm:$0x3] %vm4871_vm0, %v4001_v20 }
 0x210   : > { %v1160_v23 = vpop.f32.mrf.mxu0  ;;  %3192 = vmatpush3.xpose.msra.mxu0 %v2339_v21  ;;  %v3592_v58 = vpop.eup %3591  ;;  %v2042_v32 = vadd.f32 %v3590_v45, %v2041_v39  ;;  %383 = vst.msk [vmem:[#allocation3] sm:$0x3] %vm4871_vm0, %v4001_v20 }
 0x211   : > { %3611 = vpow2.f32 %v1773_v35  ;;  %v1775_v51 = vmul.f32 1.442695, %v1689_v18  ;;  %v1690_v44 = vmul.f32 2.5, %v1160_v23  ;;  %2179 = vmatpush2.xpose.msra.mxu1 %v4726_v29  ;;  %3193 = vmatprep.subr.mxu0 %v2354_v27  ;;  %v3594_v0 = vpop.eup %3593  ;;  %v2079_v13 = vadd.f32 %v3592_v58, %v2078_v48 }
 0x212   : > { %v1164_v46 = vpop.f32.mrf.mxu0  ;;  %2180 = vmatprep.subr.mxu1 %v4723_v62  ;;  %v3596_v52 = vpop.eup %3595  ;;  %v2043_v21 = vadd.f32 %v3594_v0, %v2042_v32  ;;  %v2021_v62 = vrot.slane %v2014_v36, %v4867_v19 }
 0x213   : > { %3613 = vpow2.f32 %v1775_v51  ;;  %v1777_v63 = vmul.f32 1.442695, %v1690_v44  ;;  %v1691_v57 = vmul.f32 2.5, %v1164_v46  ;;  %v2080_v29 = vadd.f32 %v3596_v52, %v2079_v13 }
 0x214   : > { %v1166_v4 = vpop.f32.mrf.mxu0  ;;  %3194 = vmatpush3.xpose.msra.mxu0 %v2338_v25  ;;  %v3598_v34 = vpop.eup %3597 }
 0x215   : > { %3615 = vpow2.f32 %v1777_v63  ;;  %v1779_v33 = vmul.f32 1.442695, %v1691_v57  ;;  %v1692_v9 = vmul.f32 2.5, %v1166_v4  ;;  %2181 = vmatpush2.xpose.msra.mxu1 %v4718_v60  ;;  %v3600_v43 = vpop.eup %3599  ;;  %v2044_v6 = vadd.f32 %v3598_v34, %v2043_v21 }
 0x216   : > { %v1170_v15 = vpop.f32.mrf.mxu0  ;;  %2182 = vmatprep.subr.mxu1 %v4715_v30  ;;  %v2081_v50 = vadd.f32 %v3600_v43, %v2080_v29  ;;  %v2028_v60 = vrot.slane %v2021_v62, %v4867_v19  ;;  %v1861_v23 = vld [vmem:[#allocation2] sm:$0x3] }
 0x217   : > { %3617 = vpow2.f32 %v1779_v33  ;;  %v1781_v41 = vmul.f32 1.442695, %v1692_v9  ;;  %v1693_v42 = vmul.f32 2.5, %v1170_v15  ;;  %3196 = vmatmul.mubr.f32.vlgmr.msra.gmra.mxu0 %v3999_v5  ;;  %v3602_v37 = vpop.eup %3601 }
 0x218   : > { %v1172_v7 = vpop.f32.mrf.mxu0  ;;  %v3604_v14 = vpop.eup %3603  ;;  %v2045_v36 = vadd.f32 %v3602_v37, %v2044_v6  ;;  %v2030_v46 = vadd.f32 %v2028_v60, %v1861_v23 }
 0x219   : > { %3619 = vpow2.f32 %v1781_v41  ;;  %v1783_v22 = vmul.f32 1.442695, %v1693_v42  ;;  %v1694_v55 = vmul.f32 2.5, %v1172_v7  ;;  %2183 = vmatpush2.xpose.msra.mxu1 %v4710_v47  ;;  %v3606_v27 = vpop.eup %3605  ;;  %v2082_v11 = vadd.f32 %v3604_v14, %v2081_v50 }
 0x21a   : > { %v1176_v30 = vpop.f32.mrf.mxu0  ;;  %2184 = vmatprep.subr.mxu1 %v4707_v26  ;;  %v3608_v35 = vpop.eup %3607  ;;  %v2046_v18 = vadd.f32 %v3606_v27, %v2045_v36  ;;  %2035 = vst.msk [vmem:[#allocation2] sm:$0x3] %vm4871_vm0, %v2030_v46 }
 0x21b   : > { %3621 = vpow2.f32 %v1783_v22  ;;  %v1785_v24 = vmul.f32 1.442695, %v1694_v55  ;;  %v1695_v39 = vmul.f32 2.5, %v1176_v30  ;;  %v2083_v25 = vadd.f32 %v3608_v35, %v2082_v11 }
 0x21c   : > { %v1178_v48 = vpop.f32.mrf.mxu0  ;;  %v3610_v45 = vpop.eup %3609 }
 0x21d   : > { %3623 = vpow2.f32 %v1785_v24  ;;  %v1787_v51 = vmul.f32 1.442695, %v1695_v39  ;;  %v1696_v44 = vmul.f32 2.5, %v1178_v48  ;;  %2185 = vmatpush2.xpose.msra.mxu1 %v4701_v16  ;;  %v2047_v47 = vadd.f32 %v3610_v45, %v2046_v18  ;;  %v4902_v18 = vld [vmem:[%s4194_s7 + $0xf8] sm:$0xff] }
 0x21e   : > { %v3612_v58 = vpop.eup %3611  ;;  %v1182_v32 = vpop.f32.mrf.mxu0  ;;  %2186 = vmatprep.subr.mxu1 %v4697_v10 }
 0x21f   : > { %v2084_v26 = vadd.f32 %v3612_v58, %v2083_v25  ;;  %3625 = vpow2.f32 %v1787_v51  ;;  %v1789_v0 = vmul.f32 1.442695, %v1696_v44  ;;  %v1697_v13 = vmul.f32 2.5, %v1182_v32  ;;  %v4909_v32 = vld [vmem:[%s4194_s7 + $0x78] sm:$0xff] }
 0x220   : > { %v3614_v63 = vpop.eup %3613  ;;  %v1184_v57 = vpop.f32.mrf.mxu0  ;;  %v2244_v46 = vmul.f32 %v4909_v32, %v4909_v32 }
 0x221   : > { %v2048_v52 = vadd.f32 %v3614_v63, %v2047_v47  ;;  %3627 = vpow2.f32 %v1789_v0  ;;  %v1791_v21 = vmul.f32 1.442695, %v1697_v13  ;;  %v1698_v4 = vmul.f32 2.5, %v1184_v57  ;;  %2187 = vmatpush2.xpose.msra.mxu1 %v4693_v17 }
 0x222   : > { %v3616_v29 = vpop.eup %3615  ;;  %v1188_v16 = vpop.f32.mrf.mxu0  ;;  %2188 = vmatprep.subr.mxu1 %v4691_v38 }
 0x223   : > { %v2085_v10 = vadd.f32 %v3616_v29, %v2084_v26  ;;  %3629 = vpow2.f32 %v1791_v21  ;;  %v1793_v33 = vmul.f32 1.442695, %v1698_v4  ;;  %v1699_v9 = vmul.f32 2.5, %v1188_v16  ;;  %v4914_v26 = vld [vmem:[%s4194_s7 + $0xf0] sm:$0xff] }
 0x224   : > { %v3618_v20 = vpop.eup %3617  ;;  %v1190_v62 = vpop.f32.mrf.mxu0 }
 0x225   : > { %v2049_v15 = vadd.f32 %v3618_v20, %v2048_v52  ;;  %3631 = vpow2.f32 %v1793_v33  ;;  %v1795_v34 = vmul.f32 1.442695, %v1699_v9  ;;  %v1700_v41 = vmul.f32 2.5, %v1190_v62  ;;  %2189 = vmatpush2.xpose.msra.mxu1 %v4687_v31  ;;  %v4925_v9 = vld [vmem:[%s4194_s7 + $0xe8] sm:$0xff] }
 0x226   : > { %v3620_v42 = vpop.eup %3619  ;;  %v1194_v43 = vpop.f32.mrf.mxu0  ;;  %2190 = vmatprep.subr.mxu1 %v4685_v59  ;;  %v2258_v20 = vmul.f32 %v4925_v9, %v4925_v9 }
 0x227   : > { %v2086_v17 = vadd.f32 %v3620_v42, %v2085_v10  ;;  %3633 = vpow2.f32 %v1795_v34  ;;  %v1797_v6 = vmul.f32 1.442695, %v1700_v41  ;;  %v1701_v38 = vmul.f32 2.5, %v1194_v43  ;;  %v4920_v10 = vld [vmem:[%s4194_s7 + $0x70] sm:$0xff] }
 0x228   : > { %v3622_v7 = vpop.eup %3621  ;;  %v1196_v37 = vpop.f32.mrf.mxu0  ;;  %v2243_v33 = vmul.f32 %v4920_v10, %v4920_v10 }
 0x229   : > { %v2050_v50 = vadd.f32 %v3622_v7, %v2049_v15  ;;  %3635 = vpow2.f32 %v1797_v6  ;;  %v1799_v22 = vmul.f32 1.442695, %v1701_v38  ;;  %v1702_v55 = vmul.f32 2.5, %v1196_v37  ;;  %2191 = vmatpush2.xpose.msra.mxu1 %v4681_v8  ;;  %v4931_v37 = vld [vmem:[%s4194_s7 + $0x68] sm:$0xff] }
 0x22a   : > { %v3624_v14 = vpop.eup %3623  ;;  %v1200_v60 = vpop.f32.mrf.mxu0  ;;  %2192 = vmatprep.subr.mxu1 %v4679_v40  ;;  %v2260_v8 = vmul.f32 %v4902_v18, %v4902_v18 }
 0x22b   : > { %v2087_v31 = vadd.f32 %v3624_v14, %v2086_v17  ;;  %3637 = vpow2.f32 %v1799_v22  ;;  %v1801_v59 = vmul.f32 1.442695, %v1702_v55  ;;  %v1703_v36 = vmul.f32 2.5, %v1200_v60  ;;  %v4936_v22 = vld [vmem:[%s4194_s7 + $0xe0] sm:$0xff] }
 0x22c   : > { %v3626_v30 = vpop.eup %3625  ;;  %v1202_v27 = vpop.f32.mrf.mxu0  ;;  %v2257_v55 = vmul.f32 %v4936_v22, %v4936_v22 }
 0x22d   : > { %v2051_v11 = vadd.f32 %v3626_v30, %v2050_v50  ;;  %3639 = vpow2.f32 %v1801_v59  ;;  %v1803_v24 = vmul.f32 1.442695, %v1703_v36  ;;  %v1704_v39 = vmul.f32 2.5, %v1202_v27  ;;  %2193 = vmatpush2.xpose.msra.mxu1 %v4675_v3 }
 0x22e   : > { %v3628_v35 = vpop.eup %3627  ;;  %v1206_v40 = vpop.f32.mrf.mxu0  ;;  %2194 = vmatprep.subr.mxu1 %v4673_v49  ;;  %v2259_v49 = vmul.f32 %v4914_v26, %v4914_v26  ;;  %v2242_v50 = vmul.f32 %v4931_v37, %v4931_v37 }
 0x22f   : > { %v2088_v48 = vadd.f32 %v3628_v35, %v2087_v31  ;;  %3641 = vpow2.f32 %v1803_v24  ;;  %v1805_v23 = vmul.f32 1.442695, %v1704_v39  ;;  %v1705_v45 = vmul.f32 2.5, %v1206_v40  ;;  %v4941_v35 = vld [vmem:[%s4194_s7 + $0x60] sm:$0xff]  ;;  %v4946_v40 = vld [vmem:[%s4194_s7 + $0xd8] sm:$0xff] }
 0x230   : > { %v3630_v25 = vpop.eup %3629  ;;  %v1208_v51 = vpop.f32.mrf.mxu0 }
 0x231   : > { %v2052_v44 = vadd.f32 %v3630_v25, %v2051_v11  ;;  %3643 = vpow2.f32 %v1805_v23  ;;  %v1807_v58 = vmul.f32 1.442695, %v1705_v45  ;;  %v1706_v3 = vmul.f32 2.5, %v1208_v51  ;;  %2195 = vmatpush2.xpose.msra.mxu1 %v4671_v2 }
 0x232   : > { %v3632_v47 = vpop.eup %3631  ;;  %v1212_v0 = vpop.f32.mrf.mxu0  ;;  %3129 = vmatprep.subr.mxu1 %v2260_v8  ;;  %v2241_v8 = vmul.f32 %v4941_v35, %v4941_v35 }
 0x233   : > { %v2089_v13 = vadd.f32 %v3632_v47, %v2088_v48  ;;  %3645 = vpow2.f32 %v1807_v58  ;;  %v1809_v63 = vmul.f32 1.442695, %v1706_v3  ;;  %v1707_v57 = vmul.f32 2.5, %v1212_v0  ;;  %v4951_v0 = vld [vmem:[%s4194_s7 + $0x58] sm:$0xff] }
 0x234   : > { %v3634_v52 = vpop.eup %3633  ;;  %v1214_v2 = vpop.f32.mrf.mxu0  ;;  %2197 = vmatmul.mubr.f32.vlgmr.msra.gmra.mxu1 %v3999_v5  ;;  %v2256_v48 = vmul.f32 %v4946_v40, %v4946_v40 }
 0x235   : > { %v2053_v21 = vadd.f32 %v3634_v52, %v2052_v44  ;;  %3647 = vpow2.f32 %v1809_v63  ;;  %v1811_v4 = vmul.f32 1.442695, %v1707_v57  ;;  %v1708_v29 = vmul.f32 2.5, %v1214_v2  ;;  %3130 = vmatpush3.xpose.msra.mxu1 %v2244_v46  ;;  %3161 = vmatprep.mubr.f32.mxu1 %v3999_v5  ;;  %v4956_v63 = vld [vmem:[%s4194_s7 + $0xd0] sm:$0xff] }
 0x236   : > { %v3636_v16 = vpop.eup %3635  ;;  %v1218_v62 = vpop.f32.mrf.mxu0  ;;  %3131 = vmatprep.subr.mxu1 %v2259_v49  ;;  %v2255_v57 = vmul.f32 %v4956_v63, %v4956_v63 }
 0x237   : > { %v2090_v15 = vadd.f32 %v3636_v16, %v2089_v13  ;;  %3649 = vpow2.f32 %v1811_v4  ;;  %v1813_v34 = vmul.f32 1.442695, %v1708_v29  ;;  %v1709_v41 = vmul.f32 2.5, %v1218_v62 }
 0x238   : > { %v3638_v42 = vpop.eup %3637  ;;  %v1220_v43 = vpop.f32.mrf.mxu0  ;;  %v2240_v13 = vmul.f32 %v4951_v0, %v4951_v0 }
 0x239   : > { %v2054_v17 = vadd.f32 %v3638_v42, %v2053_v21  ;;  %3651 = vpow2.f32 %v1813_v34  ;;  %v1815_v6 = vmul.f32 1.442695, %v1709_v41  ;;  %v1710_v38 = vmul.f32 2.5, %v1220_v43  ;;  %3132 = vmatpush3.xpose.msra.mxu1 %v2243_v33  ;;  %v4961_v34 = vld [vmem:[%s4194_s7 + $0x50] sm:$0xff]  ;;  %v4966_v42 = vld [vmem:[%s4194_s7 + $0xc8] sm:$0xff] }
 0x23a   : > { %v3640_v7 = vpop.eup %3639  ;;  %v1224_v14 = vpop.f32.mrf.mxu0  ;;  %3133 = vmatprep.subr.mxu1 %v2258_v20  ;;  %v2239_v41 = vmul.f32 %v4961_v34, %v4961_v34  ;;  %v2254_v43 = vmul.f32 %v4966_v42, %v4966_v42 }
 0x23b   : > { %v2091_v60 = vadd.f32 %v3640_v7, %v2090_v15  ;;  %3653 = vpow2.f32 %v1815_v6  ;;  %v1817_v31 = vmul.f32 1.442695, %v1710_v38  ;;  %v1711_v59 = vmul.f32 2.5, %v1224_v14 }
 0x23c   : > { %v3642_v36 = vpop.eup %3641  ;;  %v1226_v30 = vpop.f32.mrf.mxu0 }
 0x23d   : > { %v2055_v27 = vadd.f32 %v3642_v36, %v2054_v17  ;;  %3655 = vpow2.f32 %v1817_v31  ;;  %v1819_v11 = vmul.f32 1.442695, %v1711_v59  ;;  %v1712_v24 = vmul.f32 2.5, %v1226_v30  ;;  %3134 = vmatpush3.xpose.msra.mxu1 %v2242_v50  ;;  %v4971_v36 = vld [vmem:[%s4194_s7 + $0x48] sm:$0xff] }
 0x23e   : > { %v3644_v39 = vpop.eup %3643  ;;  %v1230_v23 = vpop.f32.mrf.mxu0  ;;  %3135 = vmatprep.subr.mxu1 %v2257_v55  ;;  %v2238_v30 = vmul.f32 %v4971_v36, %v4971_v36 }
 0x23f   : > { %v2092_v45 = vadd.f32 %v3644_v39, %v2091_v60  ;;  %3657 = vpow2.f32 %v1819_v11  ;;  %v1821_v25 = vmul.f32 1.442695, %v1712_v24  ;;  %v1713_v51 = vmul.f32 2.5, %v1230_v23 }
 0x240   : > { %v3646_v44 = vpop.eup %3645  ;;  %v1232_v58 = vpop.f32.mrf.mxu0 }
 0x241   : > { %v2056_v3 = vadd.f32 %v3646_v44, %v2055_v27  ;;  %3659 = vpow2.f32 %v1821_v25  ;;  %v1823_v47 = vmul.f32 1.442695, %v1713_v51  ;;  %v1714_v46 = vmul.f32 2.5, %v1232_v58  ;;  %3136 = vmatpush3.xpose.msra.mxu1 %v2241_v8  ;;  %v4976_v27 = vld [vmem:[%s4194_s7 + $0xc0] sm:$0xff] }
 0x242   : > { %v3648_v49 = vpop.eup %3647  ;;  %v1236_v52 = vpop.f32.mrf.mxu0  ;;  %3137 = vmatprep.subr.mxu1 %v2256_v48  ;;  %v2253_v11 = vmul.f32 %v4976_v27, %v4976_v27 }
 0x243   : > { %v2093_v2 = vadd.f32 %v3648_v49, %v2092_v45  ;;  %3661 = vpow2.f32 %v1823_v47  ;;  %v1825_v21 = vmul.f32 1.442695, %v1714_v46  ;;  %v1715_v4 = vmul.f32 2.5, %v1236_v52  ;;  %v4986_v46 = vld [vmem:[%s4194_s7 + $0xb8] sm:$0xff] }
 0x244   : > { %v3650_v29 = vpop.eup %3649  ;;  %v1238_v16 = vpop.f32.mrf.mxu0  ;;  %v2252_v49 = vmul.f32 %v4986_v46, %v4986_v46 }
 0x245   : > { %v2057_v33 = vadd.f32 %v3650_v29, %v2056_v3  ;;  %3663 = vpow2.f32 %v1825_v21  ;;  %v1827_v20 = vmul.f32 1.442695, %v1715_v4  ;;  %v1716_v62 = vmul.f32 2.5, %v1238_v16  ;;  %3138 = vmatpush3.xpose.msra.mxu1 %v2240_v13  ;;  %v4981_v3 = vld [vmem:[%s4194_s7 + $0x40] sm:$0xff] }
 0x246   : > { %v3652_v15 = vpop.eup %3651  ;;  %v1242_v17 = vpop.f32.mrf.mxu0  ;;  %3139 = vmatprep.subr.mxu1 %v2255_v57  ;;  %v2237_v47 = vmul.f32 %v4981_v3, %v4981_v3 }
 0x247   : > { %v2094_v6 = vadd.f32 %v3652_v15, %v2093_v2  ;;  %3665 = vpow2.f32 %v1827_v20  ;;  %v1829_v38 = vmul.f32 1.442695, %v1716_v62  ;;  %v1717_v7 = vmul.f32 2.5, %v1242_v17  ;;  %v4991_v62 = vld [vmem:[%s4194_s7 + $0x38] sm:$0xff] }
 0x248   : > { %v3654_v50 = vpop.eup %3653  ;;  %v1244_v55 = vpop.f32.mrf.mxu0  ;;  %v2236_v15 = vmul.f32 %v4991_v62, %v4991_v62 }
 0x249   : > { %v2058_v14 = vadd.f32 %v3654_v50, %v2057_v33  ;;  %3667 = vpow2.f32 %v1829_v38  ;;  %v1831_v60 = vmul.f32 1.442695, %v1717_v7  ;;  %v1718_v31 = vmul.f32 2.5, %v1244_v55  ;;  %3140 = vmatpush3.xpose.msra.mxu1 %v2239_v41  ;;  %v4996_v41 = vld [vmem:[%s4194_s7 + $0xb0] sm:$0xff] }
 0x24a   : > { %v3656_v59 = vpop.eup %3655  ;;  %v1248_v24 = vpop.f32.mrf.mxu0  ;;  %3141 = vmatprep.subr.mxu1 %v2254_v43  ;;  %v2251_v43 = vmul.f32 %v4996_v41, %v4996_v41 }
 0x24b   : > { %v2095_v39 = vadd.f32 %v3656_v59, %v2094_v6  ;;  %3669 = vpow2.f32 %v1831_v60  ;;  %v1833_v8 = vmul.f32 1.442695, %v1718_v31  ;;  %v1719_v48 = vmul.f32 2.5, %v1248_v24  ;;  %v5006_v24 = vld [vmem:[%s4194_s7 + $0xa8] sm:$0xff] }
 0x24c   : > { %v3658_v23 = vpop.eup %3657  ;;  %v1250_v45 = vpop.f32.mrf.mxu0 }
 0x24d   : > { %v2059_v25 = vadd.f32 %v3658_v23, %v2058_v14  ;;  %3671 = vpow2.f32 %v1833_v8  ;;  %v1835_v51 = vmul.f32 1.442695, %v1719_v48  ;;  %v1720_v44 = vmul.f32 2.5, %v1250_v45  ;;  %3142 = vmatpush3.xpose.msra.mxu1 %v2238_v30  ;;  %v5001_v30 = vld [vmem:[%s4194_s7 + $0x30] sm:$0xff] }
 0x24e   : > { %v3660_v58 = vpop.eup %3659  ;;  %v1254_v13 = vpop.f32.mrf.mxu0  ;;  %3143 = vmatprep.subr.mxu1 %v2253_v11  ;;  %v2235_v11 = vmul.f32 %v5001_v30, %v5001_v30 }
 0x24f   : > { %v2096_v57 = vadd.f32 %v3660_v58, %v2095_v39  ;;  %3673 = vpow2.f32 %v1835_v51  ;;  %v1837_v52 = vmul.f32 1.442695, %v1720_v44  ;;  %v1721_v2 = vmul.f32 2.5, %v1254_v13  ;;  %v5011_v13 = vld [vmem:[%s4194_s7 + $0x28] sm:$0xff] }
 0x250   : > { %v3662_v21 = vpop.eup %3661  ;;  %v1256_v4 = vpop.f32.mrf.mxu0  ;;  %v2250_v39 = vmul.f32 %v5006_v24, %v5006_v24 }
 0x251   : > { %v2060_v29 = vadd.f32 %v3662_v21, %v2059_v25  ;;  %3675 = vpow2.f32 %v1837_v52  ;;  %v1839_v16 = vmul.f32 1.442695, %v1721_v2  ;;  %v1722_v33 = vmul.f32 2.5, %v1256_v4  ;;  %3144 = vmatpush3.xpose.msra.mxu1 %v2237_v47  ;;  %v5016_v52 = vld [vmem:[%s4194_s7 + $0xa0] sm:$0xff] }
 0x252   : > { %v3664_v20 = vpop.eup %3663  ;;  %v1260_v17 = vpop.f32.mrf.mxu0  ;;  %3145 = vmatprep.subr.mxu1 %v2252_v49  ;;  %v2249_v2 = vmul.f32 %v5016_v52, %v5016_v52 }
 0x253   : > { %v2097_v6 = vadd.f32 %v3664_v20, %v2096_v57  ;;  %3677 = vpow2.f32 %v1839_v16  ;;  %v1841_v38 = vmul.f32 1.442695, %v1722_v33  ;;  %v1723_v7 = vmul.f32 2.5, %v1260_v17 }
 0x254   : > { %v3666_v50 = vpop.eup %3665  ;;  %v1262_v55 = vpop.f32.mrf.mxu0  ;;  %v2234_v57 = vmul.f32 %v5011_v13, %v5011_v13 }
 0x255   : > { %v2061_v14 = vadd.f32 %v3666_v50, %v2060_v29  ;;  %3679 = vpow2.f32 %v1841_v38  ;;  %v1843_v60 = vmul.f32 1.442695, %v1723_v7  ;;  %v1724_v31 = vmul.f32 2.5, %v1262_v55  ;;  %3146 = vmatpush3.xpose.msra.mxu1 %v2236_v15  ;;  %v5021_v38 = vld [vmem:[%s4194_s7 + $0x20] sm:$0xff]  ;;  %v5026_v50 = vld [vmem:[%s4194_s7 + $0x98] sm:$0xff] }
 0x256   : > { %v3668_v59 = vpop.eup %3667  ;;  %v1266_v8 = vpop.f32.mrf.mxu0  ;;  %3147 = vmatprep.subr.mxu1 %v2251_v43  ;;  %v2233_v7 = vmul.f32 %v5021_v38, %v5021_v38  ;;  %v2248_v55 = vmul.f32 %v5026_v50, %v5026_v50 }
 0x257   : > { %v2098_v48 = vadd.f32 %v3668_v59, %v2097_v6  ;;  %3681 = vpow2.f32 %v1843_v60  ;;  %v1845_v23 = vmul.f32 1.442695, %v1724_v31  ;;  %v1725_v45 = vmul.f32 2.5, %v1266_v8 }
 0x258   : > { %v3670_v25 = vpop.eup %3669  ;;  %v1268_v51 = vpop.f32.mrf.mxu0 }
 0x259   : > { %v2062_v44 = vadd.f32 %v3670_v25, %v2061_v14  ;;  %3683 = vpow2.f32 %v1845_v23  ;;  %v1847_v58 = vmul.f32 1.442695, %v1725_v45  ;;  %v1726_v47 = vmul.f32 2.5, %v1268_v51  ;;  %3148 = vmatpush3.xpose.msra.mxu1 %v2235_v11  ;;  %v5031_v25 = vld [vmem:[%s4194_s7 + $0x18] sm:$0xff] }
 0x25a   : > { %v3672_v49 = vpop.eup %3671  ;;  %v1272_v21 = vpop.f32.mrf.mxu0  ;;  %3149 = vmatprep.subr.mxu1 %v2250_v39  ;;  %v2232_v51 = vmul.f32 %v5031_v25, %v5031_v25 }
 0x25b   : > { %v2099_v4 = vadd.f32 %v3672_v49, %v2098_v48  ;;  %3685 = vpow2.f32 %v1847_v58  ;;  %v1849_v29 = vmul.f32 1.442695, %v1726_v47  ;;  %v1727_v16 = vmul.f32 2.5, %v1272_v21 }
 0x25c   : > { %v3674_v33 = vpop.eup %3673  ;;  %v1274_v20 = vpop.f32.mrf.mxu0 }
 0x25d   : > { %v2063_v15 = vadd.f32 %v3674_v33, %v2062_v44  ;;  %3687 = vpow2.f32 %v1849_v29  ;;  %v1851_v43 = vmul.f32 1.442695, %v1727_v16  ;;  %v1728_v17 = vmul.f32 2.5, %v1274_v20  ;;  %3150 = vmatpush3.xpose.msra.mxu1 %v2234_v57  ;;  %v5036_v44 = vld [vmem:[%s4194_s7 + $0x90] sm:$0xff]  ;;  %v5046_v16 = vld [vmem:[%s4194_s7 + $0x88] sm:$0xff] }
 0x25e   : > { %v3676_v6 = vpop.eup %3675  ;;  %v1278_v14 = vpop.f32.mrf.mxu0  ;;  %3151 = vmatprep.subr.mxu1 %v2249_v2  ;;  %v2247_v58 = vmul.f32 %v5036_v44, %v5036_v44  ;;  %v2246_v33 = vmul.f32 %v5046_v16, %v5046_v16 }
 0x25f   : > { %v2100_v60 = vadd.f32 %v3676_v6, %v2099_v4  ;;  %3689 = vpow2.f32 %v1851_v43  ;;  %v1853_v31 = vmul.f32 1.442695, %v1728_v17  ;;  %v1729_v59 = vmul.f32 2.5, %v1278_v14  ;;  %v5041_v4 = vld [vmem:[%s4194_s7 + $0x10] sm:$0xff]  ;;  %v5051_v6 = vld [vmem:[%s4194_s7 + $0x8] sm:$0xff] }
 0x260   : > { %v3678_v11 = vpop.eup %3677  ;;  %v1280_v39 = vpop.f32.mrf.mxu0  ;;  %v2231_v29 = vmul.f32 %v5041_v4, %v5041_v4 }
 0x261   : > { %v2064_v8 = vadd.f32 %v3678_v11, %v2063_v15  ;;  %3691 = vpow2.f32 %v1853_v31  ;;  %v1855_v48 = vmul.f32 1.442695, %v1729_v59  ;;  %v1730_v23 = vmul.f32 2.5, %v1280_v39  ;;  %3152 = vmatpush3.xpose.msra.mxu1 %v2233_v7  ;;  %v5061_v39 = vld [vmem:[%s4194_s7] sm:$0xff] }
 0x262   : > { %v3680_v45 = vpop.eup %3679  ;;  %3153 = vmatprep.subr.mxu1 %v2248_v55  ;;  %v2230_v7 = vmul.f32 %v5051_v6, %v5051_v6  ;;  %v5056_v55 = vld [vmem:[%s4194_s7 + $0x80] sm:$0xff] }
 0x263   : > { %v2101_v47 = vadd.f32 %v3680_v45, %v2100_v60  ;;  %3693 = vpow2.f32 %v1855_v48  ;;  %v1857_v49 = vmul.f32 1.442695, %v1730_v23  ;;  %v2245_v14 = vmul.f32 %v5056_v55, %v5056_v55  ;;  %v3765_v48 = vld [vmem:[%s4207_s13 + $0xf8] sm:$0xff] }
 0x264   : > { %v3682_v57 = vpop.eup %3681  ;;  %v2478_v23 = vmul.f32 %v3765_v48, %v4902_v18 }
 0x265   : > { %v2065_v2 = vadd.f32 %v3682_v57, %v2064_v8  ;;  %3695 = vpow2.f32 %v1857_v49  ;;  %3154 = vmatpush3.xpose.msra.mxu1 %v2232_v51  ;;  %v2229_v8 = vmul.f32 %v5061_v39, %v5061_v39  ;;  %v3766_v49 = vld [vmem:[%s4207_s13 + $0x78] sm:$0xff] }
 0x266   : > { %v3684_v21 = vpop.eup %3683  ;;  %3155 = vmatprep.subr.mxu1 %v2247_v58  ;;  %v2462_v57 = vmul.f32 %v3766_v49, %v4909_v32  ;;  %v3769_v32 = vld [vmem:[%s4207_s13 + $0xe8] sm:$0xff] }
 0x267   : > { %v2102_v20 = vadd.f32 %v3684_v21, %v2101_v47 }
 0x268   : > { %v3686_v15 = vpop.eup %3685 }
 0x269   : > { %v2066_v43 = vadd.f32 %v3686_v15, %v2065_v2  ;;  %3156 = vmatpush3.xpose.msra.mxu1 %v2231_v29  ;;  %v3767_v2 = vld [vmem:[%s4207_s13 + $0xf0] sm:$0xff] }
 0x26a   : > { %v3688_v17 = vpop.eup %3687  ;;  %3157 = vmatprep.subr.mxu1 %v2246_v33  ;;  %v2477_v21 = vmul.f32 %v3767_v2, %v4914_v26  ;;  %v3768_v15 = vld [vmem:[%s4207_s13 + $0x70] sm:$0xff] }
 0x26b   : > { %v2103_v60 = vadd.f32 %v3688_v17, %v2102_v20  ;;  %v2476_v17 = vmul.f32 %v3769_v32, %v4925_v9  ;;  %v3772_v9 = vld [vmem:[%s4207_s13 + $0x60] sm:$0xff]  ;;  %v3775_v2 = vld [vmem:[%s4207_s13 + $0xd0] sm:$0xff] }
 0x26c   : > { %v3690_v31 = vpop.eup %3689  ;;  %v3779_v32 = vld [vmem:[%s4207_s13 + $0xc0] sm:$0xff] }
 0x26d   : > { %v2067_v59 = vadd.f32 %v3690_v31, %v2066_v43  ;;  %3158 = vmatpush3.xpose.msra.mxu1 %v2230_v7  ;;  %v2461_v43 = vmul.f32 %v3768_v15, %v4920_v10  ;;  %v3770_v31 = vld [vmem:[%s4207_s13 + $0x68] sm:$0xff]  ;;  %v3771_v10 = vld [vmem:[%s4207_s13 + $0xe0] sm:$0xff] }
 0x26e   : > { %v3692_v11 = vpop.eup %3691  ;;  %3159 = vmatprep.subr.mxu1 %v2245_v14 }
 0x26f   : > { %v2104_v45 = vadd.f32 %v3692_v11, %v2103_v60  ;;  %v2475_v11 = vmul.f32 %v3771_v10, %v4936_v22  ;;  %v3786_v10 = vld [vmem:[%s4207_s13 + $0x28] sm:$0xff] }
 0x270   : > { %v3694_v51 = vpop.eup %3693 }
 0x271   : > { %v2068_v58 = vadd.f32 %v3694_v51, %v2067_v59  ;;  %3160 = vmatpush3.xpose.msra.mxu1 %v2229_v8  ;;  %v2460_v59 = vmul.f32 %v3770_v31, %v4931_v37  ;;  %v2459_v51 = vmul.f32 %v3772_v9, %v4941_v35  ;;  %v3784_v31 = vld [vmem:[%s4207_s13 + $0x30] sm:$0xff] }
 0x272   : > { %v3696_v47 = vpop.eup %3695  ;;  %3197 = vmatprep.subr.mxu1 %v2478_v23 }
 0x273   : > { %v2069_v29 = vrot.slane %v2068_v58, 4  ;;  %v2105_v33 = vadd.f32 %v3696_v47, %v2104_v45 }
 0x274   : > { %3162 = vmatmul.mubr.f32.vlgmr.msra.gmra.mxu1 %v3999_v5 }
 0x275   : > { %v2070_v18 = vadd.f32 %v2069_v29, %v2068_v58  ;;  %v2106_v20 = vrot.slane %v2105_v33, 4  ;;  %3198 = vmatpush3.xpose.msra.mxu1 %v2462_v57  ;;  %3229 = vmatprep.mubr.f32.mxu1 %v3999_v5  ;;  %v3773_v58 = vld [vmem:[%s4207_s13 + $0xd8] sm:$0xff] }
 0x276   : > { %3199 = vmatprep.subr.mxu1 %v2477_v21  ;;  %v2474_v37 = vmul.f32 %v3773_v58, %v4946_v40  ;;  %v3774_v57 = vld [vmem:[%s4207_s13 + $0x58] sm:$0xff]  ;;  %v2473_v21 = vmul.f32 %v3775_v2, %v4956_v63  ;;  %v3776_v40 = vld [vmem:[%s4207_s13 + $0x50] sm:$0xff]  ;;  %v3778_v63 = vld [vmem:[%s4207_s13 + $0x48] sm:$0xff] }
 0x277   : > { %v2071_v26 = vrot.slane %v2070_v18, 2  ;;  %v2107_v7 = vadd.f32 %v2106_v20, %v2105_v33  ;;  %v2458_v22 = vmul.f32 %v3774_v57, %v4951_v0  ;;  %v2037_v29 = vld [vmem:[#allocation3] sm:$0x3]  ;;  %v3777_v0 = vld [vmem:[%s4207_s13 + $0xc8] sm:$0xff] }
 0x278   : > { %v2472_v20 = vmul.f32 %v3777_v0, %v4966_v42  ;;  %v3781_v42 = vld [vmem:[%s4207_s13 + $0xb8] sm:$0xff] }
 0x279   : > { %v2072_v14 = vadd.f32 %v2071_v26, %v2070_v18  ;;  %v2108_v60 = vrot.slane %v2107_v7, 2  ;;  %3200 = vmatpush3.xpose.msra.mxu1 %v2461_v43  ;;  %v2457_v18 = vmul.f32 %v3776_v40, %v4961_v34  ;;  %v2456_v43 = vmul.f32 %v3778_v63, %v4971_v36 }
 0x27a   : > { %3201 = vmatprep.subr.mxu1 %v2476_v17  ;;  %v2471_v34 = vmul.f32 %v3779_v32, %v4976_v27  ;;  %v3780_v17 = vld [vmem:[%s4207_s13 + $0x40] sm:$0xff] }
 0x27b   : > { %v2073_v8 = vrot.slane %v2072_v14, 1  ;;  %v2109_v48 = vadd.f32 %v2108_v60, %v2107_v7  ;;  %v2455_v26 = vmul.f32 %v3780_v17, %v4981_v3  ;;  %v2470_v7 = vmul.f32 %v3781_v42, %v4986_v46  ;;  %v3783_v60 = vld [vmem:[%s4207_s13 + $0xb0] sm:$0xff] }
 0x27c   : > { %v2469_v27 = vmul.f32 %v3783_v60, %v4996_v41  ;;  %v2453_v3 = vmul.f32 %v3784_v31, %v5001_v30  ;;  %v3789_v30 = vld [vmem:[%s4207_s13 + $0x98] sm:$0xff] }
 0x27d   : > { %v2074_v23 = vadd.f32 %v2073_v8, %v2072_v14  ;;  %v2110_v45 = vrot.slane %v2109_v48, 1  ;;  %3202 = vmatpush3.xpose.msra.mxu1 %v2460_v59  ;;  %v3782_v14 = vld [vmem:[%s4207_s13 + $0x38] sm:$0xff]  ;;  %v3785_v59 = vld [vmem:[%s4207_s13 + $0xa8] sm:$0xff] }
 0x27e   : > { %3203 = vmatprep.subr.mxu1 %v2475_v11  ;;  %v2454_v36 = vmul.f32 %v3782_v14, %v4991_v62  ;;  %v2468_v46 = vmul.f32 %v3785_v59, %v5006_v24  ;;  %v2452_v11 = vmul.f32 %v3786_v10, %v5011_v13  ;;  %v3787_v62 = vld [vmem:[%s4207_s13 + $0xa0] sm:$0xff]  ;;  %v2465_v24 = vmul.f32 %v5036_v44, %v4832_v1 }
 0x27f   : > { %v2111_v47 = vadd.f32 %v2110_v45, %v2109_v48  ;;  %v2467_v8 = vmul.f32 %v3787_v62, %v5016_v52  ;;  %v3788_v48 = vld [vmem:[%s4207_s13 + $0x20] sm:$0xff]  ;;  %v3790_v45 = vld [vmem:[%s4207_s13 + $0x18] sm:$0xff]  ;;  %v2449_v13 = vmul.f32 %v5041_v4, %v4837_v56  ;;  %v2464_v52 = vmul.f32 %v5046_v16, %v4843_v12 }
 0x280   : > { %v2451_v41 = vmul.f32 %v3788_v48, %v5021_v38  ;;  %v2450_v9 = vmul.f32 %v3790_v45, %v5031_v25  ;;  %v2448_v38 = vmul.f32 %v5051_v6, %v4849_v61  ;;  %v2447_v25 = vmul.f32 %v5061_v39, %v4863_v54 }
 0x281   : > { %v2114_v49 = vcombine.low %v2074_v23, %v2111_v47  ;;  %3204 = vmatpush3.xpose.msra.mxu1 %v2459_v51  ;;  %v2466_v23 = vmul.f32 %v3789_v30, %v5026_v50  ;;  %v2463_v50 = vmul.f32 %v5056_v55, %v4857_v53 }
 0x282   : > { %3205 = vmatprep.subr.mxu1 %v2474_v37 }
 0x283   : > { %v2121_v35 = vrot.slane %v2114_v49, %v4867_v19 }
 0x285   : > { %v2128_v33 = vrot.slane %v2121_v35, %v4867_v19  ;;  %3206 = vmatpush3.xpose.msra.mxu1 %v2458_v22 }
 0x286   : > { %3207 = vmatprep.subr.mxu1 %v2473_v21 }
 0x287   : > { %v2130_v15 = vadd.f32 %v2128_v33, %v2037_v29 }
 0x289   : > { %2131 = vst.msk [vmem:[#allocation3] sm:$0x3] %vm4871_vm0, %v2130_v15  ;;  %3208 = vmatpush3.xpose.msra.mxu1 %v2457_v18 }
 0x28a   : > { %3209 = vmatprep.subr.mxu1 %v2472_v20 }
 0x28d   : > { %3210 = vmatpush3.xpose.msra.mxu1 %v2456_v43  ;;  %v2552_v43 = vld [vmem:[#allocation2] sm:$0x3] }
 0x28e   : > { %3211 = vmatprep.subr.mxu1 %v2471_v34 }
 0x290   : > { %v2205_v39 = vld [vmem:[#allocation3] sm:$0x3] }
 0x291   : > { %3212 = vmatpush3.xpose.msra.mxu1 %v2455_v26 }
 0x292   : > { %3213 = vmatprep.subr.mxu1 %v2470_v7 }
 0x295   : > { %3214 = vmatpush3.xpose.msra.mxu1 %v2454_v36 }
 0x296   : > { %3215 = vmatprep.subr.mxu1 %v2469_v27 }
 0x299   : > { %3216 = vmatpush3.xpose.msra.mxu1 %v2453_v3 }
 0x29a   : > { %3217 = vmatprep.subr.mxu1 %v2468_v46 }
 0x29d   : > { %3218 = vmatpush3.xpose.msra.mxu1 %v2452_v11 }
 0x29e   : > { %3219 = vmatprep.subr.mxu1 %v2467_v8 }
 0x2a1   : > { %3220 = vmatpush3.xpose.msra.mxu1 %v2451_v41 }
 0x2a2   : > { %3221 = vmatprep.subr.mxu1 %v2466_v23 }
 0x2a5   : > { %3222 = vmatpush3.xpose.msra.mxu1 %v2450_v9 }
 0x2a6   : > { %3223 = vmatprep.subr.mxu1 %v2465_v24 }
 0x2a9   : > { %3224 = vmatpush3.xpose.msra.mxu1 %v2449_v13 }
 0x2aa   : > { %3225 = vmatprep.subr.mxu1 %v2464_v52 }
 0x2ad   : > { %3226 = vmatpush3.xpose.msra.mxu1 %v2448_v38 }
 0x2ae   : > { %3227 = vmatprep.subr.mxu1 %v2463_v50 }
 0x2b1   : > { %3228 = vmatpush3.xpose.msra.mxu1 %v2447_v25 }
 0x2b4   : > { %3230 = vmatmul.mubr.f32.vlgmr.msra.gmra.mxu1 %v3999_v5 }
 0x2d7   : > { %v2436_v1 = vpop.f32.mrf.mxu0 }
 0x2d8   : > { %v2441_v44 = vmul.f32 2.5, %v2436_v1 }
 0x2d9   : > { %v2438_v56 = vpop.f32.mrf.mxu0 }
 0x2da   : > { %v2442_v12 = vmul.f32 2.5, %v2438_v56  ;;  %v2443_v4 = vmul.f32 1.442695, %v2441_v44 }
 0x2dc   : > { %v2445_v16 = vmul.f32 1.442695, %v2442_v12  ;;  %3697 = vpow2.f32 %v2443_v4 }
 0x2de   : > { %3699 = vpow2.f32 %v2445_v16 }
 0x2e9   : > { %v3698_v51 = vpop.eup %3697 }
 0x2eb   : > { %v3700_v55 = vpop.eup %3699 }
 0x2ec   : > { %v2576_v58 = vcombine.low %v3698_v51, %v3700_v55 }
 0x2ee   : > { %v2583_v47 = vrot.slane %v2576_v58, %v4867_v19 }
 0x2f0   : > { %v2590_v49 = vrot.slane %v2583_v47, %v4867_v19 }
 0x2f4   : > { %v2198_v61 = vpop.f32.mrf.mxu1 }
 0x2f6   : > { %v2200_v6 = vpop.f32.mrf.mxu1 }
 0x2f7   : > { %v2208_v53 = vcombine.low %v2198_v61, %v2200_v6 }
 0x2f9   : > { %v2215_v54 = vrot.slane %v2208_v53, %v4867_v19 }
 0x2fb   : > { %v2222_v37 = vrot.slane %v2215_v54, %v4867_v19 }
 0x2fd   : > { %v2224_v5 = vadd.f32 %v2222_v37, %v2205_v39 }
 0x2ff   : > { %2225 = vst.msk [vmem:[#allocation3] sm:$0x3] %vm4871_vm0, %v2224_v5 }
 0x306   : > { %v2573_v57 = vld [vmem:[#allocation3] sm:$0x3] }
 0x307   : > { %v2592_v22 = vsub.f32 %v2573_v57, %v2590_v49 }
 0x309   : > { %2593 = vst.msk [vmem:[#allocation3] sm:$0x3] %vm4871_vm0, %v2592_v22 }
 0x310   : > { %v2619_v17 = vld [vmem:[#allocation3] sm:$0x3] }
 0x334   : > { %v2327_v2 = vpop.f32.mrf.mxu1 }
 0x335   : > { %v2332_v21 = vmul.f32 2.5, %v2327_v2 }
 0x336   : > { %v2329_v35 = vpop.f32.mrf.mxu1 }
 0x337   : > { %v2334_v29 = vmul.f32 1.442695, %v2332_v21  ;;  %v2333_v33 = vmul.f32 2.5, %v2329_v35 }
 0x339   : > { %3701 = vpow2.f32 %v2334_v29  ;;  %v2336_v40 = vmul.f32 1.442695, %v2333_v33 }
 0x33b   : > { %3703 = vpow2.f32 %v2336_v40 }
 0x346   : > { %v3702_v18 = vpop.eup %3701 }
 0x348   : > { %v3704_v0 = vpop.eup %3703 }
 0x349   : > { %v2555_v20 = vcombine.low %v3702_v18, %v3704_v0 }
 0x34b   : > { %v2562_v15 = vrot.slane %v2555_v20, %v4867_v19 }
 0x34d   : > { %v2569_v63 = vrot.slane %v2562_v15, %v4867_v19 }
 0x34f   : > { %v2571_v32 = vsub.f32 %v2552_v43, %v2569_v63 }
 0x351   : > { %2572 = vst.msk [vmem:[#allocation2] sm:$0x3] %vm4871_vm0, %v2571_v32 }
 0x358   : > { %v2616_v34 = vld [vmem:[#allocation2] sm:$0x3] }
 0x359   : > { %3705 = vlog2.f32 %v2616_v34 }
 0x35a   : > { %3707 = vlog2.f32 %v2619_v17 }
 0x366   : > { %v3706_v60 = vpop.eup %3705 }
 0x367   : > { %v3708_v31 = vpop.eup %3707  ;;  %v2618_v59 = vmul.f32 0.6931472, %v3706_v60 }
 0x368   : > { %v2621_v46 = vmul.f32 0.6931472, %v3708_v31 }
 0x36a   : > { %v2622_v10 = vadd.f32 %v2621_v46, %v2618_v59 }
 0x36c   : > { %v2623_v11 = vmul.f32 0.5, %v2622_v10 }
 0x374   : > { %v2545_v26 = vpop.f32.mrf.mxu1 }
 0x375   : > { %v2550_v7 = vmul.f32 2.5, %v2545_v26 }
 0x376   : > { %v2547_v42 = vpop.f32.mrf.mxu1 }
 0x377   : > { %v2551_v14 = vmul.f32 2.5, %v2547_v42 }
 0x379   : > { %v2596_v36 = vcombine.low %v2550_v7, %v2551_v14 }
 0x37b   : > { %v2603_v27 = vrot.slane %v2596_v36, %v4867_v19 }
 0x37d   : > { %v2610_v3 = vrot.slane %v2603_v27, %v4867_v19 }
 0x37f   : > { %2613 = vst.msk [vmem:[#allocation4] sm:$0x3] %vm4871_vm0, %v2610_v3 }
 0x386   : > { %v2624_v62 = vld [vmem:[#allocation4] sm:$0x3] }
 0x387   : > { %v2625_v8 = vsub.f32 %v2623_v11, %v2624_v62 }
 0x389   : > { %2626 = vst.msk [vmem:[%s367_s26] sm:$0x3] %vm4871_vm0, %v2625_v8 }
 0x38a   : > { %3916 = shalt.err (!%p3913_p13)
}
 0x38b   : > { %s3917_s17 = scalar_lea.hbm %s2640_s25, 32  ;;  %s3921_s6 = scalar_lea.hbm %s5199_s4, 64 }
 0x38c   : > { %p3918_p12 = scmp.ne.s32.totalorder %s2640_s25, %s3917_s17  ;;  %p3922_p5 = scmp.lt.s32.totalorder %s2640_s25, %s5199_s4 }
 0x38d   : > { %p3923_p6 = scmp.lt.s32.totalorder %s3921_s6, %s3917_s17 }
 0x38e   : > { %p3919_p1 = pnand %p3918_p12, %p4083_p9 }
 0x38f   : > { %p3924_p8 = por %p3923_p6, %p3922_p5 }
 0x390   : > { %p3920_p2 = pneg %p3919_p1 }
 0x392   : > { %p3925_p0 = pnand %p3924_p8, %p3920_p2 }
 0x394   : > { %3928 = shalt.err (!%p3925_p0)
}
 0x395   : > { %3239 = dma.vmem_to_hbm [thread:$0]  (%p4083_p9), %s2643_s12, 32, %s2640_s25, %s2628_s30  }
 0x396 PF: > { %s2654_s9 = sand.u32 1, %s3971_s15   ;;  %p5223_p3 = scmp.ge.s32.totalorder %s3991_s20, 2 }
 0x397   : > { %s2655_s13 = scalar_lea.sflag [#allocation7], %s2654_s9 }
 0x398   : > { %p3255_p4 = pnand %p5223_p3, %p4090_p11 }
 0x39a   : > { %p3256_p7 = pneg %p3255_p4 }
 0x39c   : > { %3966 = dma.done.wait (%p3256_p7), %s2655_s13, 32  }
 0x39d   : > { %3968 = vsyncadd (%p3256_p7), %s2655_s13, 4294967264  ;;  %s26_s20 = sadd.s32 1, %s3991_s20   ;;  %s5224_s19 = sld [smem:[#allocation18_spill]] }
 0x39e   : > { %p23_p10 = scmp.ge.s32.totalorder %s26_s20, 4   ;;  %s5225_s17 = sld [smem:[#allocation21_spill]] }
 0x39f   : > { %s5226_s18 = sld [smem:[#allocation19_spill]]  ;;  %s5228_s15 = smov %s3975_s16 }
 0x3a0   : > { %s5227_s28 = sld [smem:[#allocation20_spill]] }
 0x3a2   :  { %25 = sbr.rel (!%p23_p10) target bundleno = 12 (0xc), region = 134 }
 0x3a3   : > { %s5229_s16 = smov %s5224_s19 }
 0x3a6   : > { %s5230_s19 = smov %s5227_s28 }
 0x3a7   :  { %2660 = vsyncpa [#allocation6], 1 }
 0x3a8   :  { %2662 = vsyncpa [#allocation6 + $0x1], 1 }
 0x3a9   :  { %2663 = vsyncpa [#allocation9], 1 }
 0x3aa   :  { %2665 = vsyncpa [#allocation9 + $0x1], 1 }
 0x3ab   :  { %2666 = vsyncpa [#allocation12], 1 }
 0x3ac   :  { %2668 = vsyncpa [#allocation12 + $0x1], 1 }
 0x3ad   :  { %2669 = vsyncpa [#allocation7], 1 }
 0x3ae   :  { %2671 = vsyncpa [#allocation7 + $0x1], 1 }

</bundles_post_ra>
